<compile_context>
chip_gen: v7x
topology: tpu7x:2x2x1
jax: 0.10.0
libtpu: 0.0.40
codegen_flags: <defaults>
</compile_context>

<pallas_src>
import math

import numpy as np
import jax
import jax.numpy as jnp
from jax import lax
from jax.experimental import pallas as pl
from jax.experimental.pallas import tpu as pltpu


def _round_up(x, m):
    return (x + m - 1) // m * m


def build_unet_mnist(N, inshape, nb_features, ndim):
    H, W = inshape
    assert H % 4 == 0 and W % 4 == 0, "two 2x pooling levels need H,W % 4 == 0"
    enc_nf, dec_full = nb_features
    assert len(enc_nf) == 2 and len(dec_full) == 3, (
        "fused kernel is specialized to 2 encoder levels + 1 remaining conv")
    E0, E1 = enc_nf                  # encoder conv widths
    D0, D1, R0 = dec_full            # decoder conv widths + remaining conv width
    C_IN, NDIM = 2, ndim
    C_PACK = _round_up(C_IN, 8)      # pad input channels to a sublane multiple

    # spatial sizes per pyramid level (0 = full resolution)
    HW = [(H, W), (H // 2, W // 2), (H // 4, W // 4)]
    WP = [w + 2 for (_, w) in HW]                 # padded row width per level
    P = [(h + 2) * (w + 2) for (h, w) in HW]      # padded flat size per level
    L = [_round_up(p, 128) for p in P]            # lane-rounded flat size
    WP0, WP1, WP2 = WP
    L0, L1, L2 = L

    # conv plan (true cin, cout) in execution order: enc0, enc1, dec0, dec1, rem, flow
    conv_dims = [(C_IN, E0), (E0, E1), (E1, D0),
                 (D0 + E1, D1), (D1 + E0, R0), (R0, NDIM)]
    # cin as seen by the kernel (first conv input is zero-padded to C_PACK chans)
    cin_spec = [C_PACK] + [c for c, _ in conv_dims[1:]]

    # ------- constant 0/1 gather matrices (pool re-pack + nearest upsample) ------
    def pool_matrix(lvl):            # level lvl -> lvl+1 (anchor gather + re-pack)
        hd, wd = HW[lvl + 1]
        S = np.zeros((L[lvl], L[lvl + 1]), np.float32)
        for i in range(hd):
            for j in range(wd):
                S[(2 * i + 1) * WP[lvl] + (2 * j + 1),
                  (i + 1) * WP[lvl + 1] + (j + 1)] = 1.0
        return jnp.asarray(S)

    def up_matrix(lvl):              # level lvl+1 -> lvl (nearest 2x upsample)
        hd, wd = HW[lvl]
        U = np.zeros((L[lvl + 1], L[lvl]), np.float32)
        for i in range(hd):
            for j in range(wd):
                U[(i // 2 + 1) * WP[lvl + 1] + (j // 2 + 1),
                  (i + 1) * WP[lvl] + (j + 1)] = 1.0
        return jnp.asarray(U)

    def interior_mask(lvl):
        h, w = HW[lvl]
        m = np.zeros((h + 2, w + 2), np.float32)
        m[1:1 + h, 1:1 + w] = 1.0
        out = np.zeros((1, L[lvl]), np.float32)
        out[0, :P[lvl]] = m.reshape(-1)
        return jnp.asarray(out)

    S0, S1 = pool_matrix(0), pool_matrix(1)       # (L0,L1), (L1,L2)
    U1, U0 = up_matrix(1), up_matrix(0)           # (L2,L1), (L1,L0)
    M0, M1 = interior_mask(0), interior_mask(1)   # (1,L0),  (1,L1)

    # --------------------------------- kernel ------------------------------------
    def conv3x3(x, w, b, wp, mask=None, leaky=True):
        # x: (cin, L) padded-flat with zero border; w: (cout, 9*cin); b: (cout, 1)
        cin, l = x.shape
        z = jnp.zeros((cin, wp + 1), jnp.float32)
        xe = jnp.concatenate([z, x, z], axis=1)                # (cin, l + 2*(wp+1))
        taps = [xe[:, dy * wp + dx: dy * wp + dx + l]          # static lane shifts
                for dy in range(3) for dx in range(3)]
        patches = jnp.concatenate(taps, axis=0)                # (9*cin, l)
        y = jnp.dot(w, patches, preferred_element_type=jnp.float32) + b
        if leaky:
            y = jnp.maximum(y, 0.2 * y)                        # LeakyReLU(0.2)
        if mask is not None:
            y = y * mask                                       # re-zero pad border
        return y

    def maxpool2x2(y, wp, gather):
        # 2x2 / stride-2 max pool, fully vectorized, result re-packed into the
        # next level's zero-bordered flat layout by a 0/1 gather matmul.
        c, l = y.shape
        right = jnp.concatenate([y[:, 1:], jnp.zeros((c, 1), jnp.float32)], axis=1)
        m = jnp.maximum(y, right)                              # max over dx
        down = jnp.concatenate([m[:, wp:], jnp.zeros((c, wp), jnp.float32)], axis=1)
        m = jnp.maximum(m, down)                               # max over dy
        return jnp.dot(m, gather, preferred_element_type=jnp.float32)

    def kernel(x_ref, s0_ref, s1_ref, u1_ref, u0_ref, m0_ref, m1_ref,
               we0, be0, we1, be1, wd0, bd0, wd1, bd1, wr0, br0, wfl, bfl,
               o_ref):
        x = x_ref[...][0]                                      # (C_PACK, L0)
        m0, m1 = m0_ref[...], m1_ref[...]

        # ------------------------------ encoder -------------------------------
        e0 = conv3x3(x, we0[...], be0[...], WP0, mask=m0)                  # (E0, L0)
        e1 = conv3x3(maxpool2x2(e0, WP0, s0_ref[...]),
                     we1[...], be1[...], WP1, mask=m1)                     # (E1, L1)

        # ------------------------------ decoder -------------------------------
        d0 = conv3x3(maxpool2x2(e1, WP1, s1_ref[...]),
                     wd0[...], bd0[...], WP2)                              # (D0, L2)
        d1_in = jnp.concatenate(
            [jnp.dot(d0, u1_ref[...], preferred_element_type=jnp.float32), e1],
            axis=0)                                                        # (D0+E1, L1)
        d1 = conv3x3(d1_in, wd1[...], bd1[...], WP1)                       # (D1, L1)
        r_in = jnp.concatenate(
            [jnp.dot(d1, u0_ref[...], preferred_element_type=jnp.float32), e0],
            axis=0)                                                        # (D1+E0, L0)
        r0 = conv3x3(r_in, wr0[...], br0[...], WP0, mask=m0)               # (R0, L0)

        # -------------------------- flow head (linear) ------------------------
        flow = conv3x3(r0, wfl[...], bfl[...], WP0, mask=None, leaky=False)
        o_ref[...] = flow[None, :, :]                                      # (1, NDIM, L0)

    # ----------------------------- pallas_call wiring -----------------------------
    def _const(shape):
        return pl.BlockSpec(shape, lambda n: (0, 0))

    in_specs = [
        pl.BlockSpec((1, C_PACK, L0), lambda n: (n, 0, 0)),    # packed [src|tgt]
        _const((L0, L1)), _const((L1, L2)),                    # pool gathers
        _const((L2, L1)), _const((L1, L0)),                    # upsample gathers
        _const((1, L0)), _const((1, L1)),                      # interior masks
    ]
    for cin_p, (_, cout) in zip(cin_spec, conv_dims):
        in_specs.append(_const((cout, 9 * cin_p)))             # packed weight
        in_specs.append(_const((cout, 1)))                     # bias

    fused = pl.pallas_call(
        kernel,
        out_shape=jax.ShapeDtypeStruct((N, NDIM, L0), jnp.float32),
        grid=(N,),
        in_specs=in_specs,
        out_specs=pl.BlockSpec((1, NDIM, L0), lambda n: (n, 0, 0)),
        compiler_params=pltpu.CompilerParams(
            dimension_semantics=("parallel",)),                # batch across TCs on v7x
    )

    def pack_weight(w, cin_p):
        cout, cin = w.shape[0], w.shape[1]
        if cin_p != cin:
            w = jnp.pad(w, ((0, 0), (0, cin_p - cin), (0, 0), (0, 0)))
        # (cout, cin_p, 3, 3) -> (cout, 3, 3, cin_p) -> (cout, 9*cin_p)
        return jnp.transpose(w, (0, 2, 3, 1)).reshape(cout, 9 * cin_p)

    def forward(params, source, target):
        # pack [source|target] into the zero-padded, lane-rounded flat layout
        x = jnp.concatenate([source, target], axis=1)                  # (N, 2, H, W)
        x = jnp.pad(x, ((0, 0), (0, C_PACK - C_IN), (1, 1), (1, 1)))   # pad chans+border
        x = x.reshape(N, C_PACK, P[0])
        x = jnp.pad(x, ((0, 0), (0, 0), (0, L0 - P[0])))               # (N, C_PACK, L0)

        args = [x, S0, S1, U1, U0, M0, M1]
        for cin_p, (w, b) in zip(cin_spec, params):
            args.append(pack_weight(w, cin_p))
            args.append(b.reshape(-1, 1))

        out = fused(*args)                                             # (N, NDIM, L0)
        out = out[:, :, :P[0]].reshape(N, NDIM, H + 2, W + 2)
        return out[:, :, 1:1 + H, 1:1 + W]                             # NCHW flow

    return forward, conv_dims


def build_params(key, conv_dims):
    # PyTorch-style OIHW conv weights + biases
    params = []
    keys = jax.random.split(key, len(conv_dims))
    for k, (cin, cout) in zip(keys, conv_dims):
        kw, kb = jax.random.split(k)
        scale = 1.0 / math.sqrt(9 * cin)
        w = scale * jax.random.normal(kw, (cout, cin, 3, 3), jnp.float32)
        b = scale * jax.random.normal(kb, (cout,), jnp.float32)
        params.append((w, b))
    return params


def reference_forward(params, source, target):
    # Pure-JAX reference of the same forward pass (voxelmorph Unet + flow conv).
    def conv(x, w, b, act=True):
        y = lax.conv_general_dilated(
            x, w, (1, 1), ((1, 1), (1, 1)),
            dimension_numbers=("NCHW", "OIHW", "NCHW"))
        y = y + b.reshape(1, -1, 1, 1)
        return jnp.where(y >= 0, y, 0.2 * y) if act else y

    def pool(x):
        return lax.reduce_window(x, -jnp.inf, lax.max,
                                 (1, 1, 2, 2), (1, 1, 2, 2), "VALID")

    def up(x):
        return jnp.repeat(jnp.repeat(x, 2, axis=2), 2, axis=3)

    (we0, be0), (we1, be1), (wd0, bd0), (wd1, bd1), (wr0, br0), (wfl, bfl) = params
    x = jnp.concatenate([source, target], axis=1)
    e0 = conv(x, we0, be0)
    e1 = conv(pool(e0), we1, be1)
    d0 = conv(pool(e1), wd0, bd0)
    d1 = conv(jnp.concatenate([up(d0), e1], axis=1), wd1, bd1)
    r0 = conv(jnp.concatenate([up(d1), e0], axis=1), wr0, br0)
    return conv(r0, wfl, bfl, act=False)


if __name__ == "__main__":
    # Small MNIST-like config: 16x16 images, 1 channel each, batch 2.
    N = 2
    inshape = (16, 16)
    ndim = 2
    nb_features = [[8, 16], [16, 16, 8]]     # [encoder feats, decoder feats]

    forward, conv_dims = build_unet_mnist(N, inshape, nb_features, ndim)

    key = jax.random.PRNGKey(0)
    k_src, k_tgt, k_par = jax.random.split(key, 3)
    source = jax.random.normal(k_src, (N, 1, *inshape), jnp.float32)
    target = jax.random.normal(k_tgt, (N, 1, *inshape), jnp.float32)
    params = build_params(k_par, conv_dims)

    flow_field = jax.jit(forward)(params, source, target)
    flow_field = jax.block_until_ready(flow_field)

    assert flow_field.shape == (N, ndim, *inshape), flow_field.shape
    assert flow_field.dtype == jnp.float32

    # Correctness check vs. the pure-JAX reference (generous tolerance covers
    # any reduced-precision MXU passes on real hardware).
    ref = reference_forward(params, source, target)
    max_err = float(jnp.max(jnp.abs(flow_field - ref)))
    assert max_err < 5e-2, f"max abs error vs reference: {max_err}"
    print("KERNEL_OK")
</pallas_src>

<mosaic_0001>
module attributes {stable_mosaic.version = 11 : i64} {
  func.func @kernel(%arg0: i32, %arg1: memref<1x8x384xf32, #tpu.memory_space<vmem>>, %arg2: memref<384x128xf32, #tpu.memory_space<vmem>>, %arg3: memref<128x128xf32, #tpu.memory_space<vmem>>, %arg4: memref<128x128xf32, #tpu.memory_space<vmem>>, %arg5: memref<128x384xf32, #tpu.memory_space<vmem>>, %arg6: memref<1x384xf32, #tpu.memory_space<vmem>>, %arg7: memref<1x128xf32, #tpu.memory_space<vmem>>, %arg8: memref<8x72xf32, #tpu.memory_space<vmem>>, %arg9: memref<8x1xf32, #tpu.memory_space<vmem>>, %arg10: memref<16x72xf32, #tpu.memory_space<vmem>>, %arg11: memref<16x1xf32, #tpu.memory_space<vmem>>, %arg12: memref<16x144xf32, #tpu.memory_space<vmem>>, %arg13: memref<16x1xf32, #tpu.memory_space<vmem>>, %arg14: memref<16x288xf32, #tpu.memory_space<vmem>>, %arg15: memref<16x1xf32, #tpu.memory_space<vmem>>, %arg16: memref<8x216xf32, #tpu.memory_space<vmem>>, %arg17: memref<8x1xf32, #tpu.memory_space<vmem>>, %arg18: memref<2x72xf32, #tpu.memory_space<vmem>>, %arg19: memref<2x1xf32, #tpu.memory_space<vmem>>, %arg20: memref<1x2x384xf32, #tpu.memory_space<vmem>>) attributes {dimension_semantics = [#tpu.dimension_semantics<parallel>], iteration_bounds = array<i64: 2>, scalar_prefetch = 0 : i64, scratch_operands = 0 : i64, tpu.core_type = #tpu.core_type<tc>, window_params = [{transform_indices = @transform_0, window_bounds = array<i64: 1, 8, 384>}, {pipeline_mode = #tpu.pipeline_mode<synchronous>, transform_indices = @transform_1, window_bounds = array<i64: 384, 128>}, {pipeline_mode = #tpu.pipeline_mode<synchronous>, transform_indices = @transform_2, window_bounds = array<i64: 128, 128>}, {pipeline_mode = #tpu.pipeline_mode<synchronous>, transform_indices = @transform_3, window_bounds = array<i64: 128, 128>}, {pipeline_mode = #tpu.pipeline_mode<synchronous>, transform_indices = @transform_4, window_bounds = array<i64: 128, 384>}, {pipeline_mode = #tpu.pipeline_mode<synchronous>, transform_indices = @transform_5, window_bounds = array<i64: 1, 384>}, {pipeline_mode = #tpu.pipeline_mode<synchronous>, transform_indices = @transform_6, window_bounds = array<i64: 1, 128>}, {pipeline_mode = #tpu.pipeline_mode<synchronous>, transform_indices = @transform_7, window_bounds = array<i64: 8, 72>}, {pipeline_mode = #tpu.pipeline_mode<synchronous>, transform_indices = @transform_8, window_bounds = array<i64: 8, 1>}, {pipeline_mode = #tpu.pipeline_mode<synchronous>, transform_indices = @transform_9, window_bounds = array<i64: 16, 72>}, {pipeline_mode = #tpu.pipeline_mode<synchronous>, transform_indices = @transform_10, window_bounds = array<i64: 16, 1>}, {pipeline_mode = #tpu.pipeline_mode<synchronous>, transform_indices = @transform_11, window_bounds = array<i64: 16, 144>}, {pipeline_mode = #tpu.pipeline_mode<synchronous>, transform_indices = @transform_12, window_bounds = array<i64: 16, 1>}, {pipeline_mode = #tpu.pipeline_mode<synchronous>, transform_indices = @transform_13, window_bounds = array<i64: 16, 288>}, {pipeline_mode = #tpu.pipeline_mode<synchronous>, transform_indices = @transform_14, window_bounds = array<i64: 16, 1>}, {pipeline_mode = #tpu.pipeline_mode<synchronous>, transform_indices = @transform_15, window_bounds = array<i64: 8, 216>}, {pipeline_mode = #tpu.pipeline_mode<synchronous>, transform_indices = @transform_16, window_bounds = array<i64: 8, 1>}, {pipeline_mode = #tpu.pipeline_mode<synchronous>, transform_indices = @transform_17, window_bounds = array<i64: 2, 72>}, {pipeline_mode = #tpu.pipeline_mode<synchronous>, transform_indices = @transform_18, window_bounds = array<i64: 2, 1>}, {transform_indices = @transform_19, window_bounds = array<i64: 1, 2, 384>}]} {
    %c0 = arith.constant 0 : index
    %c0_0 = arith.constant 0 : index
    %c0_1 = arith.constant 0 : index
    %0 = vector.load %arg1[%c0, %c0_0, %c0_1] : memref<1x8x384xf32, #tpu.memory_space<vmem>>, vector<1x8x384xf32>
    %1 = vector.shape_cast %0 : vector<1x8x384xf32> to vector<8x384xf32>
    %c0_2 = arith.constant 0 : index
    %c0_3 = arith.constant 0 : index
    %2 = vector.load %arg6[%c0_2, %c0_3] : memref<1x384xf32, #tpu.memory_space<vmem>>, vector<1x384xf32>
    %c0_4 = arith.constant 0 : index
    %c0_5 = arith.constant 0 : index
    %3 = vector.load %arg7[%c0_4, %c0_5] : memref<1x128xf32, #tpu.memory_space<vmem>>, vector<1x128xf32>
    %c0_6 = arith.constant 0 : index
    %c0_7 = arith.constant 0 : index
    %4 = vector.load %arg8[%c0_6, %c0_7] : memref<8x72xf32, #tpu.memory_space<vmem>>, vector<8x72xf32>
    %c0_8 = arith.constant 0 : index
    %c0_9 = arith.constant 0 : index
    %5 = vector.load %arg9[%c0_8, %c0_9] : memref<8x1xf32, #tpu.memory_space<vmem>>, vector<8x1xf32>
    %cst = arith.constant 0.000000e+00 : f32
    %6 = vector.broadcast %cst : f32 to vector<8x19xf32>
    %7 = tpu.concatenate %6, %1, %6 in 1 : vector<8x19xf32>, vector<8x384xf32>, vector<8x19xf32> -> vector<8x422xf32>
    %8 = vector.extract_strided_slice %7 {offsets = [0, 0], sizes = [8, 384], strides = [1, 1]} : vector<8x422xf32> to vector<8x384xf32>
    %9 = vector.extract_strided_slice %7 {offsets = [0, 1], sizes = [8, 384], strides = [1, 1]} : vector<8x422xf32> to vector<8x384xf32>
    %10 = vector.extract_strided_slice %7 {offsets = [0, 2], sizes = [8, 384], strides = [1, 1]} : vector<8x422xf32> to vector<8x384xf32>
    %11 = vector.extract_strided_slice %7 {offsets = [0, 18], sizes = [8, 384], strides = [1, 1]} : vector<8x422xf32> to vector<8x384xf32>
    %12 = vector.extract_strided_slice %7 {offsets = [0, 19], sizes = [8, 384], strides = [1, 1]} : vector<8x422xf32> to vector<8x384xf32>
    %13 = vector.extract_strided_slice %7 {offsets = [0, 20], sizes = [8, 384], strides = [1, 1]} : vector<8x422xf32> to vector<8x384xf32>
    %14 = vector.extract_strided_slice %7 {offsets = [0, 36], sizes = [8, 384], strides = [1, 1]} : vector<8x422xf32> to vector<8x384xf32>
    %15 = vector.extract_strided_slice %7 {offsets = [0, 37], sizes = [8, 384], strides = [1, 1]} : vector<8x422xf32> to vector<8x384xf32>
    %16 = vector.extract_strided_slice %7 {offsets = [0, 38], sizes = [8, 384], strides = [1, 1]} : vector<8x422xf32> to vector<8x384xf32>
    %17 = tpu.concatenate %8, %9, %10, %11, %12, %13, %14, %15, %16 in 0 : vector<8x384xf32>, vector<8x384xf32>, vector<8x384xf32>, vector<8x384xf32>, vector<8x384xf32>, vector<8x384xf32>, vector<8x384xf32>, vector<8x384xf32>, vector<8x384xf32> -> vector<72x384xf32>
    %cst_10 = arith.constant dense<0.000000e+00> : vector<8x384xf32>
    %18 = tpu.matmul %4, %17, %cst_10 {dimension_numbers = #tpu.dot_dimension_numbers<[1], [0], [0], [1], [0, 0, 1, 1], [], []>} : vector<8x72xf32>, vector<72x384xf32>, vector<8x384xf32> -> vector<8x384xf32>
    %19 = vector.broadcast %5 : vector<8x1xf32> to vector<8x384xf32>
    %20 = arith.addf %18, %19 : vector<8x384xf32>
    %cst_11 = arith.constant 2.000000e-01 : f32
    %21 = vector.broadcast %cst_11 : f32 to vector<8x384xf32>
    %22 = arith.mulf %21, %20 : vector<8x384xf32>
    %23 = arith.maximumf %20, %22 : vector<8x384xf32>
    %24 = vector.broadcast %2 : vector<1x384xf32> to vector<8x384xf32>
    %25 = arith.mulf %23, %24 : vector<8x384xf32>
    %c0_12 = arith.constant 0 : index
    %c0_13 = arith.constant 0 : index
    %26 = vector.load %arg2[%c0_12, %c0_13] : memref<384x128xf32, #tpu.memory_space<vmem>>, vector<384x128xf32>
    %27 = vector.extract_strided_slice %25 {offsets = [0, 1], sizes = [8, 383], strides = [1, 1]} : vector<8x384xf32> to vector<8x383xf32>
    %cst_14 = arith.constant 0.000000e+00 : f32
    %28 = vector.broadcast %cst_14 : f32 to vector<8x1xf32>
    %29 = tpu.concatenate %27, %28 in 1 : vector<8x383xf32>, vector<8x1xf32> -> vector<8x384xf32>
    %30 = arith.maximumf %25, %29 : vector<8x384xf32>
    %31 = vector.extract_strided_slice %30 {offsets = [0, 18], sizes = [8, 366], strides = [1, 1]} : vector<8x384xf32> to vector<8x366xf32>
    %cst_15 = arith.constant 0.000000e+00 : f32
    %32 = vector.broadcast %cst_15 : f32 to vector<8x18xf32>
    %33 = tpu.concatenate %31, %32 in 1 : vector<8x366xf32>, vector<8x18xf32> -> vector<8x384xf32>
    %34 = arith.maximumf %30, %33 : vector<8x384xf32>
    %cst_16 = arith.constant dense<0.000000e+00> : vector<8x128xf32>
    %35 = tpu.matmul %34, %26, %cst_16 {dimension_numbers = #tpu.dot_dimension_numbers<[1], [0], [0], [1], [0, 0, 1, 1], [], []>} : vector<8x384xf32>, vector<384x128xf32>, vector<8x128xf32> -> vector<8x128xf32>
    %c0_17 = arith.constant 0 : index
    %c0_18 = arith.constant 0 : index
    %36 = vector.load %arg10[%c0_17, %c0_18] : memref<16x72xf32, #tpu.memory_space<vmem>>, vector<16x72xf32>
    %c0_19 = arith.constant 0 : index
    %c0_20 = arith.constant 0 : index
    %37 = vector.load %arg11[%c0_19, %c0_20] : memref<16x1xf32, #tpu.memory_space<vmem>>, vector<16x1xf32>
    %cst_21 = arith.constant 0.000000e+00 : f32
    %38 = vector.broadcast %cst_21 : f32 to vector<8x11xf32>
    %39 = tpu.concatenate %38, %35, %38 in 1 : vector<8x11xf32>, vector<8x128xf32>, vector<8x11xf32> -> vector<8x150xf32>
    %40 = vector.extract_strided_slice %39 {offsets = [0, 0], sizes = [8, 128], strides = [1, 1]} : vector<8x150xf32> to vector<8x128xf32>
    %41 = vector.extract_strided_slice %39 {offsets = [0, 1], sizes = [8, 128], strides = [1, 1]} : vector<8x150xf32> to vector<8x128xf32>
    %42 = vector.extract_strided_slice %39 {offsets = [0, 2], sizes = [8, 128], strides = [1, 1]} : vector<8x150xf32> to vector<8x128xf32>
    %43 = vector.extract_strided_slice %39 {offsets = [0, 10], sizes = [8, 128], strides = [1, 1]} : vector<8x150xf32> to vector<8x128xf32>
    %44 = vector.extract_strided_slice %39 {offsets = [0, 11], sizes = [8, 128], strides = [1, 1]} : vector<8x150xf32> to vector<8x128xf32>
    %45 = vector.extract_strided_slice %39 {offsets = [0, 12], sizes = [8, 128], strides = [1, 1]} : vector<8x150xf32> to vector<8x128xf32>
    %46 = vector.extract_strided_slice %39 {offsets = [0, 20], sizes = [8, 128], strides = [1, 1]} : vector<8x150xf32> to vector<8x128xf32>
    %47 = vector.extract_strided_slice %39 {offsets = [0, 21], sizes = [8, 128], strides = [1, 1]} : vector<8x150xf32> to vector<8x128xf32>
    %48 = vector.extract_strided_slice %39 {offsets = [0, 22], sizes = [8, 128], strides = [1, 1]} : vector<8x150xf32> to vector<8x128xf32>
    %49 = tpu.concatenate %40, %41, %42, %43, %44, %45, %46, %47, %48 in 0 : vector<8x128xf32>, vector<8x128xf32>, vector<8x128xf32>, vector<8x128xf32>, vector<8x128xf32>, vector<8x128xf32>, vector<8x128xf32>, vector<8x128xf32>, vector<8x128xf32> -> vector<72x128xf32>
    %cst_22 = arith.constant dense<0.000000e+00> : vector<16x128xf32>
    %50 = tpu.matmul %36, %49, %cst_22 {dimension_numbers = #tpu.dot_dimension_numbers<[1], [0], [0], [1], [0, 0, 1, 1], [], []>} : vector<16x72xf32>, vector<72x128xf32>, vector<16x128xf32> -> vector<16x128xf32>
    %51 = vector.broadcast %37 : vector<16x1xf32> to vector<16x128xf32>
    %52 = arith.addf %50, %51 : vector<16x128xf32>
    %cst_23 = arith.constant 2.000000e-01 : f32
    %53 = vector.broadcast %cst_23 : f32 to vector<16x128xf32>
    %54 = arith.mulf %53, %52 : vector<16x128xf32>
    %55 = arith.maximumf %52, %54 : vector<16x128xf32>
    %56 = vector.broadcast %3 : vector<1x128xf32> to vector<16x128xf32>
    %57 = arith.mulf %55, %56 : vector<16x128xf32>
    %c0_24 = arith.constant 0 : index
    %c0_25 = arith.constant 0 : index
    %58 = vector.load %arg3[%c0_24, %c0_25] : memref<128x128xf32, #tpu.memory_space<vmem>>, vector<128x128xf32>
    %59 = vector.extract_strided_slice %57 {offsets = [0, 1], sizes = [16, 127], strides = [1, 1]} : vector<16x128xf32> to vector<16x127xf32>
    %cst_26 = arith.constant 0.000000e+00 : f32
    %60 = vector.broadcast %cst_26 : f32 to vector<16x1xf32>
    %61 = tpu.concatenate %59, %60 in 1 : vector<16x127xf32>, vector<16x1xf32> -> vector<16x128xf32>
    %62 = arith.maximumf %57, %61 : vector<16x128xf32>
    %63 = vector.extract_strided_slice %62 {offsets = [0, 10], sizes = [16, 118], strides = [1, 1]} : vector<16x128xf32> to vector<16x118xf32>
    %cst_27 = arith.constant 0.000000e+00 : f32
    %64 = vector.broadcast %cst_27 : f32 to vector<16x10xf32>
    %65 = tpu.concatenate %63, %64 in 1 : vector<16x118xf32>, vector<16x10xf32> -> vector<16x128xf32>
    %66 = arith.maximumf %62, %65 : vector<16x128xf32>
    %cst_28 = arith.constant dense<0.000000e+00> : vector<16x128xf32>
    %67 = tpu.matmul %66, %58, %cst_28 {dimension_numbers = #tpu.dot_dimension_numbers<[1], [0], [0], [1], [0, 0, 1, 1], [], []>} : vector<16x128xf32>, vector<128x128xf32>, vector<16x128xf32> -> vector<16x128xf32>
    %c0_29 = arith.constant 0 : index
    %c0_30 = arith.constant 0 : index
    %68 = vector.load %arg12[%c0_29, %c0_30] : memref<16x144xf32, #tpu.memory_space<vmem>>, vector<16x144xf32>
    %c0_31 = arith.constant 0 : index
    %c0_32 = arith.constant 0 : index
    %69 = vector.load %arg13[%c0_31, %c0_32] : memref<16x1xf32, #tpu.memory_space<vmem>>, vector<16x1xf32>
    %cst_33 = arith.constant 0.000000e+00 : f32
    %70 = vector.broadcast %cst_33 : f32 to vector<16x7xf32>
    %71 = tpu.concatenate %70, %67, %70 in 1 : vector<16x7xf32>, vector<16x128xf32>, vector<16x7xf32> -> vector<16x142xf32>
    %72 = vector.extract_strided_slice %71 {offsets = [0, 0], sizes = [16, 128], strides = [1, 1]} : vector<16x142xf32> to vector<16x128xf32>
    %73 = vector.extract_strided_slice %71 {offsets = [0, 1], sizes = [16, 128], strides = [1, 1]} : vector<16x142xf32> to vector<16x128xf32>
    %74 = vector.extract_strided_slice %71 {offsets = [0, 2], sizes = [16, 128], strides = [1, 1]} : vector<16x142xf32> to vector<16x128xf32>
    %75 = vector.extract_strided_slice %71 {offsets = [0, 6], sizes = [16, 128], strides = [1, 1]} : vector<16x142xf32> to vector<16x128xf32>
    %76 = vector.extract_strided_slice %71 {offsets = [0, 7], sizes = [16, 128], strides = [1, 1]} : vector<16x142xf32> to vector<16x128xf32>
    %77 = vector.extract_strided_slice %71 {offsets = [0, 8], sizes = [16, 128], strides = [1, 1]} : vector<16x142xf32> to vector<16x128xf32>
    %78 = vector.extract_strided_slice %71 {offsets = [0, 12], sizes = [16, 128], strides = [1, 1]} : vector<16x142xf32> to vector<16x128xf32>
    %79 = vector.extract_strided_slice %71 {offsets = [0, 13], sizes = [16, 128], strides = [1, 1]} : vector<16x142xf32> to vector<16x128xf32>
    %80 = vector.extract_strided_slice %71 {offsets = [0, 14], sizes = [16, 128], strides = [1, 1]} : vector<16x142xf32> to vector<16x128xf32>
    %81 = tpu.concatenate %72, %73, %74, %75, %76, %77, %78, %79, %80 in 0 : vector<16x128xf32>, vector<16x128xf32>, vector<16x128xf32>, vector<16x128xf32>, vector<16x128xf32>, vector<16x128xf32>, vector<16x128xf32>, vector<16x128xf32>, vector<16x128xf32> -> vector<144x128xf32>
    %cst_34 = arith.constant dense<0.000000e+00> : vector<16x128xf32>
    %82 = tpu.matmul %68, %81, %cst_34 {dimension_numbers = #tpu.dot_dimension_numbers<[1], [0], [0], [1], [0, 0, 1, 1], [], []>} : vector<16x144xf32>, vector<144x128xf32>, vector<16x128xf32> -> vector<16x128xf32>
    %83 = vector.broadcast %69 : vector<16x1xf32> to vector<16x128xf32>
    %84 = arith.addf %82, %83 : vector<16x128xf32>
    %cst_35 = arith.constant 2.000000e-01 : f32
    %85 = vector.broadcast %cst_35 : f32 to vector<16x128xf32>
    %86 = arith.mulf %85, %84 : vector<16x128xf32>
    %87 = arith.maximumf %84, %86 : vector<16x128xf32>
    %c0_36 = arith.constant 0 : index
    %c0_37 = arith.constant 0 : index
    %88 = vector.load %arg4[%c0_36, %c0_37] : memref<128x128xf32, #tpu.memory_space<vmem>>, vector<128x128xf32>
    %cst_38 = arith.constant dense<0.000000e+00> : vector<16x128xf32>
    %89 = tpu.matmul %87, %88, %cst_38 {dimension_numbers = #tpu.dot_dimension_numbers<[1], [0], [0], [1], [0, 0, 1, 1], [], []>} : vector<16x128xf32>, vector<128x128xf32>, vector<16x128xf32> -> vector<16x128xf32>
    %90 = tpu.concatenate %89, %57 in 0 : vector<16x128xf32>, vector<16x128xf32> -> vector<32x128xf32>
    %c0_39 = arith.constant 0 : index
    %c0_40 = arith.constant 0 : index
    %91 = vector.load %arg14[%c0_39, %c0_40] : memref<16x288xf32, #tpu.memory_space<vmem>>, vector<16x288xf32>
    %c0_41 = arith.constant 0 : index
    %c0_42 = arith.constant 0 : index
    %92 = vector.load %arg15[%c0_41, %c0_42] : memref<16x1xf32, #tpu.memory_space<vmem>>, vector<16x1xf32>
    %cst_43 = arith.constant 0.000000e+00 : f32
    %93 = vector.broadcast %cst_43 : f32 to vector<32x11xf32>
    %94 = tpu.concatenate %93, %90, %93 in 1 : vector<32x11xf32>, vector<32x128xf32>, vector<32x11xf32> -> vector<32x150xf32>
    %95 = vector.extract_strided_slice %94 {offsets = [0, 0], sizes = [32, 128], strides = [1, 1]} : vector<32x150xf32> to vector<32x128xf32>
    %96 = vector.extract_strided_slice %94 {offsets = [0, 1], sizes = [32, 128], strides = [1, 1]} : vector<32x150xf32> to vector<32x128xf32>
    %97 = vector.extract_strided_slice %94 {offsets = [0, 2], sizes = [32, 128], strides = [1, 1]} : vector<32x150xf32> to vector<32x128xf32>
    %98 = vector.extract_strided_slice %94 {offsets = [0, 10], sizes = [32, 128], strides = [1, 1]} : vector<32x150xf32> to vector<32x128xf32>
    %99 = vector.extract_strided_slice %94 {offsets = [0, 11], sizes = [32, 128], strides = [1, 1]} : vector<32x150xf32> to vector<32x128xf32>
    %100 = vector.extract_strided_slice %94 {offsets = [0, 12], sizes = [32, 128], strides = [1, 1]} : vector<32x150xf32> to vector<32x128xf32>
    %101 = vector.extract_strided_slice %94 {offsets = [0, 20], sizes = [32, 128], strides = [1, 1]} : vector<32x150xf32> to vector<32x128xf32>
    %102 = vector.extract_strided_slice %94 {offsets = [0, 21], sizes = [32, 128], strides = [1, 1]} : vector<32x150xf32> to vector<32x128xf32>
    %103 = vector.extract_strided_slice %94 {offsets = [0, 22], sizes = [32, 128], strides = [1, 1]} : vector<32x150xf32> to vector<32x128xf32>
    %104 = tpu.concatenate %95, %96, %97, %98, %99, %100, %101, %102, %103 in 0 : vector<32x128xf32>, vector<32x128xf32>, vector<32x128xf32>, vector<32x128xf32>, vector<32x128xf32>, vector<32x128xf32>, vector<32x128xf32>, vector<32x128xf32>, vector<32x128xf32> -> vector<288x128xf32>
    %cst_44 = arith.constant dense<0.000000e+00> : vector<16x128xf32>
    %105 = tpu.matmul %91, %104, %cst_44 {dimension_numbers = #tpu.dot_dimension_numbers<[1], [0], [0], [1], [0, 0, 1, 1], [], []>} : vector<16x288xf32>, vector<288x128xf32>, vector<16x128xf32> -> vector<16x128xf32>
    %106 = vector.broadcast %92 : vector<16x1xf32> to vector<16x128xf32>
    %107 = arith.addf %105, %106 : vector<16x128xf32>
    %cst_45 = arith.constant 2.000000e-01 : f32
    %108 = vector.broadcast %cst_45 : f32 to vector<16x128xf32>
    %109 = arith.mulf %108, %107 : vector<16x128xf32>
    %110 = arith.maximumf %107, %109 : vector<16x128xf32>
    %c0_46 = arith.constant 0 : index
    %c0_47 = arith.constant 0 : index
    %111 = vector.load %arg5[%c0_46, %c0_47] : memref<128x384xf32, #tpu.memory_space<vmem>>, vector<128x384xf32>
    %cst_48 = arith.constant dense<0.000000e+00> : vector<16x384xf32>
    %112 = tpu.matmul %110, %111, %cst_48 {dimension_numbers = #tpu.dot_dimension_numbers<[1], [0], [0], [1], [0, 0, 1, 1], [], []>} : vector<16x128xf32>, vector<128x384xf32>, vector<16x384xf32> -> vector<16x384xf32>
    %113 = tpu.concatenate %112, %25 in 0 : vector<16x384xf32>, vector<8x384xf32> -> vector<24x384xf32>
    %c0_49 = arith.constant 0 : index
    %c0_50 = arith.constant 0 : index
    %114 = vector.load %arg16[%c0_49, %c0_50] : memref<8x216xf32, #tpu.memory_space<vmem>>, vector<8x216xf32>
    %c0_51 = arith.constant 0 : index
    %c0_52 = arith.constant 0 : index
    %115 = vector.load %arg17[%c0_51, %c0_52] : memref<8x1xf32, #tpu.memory_space<vmem>>, vector<8x1xf32>
    %cst_53 = arith.constant 0.000000e+00 : f32
    %116 = vector.broadcast %cst_53 : f32 to vector<24x19xf32>
    %117 = tpu.concatenate %116, %113, %116 in 1 : vector<24x19xf32>, vector<24x384xf32>, vector<24x19xf32> -> vector<24x422xf32>
    %118 = vector.extract_strided_slice %117 {offsets = [0, 0], sizes = [24, 384], strides = [1, 1]} : vector<24x422xf32> to vector<24x384xf32>
    %119 = vector.extract_strided_slice %117 {offsets = [0, 1], sizes = [24, 384], strides = [1, 1]} : vector<24x422xf32> to vector<24x384xf32>
    %120 = vector.extract_strided_slice %117 {offsets = [0, 2], sizes = [24, 384], strides = [1, 1]} : vector<24x422xf32> to vector<24x384xf32>
    %121 = vector.extract_strided_slice %117 {offsets = [0, 18], sizes = [24, 384], strides = [1, 1]} : vector<24x422xf32> to vector<24x384xf32>
    %122 = vector.extract_strided_slice %117 {offsets = [0, 19], sizes = [24, 384], strides = [1, 1]} : vector<24x422xf32> to vector<24x384xf32>
    %123 = vector.extract_strided_slice %117 {offsets = [0, 20], sizes = [24, 384], strides = [1, 1]} : vector<24x422xf32> to vector<24x384xf32>
    %124 = vector.extract_strided_slice %117 {offsets = [0, 36], sizes = [24, 384], strides = [1, 1]} : vector<24x422xf32> to vector<24x384xf32>
    %125 = vector.extract_strided_slice %117 {offsets = [0, 37], sizes = [24, 384], strides = [1, 1]} : vector<24x422xf32> to vector<24x384xf32>
    %126 = vector.extract_strided_slice %117 {offsets = [0, 38], sizes = [24, 384], strides = [1, 1]} : vector<24x422xf32> to vector<24x384xf32>
    %127 = tpu.concatenate %118, %119, %120, %121, %122, %123, %124, %125, %126 in 0 : vector<24x384xf32>, vector<24x384xf32>, vector<24x384xf32>, vector<24x384xf32>, vector<24x384xf32>, vector<24x384xf32>, vector<24x384xf32>, vector<24x384xf32>, vector<24x384xf32> -> vector<216x384xf32>
    %cst_54 = arith.constant dense<0.000000e+00> : vector<8x384xf32>
    %128 = tpu.matmul %114, %127, %cst_54 {dimension_numbers = #tpu.dot_dimension_numbers<[1], [0], [0], [1], [0, 0, 1, 1], [], []>} : vector<8x216xf32>, vector<216x384xf32>, vector<8x384xf32> -> vector<8x384xf32>
    %129 = vector.broadcast %115 : vector<8x1xf32> to vector<8x384xf32>
    %130 = arith.addf %128, %129 : vector<8x384xf32>
    %cst_55 = arith.constant 2.000000e-01 : f32
    %131 = vector.broadcast %cst_55 : f32 to vector<8x384xf32>
    %132 = arith.mulf %131, %130 : vector<8x384xf32>
    %133 = arith.maximumf %130, %132 : vector<8x384xf32>
    %134 = vector.broadcast %2 : vector<1x384xf32> to vector<8x384xf32>
    %135 = arith.mulf %133, %134 : vector<8x384xf32>
    %c0_56 = arith.constant 0 : index
    %c0_57 = arith.constant 0 : index
    %136 = vector.load %arg18[%c0_56, %c0_57] : memref<2x72xf32, #tpu.memory_space<vmem>>, vector<2x72xf32>
    %c0_58 = arith.constant 0 : index
    %c0_59 = arith.constant 0 : index
    %137 = vector.load %arg19[%c0_58, %c0_59] : memref<2x1xf32, #tpu.memory_space<vmem>>, vector<2x1xf32>
    %cst_60 = arith.constant 0.000000e+00 : f32
    %138 = vector.broadcast %cst_60 : f32 to vector<8x19xf32>
    %139 = tpu.concatenate %138, %135, %138 in 1 : vector<8x19xf32>, vector<8x384xf32>, vector<8x19xf32> -> vector<8x422xf32>
    %140 = vector.extract_strided_slice %139 {offsets = [0, 0], sizes = [8, 384], strides = [1, 1]} : vector<8x422xf32> to vector<8x384xf32>
    %141 = vector.extract_strided_slice %139 {offsets = [0, 1], sizes = [8, 384], strides = [1, 1]} : vector<8x422xf32> to vector<8x384xf32>
    %142 = vector.extract_strided_slice %139 {offsets = [0, 2], sizes = [8, 384], strides = [1, 1]} : vector<8x422xf32> to vector<8x384xf32>
    %143 = vector.extract_strided_slice %139 {offsets = [0, 18], sizes = [8, 384], strides = [1, 1]} : vector<8x422xf32> to vector<8x384xf32>
    %144 = vector.extract_strided_slice %139 {offsets = [0, 19], sizes = [8, 384], strides = [1, 1]} : vector<8x422xf32> to vector<8x384xf32>
    %145 = vector.extract_strided_slice %139 {offsets = [0, 20], sizes = [8, 384], strides = [1, 1]} : vector<8x422xf32> to vector<8x384xf32>
    %146 = vector.extract_strided_slice %139 {offsets = [0, 36], sizes = [8, 384], strides = [1, 1]} : vector<8x422xf32> to vector<8x384xf32>
    %147 = vector.extract_strided_slice %139 {offsets = [0, 37], sizes = [8, 384], strides = [1, 1]} : vector<8x422xf32> to vector<8x384xf32>
    %148 = vector.extract_strided_slice %139 {offsets = [0, 38], sizes = [8, 384], strides = [1, 1]} : vector<8x422xf32> to vector<8x384xf32>
    %149 = tpu.concatenate %140, %141, %142, %143, %144, %145, %146, %147, %148 in 0 : vector<8x384xf32>, vector<8x384xf32>, vector<8x384xf32>, vector<8x384xf32>, vector<8x384xf32>, vector<8x384xf32>, vector<8x384xf32>, vector<8x384xf32>, vector<8x384xf32> -> vector<72x384xf32>
    %cst_61 = arith.constant dense<0.000000e+00> : vector<2x384xf32>
    %150 = tpu.matmul %136, %149, %cst_61 {dimension_numbers = #tpu.dot_dimension_numbers<[1], [0], [0], [1], [0, 0, 1, 1], [], []>} : vector<2x72xf32>, vector<72x384xf32>, vector<2x384xf32> -> vector<2x384xf32>
    %151 = vector.broadcast %137 : vector<2x1xf32> to vector<2x384xf32>
    %152 = arith.addf %150, %151 : vector<2x384xf32>
    %153 = vector.shape_cast %152 : vector<2x384xf32> to vector<1x2x384xf32>
    %c0_62 = arith.constant 0 : index
    %c0_63 = arith.constant 0 : index
    %c0_64 = arith.constant 0 : index
    %154 = vector.load %arg20[%c0_62, %c0_63, %c0_64] : memref<1x2x384xf32, #tpu.memory_space<vmem>>, vector<1x2x384xf32>
    tpu.vector_store %arg20[%c0_62, %c0_63, %c0_64], %153 {strides = array<i32>} : memref<1x2x384xf32, #tpu.memory_space<vmem>>, vector<1x2x384xf32>,
    return
  }
  func.func @transform_0(%arg0: i32) -> (i32, i32, i32) {
    %c0_i32 = arith.constant 0 : i32
    %c0_i32_0 = arith.constant 0 : i32
    %c0_i32_1 = arith.constant 0 : i32
    return %arg0, %c0_i32, %c0_i32_0 : i32, i32, i32
  }
  func.func @transform_1(%arg0: i32) -> (i32, i32) {
    %c0_i32 = arith.constant 0 : i32
    %c0_i32_0 = arith.constant 0 : i32
    %c0_i32_1 = arith.constant 0 : i32
    return %c0_i32, %c0_i32_0 : i32, i32
  }
  func.func @transform_2(%arg0: i32) -> (i32, i32) {
    %c0_i32 = arith.constant 0 : i32
    %c0_i32_0 = arith.constant 0 : i32
    %c0_i32_1 = arith.constant 0 : i32
    return %c0_i32, %c0_i32_0 : i32, i32
  }
  func.func @transform_3(%arg0: i32) -> (i32, i32) {
    %c0_i32 = arith.constant 0 : i32
    %c0_i32_0 = arith.constant 0 : i32
    %c0_i32_1 = arith.constant 0 : i32
    return %c0_i32, %c0_i32_0 : i32, i32
  }
  func.func @transform_4(%arg0: i32) -> (i32, i32) {
    %c0_i32 = arith.constant 0 : i32
    %c0_i32_0 = arith.constant 0 : i32
    %c0_i32_1 = arith.constant 0 : i32
    return %c0_i32, %c0_i32_0 : i32, i32
  }
  func.func @transform_5(%arg0: i32) -> (i32, i32) {
    %c0_i32 = arith.constant 0 : i32
    %c0_i32_0 = arith.constant 0 : i32
    %c0_i32_1 = arith.constant 0 : i32
    return %c0_i32, %c0_i32_0 : i32, i32
  }
  func.func @transform_6(%arg0: i32) -> (i32, i32) {
    %c0_i32 = arith.constant 0 : i32
    %c0_i32_0 = arith.constant 0 : i32
    %c0_i32_1 = arith.constant 0 : i32
    return %c0_i32, %c0_i32_0 : i32, i32
  }
  func.func @transform_7(%arg0: i32) -> (i32, i32) {
    %c0_i32 = arith.constant 0 : i32
    %c0_i32_0 = arith.constant 0 : i32
    %c0_i32_1 = arith.constant 0 : i32
    return %c0_i32, %c0_i32_0 : i32, i32
  }
  func.func @transform_8(%arg0: i32) -> (i32, i32) {
    %c0_i32 = arith.constant 0 : i32
    %c0_i32_0 = arith.constant 0 : i32
    %c0_i32_1 = arith.constant 0 : i32
    return %c0_i32, %c0_i32_0 : i32, i32
  }
  func.func @transform_9(%arg0: i32) -> (i32, i32) {
    %c0_i32 = arith.constant 0 : i32
    %c0_i32_0 = arith.constant 0 : i32
    %c0_i32_1 = arith.constant 0 : i32
    return %c0_i32, %c0_i32_0 : i32, i32
  }
  func.func @transform_10(%arg0: i32) -> (i32, i32) {
    %c0_i32 = arith.constant 0 : i32
    %c0_i32_0 = arith.constant 0 : i32
    %c0_i32_1 = arith.constant 0 : i32
    return %c0_i32, %c0_i32_0 : i32, i32
  }
  func.func @transform_11(%arg0: i32) -> (i32, i32) {
    %c0_i32 = arith.constant 0 : i32
    %c0_i32_0 = arith.constant 0 : i32
    %c0_i32_1 = arith.constant 0 : i32
    return %c0_i32, %c0_i32_0 : i32, i32
  }
  func.func @transform_12(%arg0: i32) -> (i32, i32) {
    %c0_i32 = arith.constant 0 : i32
    %c0_i32_0 = arith.constant 0 : i32
    %c0_i32_1 = arith.constant 0 : i32
    return %c0_i32, %c0_i32_0 : i32, i32
  }
  func.func @transform_13(%arg0: i32) -> (i32, i32) {
    %c0_i32 = arith.constant 0 : i32
    %c0_i32_0 = arith.constant 0 : i32
    %c0_i32_1 = arith.constant 0 : i32
    return %c0_i32, %c0_i32_0 : i32, i32
  }
  func.func @transform_14(%arg0: i32) -> (i32, i32) {
    %c0_i32 = arith.constant 0 : i32
    %c0_i32_0 = arith.constant 0 : i32
    %c0_i32_1 = arith.constant 0 : i32
    return %c0_i32, %c0_i32_0 : i32, i32
  }
  func.func @transform_15(%arg0: i32) -> (i32, i32) {
    %c0_i32 = arith.constant 0 : i32
    %c0_i32_0 = arith.constant 0 : i32
    %c0_i32_1 = arith.constant 0 : i32
    return %c0_i32, %c0_i32_0 : i32, i32
  }
  func.func @transform_16(%arg0: i32) -> (i32, i32) {
    %c0_i32 = arith.constant 0 : i32
    %c0_i32_0 = arith.constant 0 : i32
    %c0_i32_1 = arith.constant 0 : i32
    return %c0_i32, %c0_i32_0 : i32, i32
  }
  func.func @transform_17(%arg0: i32) -> (i32, i32) {
    %c0_i32 = arith.constant 0 : i32
    %c0_i32_0 = arith.constant 0 : i32
    %c0_i32_1 = arith.constant 0 : i32
    return %c0_i32, %c0_i32_0 : i32, i32
  }
  func.func @transform_18(%arg0: i32) -> (i32, i32) {
    %c0_i32 = arith.constant 0 : i32
    %c0_i32_0 = arith.constant 0 : i32
    %c0_i32_1 = arith.constant 0 : i32
    return %c0_i32, %c0_i32_0 : i32, i32
  }
  func.func @transform_19(%arg0: i32) -> (i32, i32, i32) {
    %c0_i32 = arith.constant 0 : i32
    %c0_i32_0 = arith.constant 0 : i32
    %c0_i32_1 = arith.constant 0 : i32
    return %arg0, %c0_i32, %c0_i32_0 : i32, i32, i32
  }
}

</mosaic_0001>

<bundles_post_ra>
// kernel: forward.1
= control target key start
LH: loop header
LB: loop body
LE: loop exit
PB: predicated region body
PF: predicated region fallthrough
CT: control target
= control target key end

     0   :  { %s6242_s0 = inlined_call_operand.vmem [shape: f32[2,8,384], index: 0, kind: input, shape index: {}]   ;;  %s6243_s1 = inlined_call_operand.vmem [shape: f32[384,128], index: 1, kind: input, shape index: {}]   ;;  %s6244_s2 = inlined_call_operand.vmem [shape: f32[128,128], index: 2, kind: input, shape index: {}]   ;;  %s6245_s3 = inlined_call_operand.vmem [shape: f32[128,128], index: 3, kind: input, shape index: {}]   ;;  %s6246_s4 = inlined_call_operand.vmem [shape: f32[128,384], index: 4, kind: input, shape index: {}]   ;;  %s6247_s5 = inlined_call_operand.vmem [shape: f32[1,384], index: 5, kind: input, shape index: {}]   ;;  %s6248_s6 = inlined_call_operand.vmem [shape: f32[1,128], index: 6, kind: input, shape index: {}]   ;;  %s6249_s7 = inlined_call_operand.vmem [shape: f32[8,72], index: 7, kind: input, shape index: {}]   ;;  %s6250_s8 = inlined_call_operand.vmem [shape: f32[8,1], index: 8, kind: input, shape index: {}]   ;;  %s6251_s9 = inlined_call_operand.vmem [shape: f32[16,72], index: 9, kind: input, shape index: {}]   ;;  %s6252_s10 = inlined_call_operand.vmem [shape: f32[16,1], index: 10, kind: input, shape index: {}]   ;;  %s6253_s11 = inlined_call_operand.vmem [shape: f32[16,144], index: 11, kind: input, shape index: {}]   ;;  %s6254_s12 = inlined_call_operand.vmem [shape: f32[16,1], index: 12, kind: input, shape index: {}]   ;;  %s6255_s13 = inlined_call_operand.vmem [shape: f32[16,288], index: 13, kind: input, shape index: {}]   ;;  %s6256_s14 = inlined_call_operand.vmem [shape: f32[16,1], index: 14, kind: input, shape index: {}]   ;;  %s6257_s15 = inlined_call_operand.vmem [shape: f32[8,216], index: 15, kind: input, shape index: {}]   ;;  %s6258_s16 = inlined_call_operand.vmem [shape: f32[8,1], index: 16, kind: input, shape index: {}]   ;;  %s6259_s17 = inlined_call_operand.vmem [shape: f32[2,72], index: 17, kind: input, shape index: {}]   ;;  %s6260_s18 = inlined_call_operand.vmem [shape: f32[2,1], index: 18, kind: input, shape index: {}]   ;;  %s6261_s19 = inlined_call_operand.vmem [shape: f32[2,2,384], index: 19, kind: output, shape index: {}]  }
   0x1   :  { %6303 = sst [smem:[#allocation2_spill]] %s6242_s0  ;;  %s4988_s0 = smov 0  }
   0x2   :  { %6304 = sst [smem:[#allocation3_spill]] %s6243_s1 }
   0x3   :  { %6305 = sst [smem:[#allocation4_spill]] %s6244_s2 }
   0x4   :  { %6306 = sst [smem:[#allocation5_spill]] %s6245_s3 }
   0x5   :  { %6307 = sst [smem:[#allocation6_spill]] %s6247_s5 }
   0x6   :  { %6308 = sst [smem:[#allocation7_spill]] %s6248_s6 }
   0x7   :  { %6309 = sst [smem:[#allocation8_spill]] %s6249_s7 }
   0x8   :  { %6310 = sst [smem:[#allocation9_spill]] %s6250_s8 }
   0x9   :  { %6311 = sst [smem:[#allocation10_spill]] %s6251_s9 }
   0xa   :  { %6312 = sst [smem:[#allocation11_spill]] %s6252_s10 }
   0xb LB: > { %s3255_s30 = sadd.s32 4294967295, %s4859_s0   ;;  %p3259_p0 = scmp.ge.s32.totalorder %s4859_s0, 1  ;;  %s4859_s0 = sphi %s4988_s0, %s29_s0  }
   0xc   : > { %p537_p1 = scmp.lt.s32.totalorder %s4859_s0, 3 }
   0xe   : > { %p538_p2 = pnand %p3259_p0, %p537_p1 }
   0xf   : > { %p593_p3 = scmp.lt.s32.totalorder (!%p538_p2), %s3255_s30, 1  ;;  %s6313_s22 = sld [smem:[#allocation2_spill]] (!%p538_p2)  ;;  %vm6302_vm0 = vcmask (!%p538_p2), 154624   ;;  %v4862_v5 = vmov (!%p538_p2), 0.0|0.0   ;;  %v4869_v13 = vmov (!%p538_p2), 0.0   ;;  %vm6289_vm1 = vmmov (!%p538_p2), 0  }
  0x10   : > { %541 = sbr.rel (%p538_p2) target bundleno = 4398 (0x112e), region = 96  ;;  %s6273_s23 = smov (!%p538_p2), 19   ;;  %3713 = vmatprep.subr.bf16.mxu1 (!%p538_p2), %v4862_v5  ;;  %823 = vmatprep.mubr.f32.mxu0 (!%p538_p2), %v4869_v13  ;;  %v4872_v14 = vmov (!%p538_p2), 0   ;;  %vm638_vm2 = vcmask (!%p538_p2), 1039360   ;;  %vm5047_vm3 = vmneg (!%p538_p2), %vm6302_vm0  ;;  %vm6301_vm4 = vcmask (!%p538_p2), 900096   ;;  %vm4874_vm5 = vmmov (!%p538_p2), 1  }
  0x11   : > { %s6279_s24 = smov (!%p538_p2), 127   ;;  %s6281_s25 = smov (!%p538_p2), 110   ;;  %3500 = vmatprep.mubr.msk.f32.mxu1 (!%p538_p2), %vm6289_vm1, %v4869_v13  ;;  %4226 = vset.pattern.permute.xlu1 (!%p538_p2), %v4872_v14  ;;  %vm5060_vm6 = vmpackc.low (!%p538_p2), %vm4874_vm5, %vm5047_vm3  ;;  %vm653_vm7 = vcmask (!%p538_p2), 1031168   ;;  %vm6300_vm8 = vcmask (!%p538_p2), 891904   ;;  %vm698_vm9 = vcmask (!%p538_p2), 883712   ;;  %vm6292_vm10 = vcmask (!%p538_p2), 752640  }
  0x12   : > { %s6277_s3 = smov (!%p538_p2), 126   ;;  %s6275_s26 = smov (!%p538_p2), 108   ;;  %4272 = vset.pattern.permute.xlu0 (!%p538_p2), %v4872_v14  ;;  %vm6291_vm11 = vcmask (!%p538_p2), 744448   ;;  %vm6290_vm12 = vcmask (!%p538_p2), 736256   ;;  %vm6299_vm13 = vcmask (!%p538_p2), 588800   ;;  %vm1157_vm14 = vcmask (!%p538_p2), 89088  }
  0x13   : > { %s6271_s27 = smov (!%p538_p2), 109   ;;  %s6267_s28 = smov (!%p538_p2), 91   ;;  %vm5312_vm15 = vmneg (!%p538_p2), %vm1157_vm14 }
  0x14   : > { %s6269_s29 = smov (!%p538_p2), 92   ;;  %s6314_s8 = sld [smem:[#allocation9_spill]] (!%p538_p2) }
  0x15   : > { %s6319_s7 = sld [smem:[#allocation8_spill]] (!%p538_p2)  ;;  %s6320_s5 = sld [smem:[#allocation6_spill]] (!%p538_p2) }
  0x16   : > { %s6321_s21 = sld [smem:[#allocation3_spill]] (!%p538_p2)  ;;  %s6287_s1 = smov (!%p538_p2), 116  }
  0x17   : > { %s6424_s30 = smov (!%p593_p3, %s3255_s30), 1  ;;  %s6325_s9 = sld [smem:[#allocation10_spill]] }
  0x18   : > { %s4119_s20 = smul.u32 24, %s6424_s30  ;;  %s6326_s10 = sld [smem:[#allocation11_spill]] }
  0x19   : > { %s6329_s6 = sld [smem:[#allocation7_spill]] }
  0x1a   : > { %s597_s2 = scalar_lea.vmem %s6313_s22, %s4119_s20  ;;  %s6265_s20 = smov 90   ;;  %v609_v15 = vld [vmem:[%s6314_s8] sm:$0xff] }
  0x1b   : > { %v605_v0 = vld [vmem:[%s597_s2 + $0x10] sm:$0xff]  ;;  %v603_v1 = vld [vmem:[%s597_s2] sm:$0xff]  ;;  %v604_v2 = vld [vmem:[%s597_s2 + $0x8] sm:$0xff]  ;;  %s6323_s22 = smov 127   ;;  %s6283_s2 = smov 117  }
  0x1c   : > { %617 = vrot.lane.b32.xlu1 %v605_v0, %s6273_s23  ;;  %613 = vrot.lane.b32.xlu0 %v603_v1, %s6273_s23 }
  0x20   : > { %615 = vrot.lane.b32.xlu0 %v604_v2, %s6273_s23  ;;  %s6285_s23 = smov 11  }
  0x8e   : > { %v618_v3 = vpop.permute.xlu1 %617  ;;  %v5005_v4 = vpop.permute.xlu0 %613 }
  0x8f   : > { %v627_v6 = vsel %vm6302_vm0, %v618_v3, 0.0  ;;  %v626_v7 = vsel %vm6302_vm0, 0.0, %v5005_v4 }
  0x90   : > { %v4161_v8 = vpack.i.bf16 %v627_v6, %v626_v7 }
  0x92   : > { %4162 = vrot.lane.b32.xlu0 %v4161_v8, %s6279_s24  ;;  %v616_v9 = vpop.permute.xlu0 %615 }
  0x93   : > { %v5014_v10 = vsel %vm6302_vm0, %v5005_v4, %v616_v9  ;;  %v5017_v11 = vsel %vm6302_vm0, %v616_v9, %v618_v3  ;;  %vm1514_vm0 = vcmask 982016  }
  0x94   : > { %v4171_v12 = vpack.i.bf16 %v5017_v11, %v5014_v10 }
  0x96   : > { %4172 = vrot.lane.b32.xlu0 %v4171_v12, %s6281_s25  ;;  %4157 = vrot.lane.b32.xlu1 %v4171_v12, %s6279_s24 }
  0x9a   : > { %4182 = vrot.lane.b32.xlu0 %v4161_v8, %s6281_s25  ;;  %4167 = vrot.lane.b32.xlu1 %v4171_v12, %s6277_s3 }
  0x9e   : > { %4192 = vrot.lane.b32.xlu0 %v4171_v12, %s6275_s26  ;;  %4177 = vrot.lane.b32.xlu1 %v4161_v8, %s6277_s3  ;;  %s4885_s3 = smov 115  }
  0xa2   : > { %4202 = vrot.lane.b32.xlu0 %v4161_v8, %s6275_s26  ;;  %4187 = vrot.lane.b32.xlu1 %v4171_v12, %s6271_s27  ;;  %s6295_s26 = smov 107  }
  0xa6   : > { %4212 = vrot.lane.b32.xlu0 %v4171_v12, %s6267_s28  ;;  %4197 = vrot.lane.b32.xlu1 %v4161_v8, %s6271_s27  ;;  %s6322_s27 = smov 126  }
  0xaa   : > { %4222 = vrot.lane.b32.xlu0 %v4161_v8, %s6267_s28  ;;  %4207 = vrot.lane.b32.xlu1 %v4171_v12, %s6269_s29  ;;  %s4886_s28 = smov 114  }
  0xae   : > { %739 = vrot.lane.b32.xlu0 %v5017_v11, %s6265_s20  ;;  %4217 = vrot.lane.b32.xlu1 %v4161_v8, %s6269_s29  ;;  %s6293_s29 = smov 106  }
  0xb2   : > { %741 = vrot.lane.b32.xlu0 %v627_v6, %s6265_s20  ;;  %737 = vrot.lane.b32.xlu1 %v5014_v10, %s6265_s20 }
  0xb6   : > { %735 = vrot.lane.b32.xlu1 %v626_v7, %s6265_s20  ;;  %s6297_s20 = smov 118  }
  0xba   : > { %752 = vperm.xlu1 %4226, %v609_v15  }
 0x104   : > { %v4163_v16 = vpop.permute.xlu0 %4162 }
 0x105   : > { %v4165_v19 = vunpack.i.h.bf16 %v4163_v16  ;;  %v4164_v20 = vunpack.i.l.bf16 %v4163_v16 }
 0x108   : > { %v4158_v17 = vpop.permute.xlu1 %4157  ;;  %v4173_v18 = vpop.permute.xlu0 %4172 }
 0x109   : > { %v4160_v21 = vunpack.i.h.bf16 %v4158_v17  ;;  %v4159_v22 = vunpack.i.l.bf16 %v4158_v17  ;;  %v4175_v24 = vunpack.i.h.bf16 %v4173_v18  ;;  %v4174_v25 = vunpack.i.l.bf16 %v4173_v18 }
 0x10b   : > { %v640_v26 = vsel %vm638_vm2, %v4159_v22, %v4160_v21  ;;  %v641_v27 = vsel %vm638_vm2, %v4160_v21, %v4165_v19  ;;  %v639_v28 = vsel %vm638_vm2, %v4164_v20, %v4159_v22  ;;  %v670_v40 = vsel %vm6301_vm4, %v4174_v25, %v4175_v24 }
 0x10c   : > { %v4168_v29 = vpop.permute.xlu1 %4167  ;;  %v4183_v30 = vpop.permute.xlu0 %4182  ;;  %v3696_v31 = vpack.c.bf16 %v640_v26, %v5014_v10  ;;  %v3714_v32 = vpack.c.bf16 %v641_v27, %v5017_v11  ;;  %v3698_v33 = vpack.c.bf16 %v639_v28, %v5005_v4 }
 0x10d   : > { %v4170_v35 = vunpack.i.h.bf16 %v4168_v29  ;;  %v4169_v36 = vunpack.i.l.bf16 %v4168_v29  ;;  %v4185_v37 = vunpack.i.h.bf16 %v4183_v30  ;;  %v4184_v38 = vunpack.i.l.bf16 %v4183_v30 }
 0x10e   : > { %3697 = vmatprep.subr.bf16.mxu0 %v3696_v31  ;;  %3715 = vmatpush3.bf16.msra.mxu1 %v3714_v32 }
 0x10f   : > { %3700 = vmatpush1.bf16.msk.msra.mxu0 %vm5060_vm6, %v3698_v33  ;;  %v655_v39 = vsel %vm653_vm7, %v4169_v36, %v4170_v35  ;;  %3716 = vmatprep.subr.bf16.mxu1 %v4862_v5  ;;  %v669_v46 = vsel %vm6301_vm4, %v4184_v38, %v4174_v25  ;;  %v671_v47 = vsel %vm6301_vm4, %v4175_v24, %v4185_v37  ;;  %v608_v38 = vld [vmem:[%s6319_s7] sm:$0xff]  ;;  %s6338_s7 = smov 19  }
 0x110   : > { %v4178_v41 = vpop.permute.xlu1 %4177  ;;  %v4193_v42 = vpop.permute.xlu0 %4192  ;;  %v3701_v43 = vpack.c.bf16 %v670_v40, %v655_v39 }
 0x111   : > { %v4180_v44 = vunpack.i.h.bf16 %v4178_v41  ;;  %v4179_v45 = vunpack.i.l.bf16 %v4178_v41  ;;  %v4195_v48 = vunpack.i.h.bf16 %v4193_v42  ;;  %v4194_v49 = vunpack.i.l.bf16 %v4193_v42 }
 0x112   : > { %3702 = vmatprep.subr.bf16.mxu0 %v3701_v43  ;;  %v907_v41 = vlaneseq }
 0x113   : > { %v654_v50 = vsel %vm653_vm7, %v4179_v45, %v4169_v36  ;;  %v656_v51 = vsel %vm653_vm7, %v4170_v35, %v4180_v44  ;;  %v700_v61 = vsel %vm698_vm9, %v4194_v49, %v4195_v48 }
 0x114   : > { %v4188_v52 = vpop.permute.xlu1 %4187  ;;  %v4203_v53 = vpop.permute.xlu0 %4202  ;;  %v3703_v54 = vpack.c.bf16 %v669_v46, %v654_v50  ;;  %v3717_v55 = vpack.c.bf16 %v671_v47, %v656_v51  ;;  %v5099_v42 = vshrl.u32 %v907_v41, 7  ;;  %v606_v47 = vld [vmem:[%s6320_s5] sm:$0x7]  ;;  %v932_v41 = vld [vmem:[%s6321_s21 + $0x38] sm:$0xff]  ;;  %s6331_s5 = smov 118  }
 0x115   : > { %v4190_v56 = vunpack.i.h.bf16 %v4188_v52  ;;  %v4189_v57 = vunpack.i.l.bf16 %v4188_v52  ;;  %v4205_v58 = vunpack.i.h.bf16 %v4203_v53  ;;  %v4204_v59 = vunpack.i.l.bf16 %v4203_v53 }
 0x116   : > { %3704 = vmatpush1.bf16.msra.mxu0 %v3703_v54  ;;  %3718 = vmatpush3.bf16.msra.mxu1 %v3717_v55  ;;  %v917_v44 = vsub.s32 2, %v5099_v42  ;;  %v909_v45 = vsub.s32 0, %v5099_v42 }
 0x117   : > { %v685_v60 = vsel %vm6300_vm8, %v4189_v57, %v4190_v56  ;;  %3719 = vmatprep.subr.bf16.mxu1 %v4862_v5  ;;  %v699_v3 = vsel %vm698_vm9, %v4204_v59, %v4194_v49  ;;  %v701_v4 = vsel %vm698_vm9, %v4195_v48, %v4205_v58  ;;  %v913_v49 = vsub.s32 1, %v5099_v42 }
 0x118   : > { %v4198_v62 = vpop.permute.xlu1 %4197  ;;  %v4213_v63 = vpop.permute.xlu0 %4212  ;;  %v3705_v0 = vpack.c.bf16 %v700_v61, %v685_v60  ;;  %v5109_v58 = vrot.slane %v606_v47, %v909_v45 }
 0x119   : > { %v4200_v1 = vunpack.i.h.bf16 %v4198_v62  ;;  %v4199_v2 = vunpack.i.l.bf16 %v4198_v62  ;;  %v4215_v6 = vunpack.i.h.bf16 %v4213_v63  ;;  %v4214_v7 = vunpack.i.l.bf16 %v4213_v63 }
 0x11a   : > { %3706 = vmatprep.subr.bf16.mxu0 %v3705_v0  ;;  %v5111_v60 = vrot.slane %v606_v47, %v913_v49  ;;  %v941_v0 = vld [vmem:[%s6321_s21 + $0x80] sm:$0xff]  ;;  %v966_v49 = vld [vmem:[%s6321_s21 + $0x148] sm:$0xff] }
 0x11b   : > { %v684_v8 = vsel %vm6300_vm8, %v4199_v2, %v4189_v57  ;;  %v686_v9 = vsel %vm6300_vm8, %v4190_v56, %v4200_v1  ;;  %v730_v20 = vsel %vm6291_vm11, %v4214_v7, %v4215_v6  ;;  %v5107_v57 = vrot.slane %v606_v47, %v917_v44  ;;  %v942_v1 = vld [vmem:[%s6321_s21 + $0x88] sm:$0xff]  ;;  %v957_v2 = vld [vmem:[%s6321_s21 + $0x100] sm:$0xff] }
 0x11c   : > { %v4208_v10 = vpop.permute.xlu1 %4207  ;;  %v4223_v11 = vpop.permute.xlu0 %4222  ;;  %v3707_v12 = vpack.c.bf16 %v699_v3, %v684_v8  ;;  %v3720_v14 = vpack.c.bf16 %v701_v4, %v686_v9  ;;  %v925_v8 = vld [vmem:[%s6321_s21] sm:$0xff]  ;;  %v926_v9 = vld [vmem:[%s6321_s21 + $0x8] sm:$0xff] }
 0x11d   : > { %v4210_v15 = vunpack.i.h.bf16 %v4208_v10  ;;  %v4209_v16 = vunpack.i.l.bf16 %v4208_v10  ;;  %v4225_v17 = vunpack.i.h.bf16 %v4223_v11  ;;  %v4224_v18 = vunpack.i.l.bf16 %v4223_v11  ;;  %v950_v44 = vld [vmem:[%s6321_s21 + $0xc8] sm:$0xff]  ;;  %v965_v47 = vld [vmem:[%s6321_s21 + $0x140] sm:$0xff] }
 0x11e   : > { %3708 = vmatpush1.bf16.msra.mxu0 %v3707_v12  ;;  %3721 = vmatpush3.bf16.msra.mxu1 %v3720_v14  ;;  %v3727_v12 = vpack.c.bf16 %v926_v9, %v925_v8  ;;  %v943_v14 = vld [vmem:[%s6321_s21 + $0x90] sm:$0xff]  ;;  %v970_v9 = vld [vmem:[%s6321_s21 + $0x168] sm:$0xff] }
 0x11f   : > { %v715_v19 = vsel %vm6292_vm10, %v4209_v16, %v4210_v15  ;;  %3722 = vmatprep.subr.bf16.mxu1 %v4862_v5  ;;  %v729_v28 = vsel %vm6291_vm11, %v4224_v18, %v4214_v7  ;;  %v731_v30 = vsel %vm6291_vm11, %v4215_v6, %v4225_v17  ;;  %v3725_v6 = vpack.c.bf16 %v942_v1, %v941_v0  ;;  %v958_v7 = vld [vmem:[%s6321_s21 + $0x108] sm:$0xff]  ;;  %v960_v18 = vld [vmem:[%s6321_s21 + $0x118] sm:$0xff] }
 0x120   : > { %v4218_v21 = vpop.permute.xlu1 %4217  ;;  %v740_v22 = vpop.permute.xlu0 %739  ;;  %v3709_v24 = vpack.c.bf16 %v730_v20, %v715_v19  ;;  %v3758_v11 = vpack.c.bf16 %v958_v7, %v957_v2  ;;  %v927_v19 = vld [vmem:[%s6321_s21 + $0x10] sm:$0xff]  ;;  %v928_v20 = vld [vmem:[%s6321_s21 + $0x18] sm:$0xff]  ;;  %v953_v2 = vld [vmem:[%s6321_s21 + $0xe0] sm:$0xff]  ;;  %vm1185_vm11 = vcmask 957440  }
 0x121   : > { %v4220_v25 = vunpack.i.h.bf16 %v4218_v21  ;;  %v4219_v26 = vunpack.i.l.bf16 %v4218_v21  ;;  %v969_v7 = vld [vmem:[%s6321_s21 + $0x160] sm:$0xff] }
 0x122   : > { %3710 = vmatprep.subr.bf16.mxu0 %v3709_v24  ;;  %v3731_v24 = vpack.c.bf16 %v928_v20, %v927_v19  ;;  %v972_v20 = vld [vmem:[%s6321_s21 + $0x178] sm:$0xff] }
 0x123   : > { %v714_v27 = vsel %vm6292_vm10, %v4219_v26, %v4209_v16  ;;  %v716_v29 = vsel %vm6292_vm10, %v4210_v15, %v4220_v25  ;;  %v944_v15 = vld [vmem:[%s6321_s21 + $0x98] sm:$0xff]  ;;  %v959_v16 = vld [vmem:[%s6321_s21 + $0x110] sm:$0xff]  ;;  %v945_v25 = vld [vmem:[%s6321_s21 + $0xa0] sm:$0xff]  ;;  %vm1192_vm10 = vcmask 949248  }
 0x124   : > { %v738_v31 = vpop.permute.xlu1 %737  ;;  %v3711_v32 = vpack.c.bf16 %v729_v28, %v714_v27  ;;  %v3723_v33 = vpack.c.bf16 %v731_v30, %v716_v29  ;;  %v742_v36 = vpop.permute.xlu0 %741  ;;  %v3729_v17 = vpack.c.bf16 %v944_v15, %v943_v14  ;;  %v946_v26 = vld [vmem:[%s6321_s21 + $0xa8] sm:$0xff]  ;;  %v961_v27 = vld [vmem:[%s6321_s21 + $0x120] sm:$0xff]  ;;  %v3776_v14 = vpack.c.bf16 %v970_v9, %v969_v7 }
 0x125   : > { %v745_v35 = vsel %vm6290_vm12, %v738_v31, %v740_v22  ;;  %v746_v40 = vsel %vm6290_vm12, %v740_v22, %v742_v36  ;;  %v3761_v22 = vpack.c.bf16 %v960_v18, %v959_v16  ;;  %v3733_v28 = vpack.c.bf16 %v946_v26, %v945_v25  ;;  %v962_v29 = vld [vmem:[%s6321_s21 + $0x128] sm:$0xff]  ;;  %v929_v30 = vld [vmem:[%s6321_s21 + $0x20] sm:$0xff]  ;;  %v955_v16 = vld [vmem:[%s6321_s21 + $0xf0] sm:$0xff] }
 0x126   : > { %3712 = vmatpush1.bf16.msra.mxu0 %v3711_v32  ;;  %3724 = vmatpush3.bf16.msra.mxu1 %v3723_v33  ;;  %v947_v32 = vld [vmem:[%s6321_s21 + $0xb0] sm:$0xff]  ;;  %v948_v33 = vld [vmem:[%s6321_s21 + $0xb8] sm:$0xff] }
 0x127   : > { %775 = vmatprep.subr.mxu0 %v745_v35  ;;  %3498 = vmatprep.subr.mxu1 %v4869_v13  ;;  %v3764_v35 = vpack.c.bf16 %v962_v29, %v961_v27  ;;  %v971_v18 = vld [vmem:[%s6321_s21 + $0x170] sm:$0xff] }
 0x128   : > { %v736_v37 = vpop.permute.xlu1 %735 }
 0x129   : > { %v744_v39 = vsel %vm6290_vm12, %v736_v37, %v738_v31  ;;  %v930_v31 = vld [vmem:[%s6321_s21 + $0x28] sm:$0xff]  ;;  %v963_v37 = vld [vmem:[%s6321_s21 + $0x130] sm:$0xff]  ;;  %vm1178_vm12 = vcmask 965632  }
 0x12a   : > { %776 = vmatpush1.msra.mxu0 %v744_v39  ;;  %3499 = vmatpush3.msra.mxu1 %v746_v40  ;;  %v3735_v36 = vpack.c.bf16 %v930_v31, %v929_v30  ;;  %v964_v39 = vld [vmem:[%s6321_s21 + $0x138] sm:$0xff]  ;;  %v931_v40 = vld [vmem:[%s6321_s21 + $0x30] sm:$0xff] }
 0x12b   : > { %3264 = vmatmul.mubr.msk.f32.vlgmr.msra.gmra.mrb[0].mxu0 %vm6299_vm13, %v608_v38  ;;  %3501 = vmatmul.mubr.msk.f32.vlgmr.msra.gmra.mrb[0].mxu1 %vm6299_vm13, %v608_v38  ;;  %v3737_v38 = vpack.c.bf16 %v948_v33, %v947_v32  ;;  %v3767_v45 = vpack.c.bf16 %v964_v39, %v963_v37 }
 0x12c   : > { %3757 = vmatprep.subr.bf16.mxu1 %v4862_v5  ;;  %3535 = vmatprep.mubr.msk.f32.mxu1 %vm6289_vm1, %v4869_v13  ;;  %vm3782_vm1 = vmpackc.low %vm4874_vm5, %vm5312_vm15  ;;  %vm1212_vm5 = vcmask 867328  }
 0x12d   : > { %3726 = vmatprep.subr.bf16.mxu0 %v3725_v6  ;;  %3759 = vmatpush3.bf16.msra.mxu1 %v3758_v11  ;;  %v954_v6 = vld [vmem:[%s6321_s21 + $0xe8] sm:$0xff]  ;;  %v937_v11 = vld [vmem:[%s6321_s21 + $0x60] sm:$0xff] }
 0x12e   : > { %3728 = vmatpush3.bf16.msra.mxu0 %v3727_v12  ;;  %3760 = vmatprep.subr.bf16.mxu1 %v4862_v5  ;;  %v3749_v8 = vpack.c.bf16 %v954_v6, %v953_v2  ;;  %v938_v12 = vld [vmem:[%s6321_s21 + $0x68] sm:$0xff] }
 0x12f   : > { %3730 = vmatprep.subr.bf16.mxu0 %v3729_v17  ;;  %v3751_v15 = vpack.c.bf16 %v938_v12, %v937_v11  ;;  %v956_v17 = vld [vmem:[%s6321_s21 + $0xf8] sm:$0xff] }
 0x130   : > { %v3753_v19 = vpack.c.bf16 %v956_v17, %v955_v16 }
 0x131   : > { %3762 = vmatpush3.bf16.msra.mxu1 %v3761_v22  ;;  %v940_v22 = vld [vmem:[%s6321_s21 + $0x78] sm:$0xff] }
 0x132   : > { %3732 = vmatpush3.bf16.msra.mxu0 %v3731_v24  ;;  %3763 = vmatprep.subr.bf16.mxu1 %v4862_v5  ;;  %v3779_v24 = vpack.c.bf16 %v972_v20, %v971_v18 }
 0x133   : > { %3734 = vmatprep.subr.bf16.mxu0 %v3733_v28 }
 0x135   : > { %3765 = vmatpush3.bf16.msra.mxu1 %v3764_v35 }
 0x136   : > { %3736 = vmatpush3.bf16.msra.mxu0 %v3735_v36  ;;  %3766 = vmatprep.subr.bf16.mxu1 %v4862_v5 }
 0x137   : > { %3738 = vmatprep.subr.bf16.mxu0 %v3737_v38 }
 0x139   : > { %v753_v43 = vpop.permute.xlu1 %752  ;;  %3768 = vmatpush3.bf16.msra.mxu1 %v3767_v45 }
 0x13a   : > { %3769 = vmatprep.subr.bf16.mxu1 %v4862_v5 }
 0x1fe   : > { %v825_v46 = vpop.f32.mrb[0].mxu0  ;;  %v896_v48 = vpop.f32.mrb[0].mxu1 }
 0x1ff   : > { %v826_v50 = vadd.f32 %v825_v46, %v753_v43  ;;  %v897_v51 = vadd.f32 %v896_v48, %v753_v43  ;;  %v827_v52 = vpop.f32.mrb[1].mxu0  ;;  %v3502_v53 = vpop.f32.mrb[1].mxu1  ;;  %v3739_v46 = vpack.c.bf16 %v932_v41, %v931_v40 }
 0x200   : > { %v828_v54 = vadd.f32 %v827_v52, %v753_v43  ;;  %v949_v43 = vld [vmem:[%s6321_s21 + $0xc0] sm:$0xff]  ;;  %v951_v52 = vld [vmem:[%s6321_s21 + $0xd0] sm:$0xff]  ;;  %v952_v53 = vld [vmem:[%s6321_s21 + $0xd8] sm:$0xff] }
 0x201   : > { %v900_v55 = vmul.f32 0.2, %v826_v50  ;;  %v902_v56 = vmul.f32 0.2, %v897_v51  ;;  %v3741_v48 = vpack.c.bf16 %v950_v44, %v949_v43  ;;  %3740 = vmatpush3.bf16.msra.mxu0 %v3739_v46 }
 0x202   : > { %v901_v59 = vmul.f32 0.2, %v828_v54 }
 0x203   : > { %v903_v61 = vmax.f32 %v826_v50, %v900_v55  ;;  %v905_v62 = vmax.f32 %v897_v51, %v902_v56  ;;  %v933_v50 = vld [vmem:[%s6321_s21 + $0x40] sm:$0xff]  ;;  %v934_v51 = vld [vmem:[%s6321_s21 + $0x48] sm:$0xff]  ;;  %v967_v56 = vld [vmem:[%s6321_s21 + $0x150] sm:$0xff]  ;;  %3742 = vmatprep.subr.bf16.mxu0 %v3741_v48 }
 0x204   : > { %v904_v63 = vmax.f32 %v828_v54, %v901_v59  ;;  %v3770_v54 = vpack.c.bf16 %v966_v49, %v965_v47  ;;  %v3743_v55 = vpack.c.bf16 %v934_v51, %v933_v50  ;;  %v3745_v59 = vpack.c.bf16 %v952_v53, %v951_v52 }
 0x205   : > { %v5123_v3 = vmul.f32 %v5107_v57, %v905_v62  ;;  %v5126_v4 = vmul.f32 %v5109_v58, %v903_v61  ;;  %v968_v61 = vld [vmem:[%s6321_s21 + $0x158] sm:$0xff]  ;;  %v935_v62 = vld [vmem:[%s6321_s21 + $0x50] sm:$0xff] }
 0x206   : > { %v5138_v10 = vmul.f32 %v5111_v60, %v904_v63  ;;  %v936_v63 = vld [vmem:[%s6321_s21 + $0x58] sm:$0xff]  ;;  %3771 = vmatpush3.bf16.msra.mxu1 %v3770_v54  ;;  %3744 = vmatpush3.bf16.msra.mxu0 %v3743_v55  ;;  %v3773_v0 = vpack.c.bf16 %v968_v61, %v967_v56 }
 0x207   : > { %976 = vrot.lane.b32.xlu1 %v5126_v4, %s6279_s24  ;;  %v3747_v1 = vpack.c.bf16 %v936_v63, %v935_v62  ;;  %3772 = vmatprep.subr.bf16.mxu1 %v4862_v5  ;;  %v1149_v62 = vld [vmem:[%s6325_s9] sm:$0xff]  ;;  %v1152_v63 = vld [vmem:[%s6326_s10 + $0x8] sm:$0xff] }
 0x208   : > { %v4227_v21 = vpack.i.bf16 %v5123_v3, %v5138_v10  ;;  %3746 = vmatprep.subr.bf16.mxu0 %v3745_v59 }
 0x20a   : > { %4228 = vrot.lane.b32.xlu0 %v4227_v21, %s6279_s24  ;;  %3774 = vmatpush3.bf16.msra.mxu1 %v3773_v0  ;;  %v939_v21 = vld [vmem:[%s6321_s21 + $0x70] sm:$0xff]  ;;  %s6324_s24 = smov 108   ;;  %v1151_v0 = vld [vmem:[%s6326_s10] sm:$0xff] }
 0x20b   : > { %3748 = vmatpush3.bf16.msra.mxu0 %v3747_v1  ;;  %3775 = vmatprep.subr.bf16.mxu1 %v4862_v5  ;;  %v3755_v25 = vpack.c.bf16 %v940_v22, %v939_v21 }
 0x20c   : > { %3750 = vmatprep.subr.bf16.mxu0 %v3749_v8 }
 0x20e   : > { %3777 = vmatpush3.bf16.msra.mxu1 %v3776_v14 }
 0x20f   : > { %3752 = vmatpush3.bf16.msra.mxu0 %v3751_v15  ;;  %3778 = vmatprep.subr.bf16.mxu1 %v4862_v5 }
 0x210   : > { %3754 = vmatprep.subr.bf16.mxu0 %v3753_v19 }
 0x212   : > { %3780 = vmatpush3.bf16.msra.mxu1 %v3779_v24 }
 0x213   : > { %3756 = vmatpush3.bf16.msra.mxu0 %v3755_v25 }
 0x279   : > { %v977_v29 = vpop.permute.xlu1 %976 }
 0x27c   : > { %v4229_v26 = vpop.permute.xlu0 %4228 }
 0x27d   : > { %v4231_v27 = vunpack.i.h.bf16 %v4229_v26  ;;  %v4230_v28 = vunpack.i.l.bf16 %v4229_v26 }
 0x27f   : > { %v987_v30 = vsel %vm638_vm2, %v4231_v27, 0.0  ;;  %v982_v31 = vsel %vm638_vm2, %v977_v29, %v4230_v28  ;;  %v983_v32 = vsel %vm638_vm2, %v4230_v28, %v4231_v27 }
 0x280   : > { %v988_v33 = vmax.f32 %v5126_v4, %v982_v31  ;;  %v989_v35 = vmax.f32 %v5138_v10, %v983_v32  ;;  %v990_v36 = vmax.f32 %v5123_v3, %v987_v30 }
 0x282   : > { %994 = vrot.lane.b32.xlu1 %v988_v33, %s6281_s25  ;;  %v4232_v37 = vpack.i.bf16 %v990_v36, %v989_v35 }
 0x284   : > { %4233 = vrot.lane.b32.xlu0 %v4232_v37, %s6281_s25  ;;  %s6330_s25 = sld [smem:[#allocation4_spill]] }
 0x2f4   : > { %v995_v41 = vpop.permute.xlu1 %994 }
 0x2f6   : > { %v4234_v38 = vpop.permute.xlu0 %4233 }
 0x2f7   : > { %v4236_v39 = vunpack.i.h.bf16 %v4234_v38  ;;  %v4235_v40 = vunpack.i.l.bf16 %v4234_v38 }
 0x2f9   : > { %v1005_v43 = vsel %vm6301_vm4, %v4236_v39, 0.0  ;;  %v1000_v44 = vsel %vm6301_vm4, %v995_v41, %v4235_v40  ;;  %v1001_v45 = vsel %vm6301_vm4, %v4235_v40, %v4236_v39 }
 0x2fa   : > { %v1008_v46 = vmax.f32 %v990_v36, %v1005_v43  ;;  %v1007_v47 = vmax.f32 %v989_v35, %v1001_v45  ;;  %v1006_v48 = vmax.f32 %v988_v33, %v1000_v44  ;;  %v1150_v45 = vld [vmem:[%s6325_s9 + $0x8] sm:$0xff] }
 0x2fc   : > { %1073 = vmatprep.mubr.f32.mxu0 %v1007_v47  ;;  %3536 = vmatmul.mubr.f32.vlgmr.msra.gmra.mrb[2].mxu1 %v1008_v46 }
 0x2fd   : > { %1074 = vmatmul.mubr.f32.vlgmr.msra.gmra.mrb[2].mxu0 %v1006_v48 }
 0x2fe   : > { %3556 = vmatprep.mubr.msk.f32.mxu0 %vm6299_vm13, %v1149_v62  ;;  %v1320_v62 = vld [vmem:[%s6330_s25 + $0x10] sm:$0xff] }
 0x3cf   : > { %v1145_v49 = vpop.f32.mrb[2].mxu1 }
 0x3d0   : > { %v3343_v50 = vpop.f32.mrb[2].mxu0  ;;  %v3537_v51 = vpop.f32.mrb[3].mxu1 }
 0x3d1   : > { %v3344_v52 = vpop.f32.mrb[3].mxu0 }
 0x3d2   : > { %v3345_v53 = vadd.f32 %v3344_v52, %v3343_v50 }
 0x3d4   : > { %v1146_v54 = vadd.f32 %v3345_v53, %v1145_v49  ;;  %v3270_v53 = vld [vmem:[%s6329_s6] ss:$0 sm:$0xff]  ;;  %s4883_s6 = smov 121  }
 0x3d6   : > { %1154 = vrot.lane.b32.xlu0 %v1146_v54, %s6285_s23  ;;  %s6332_s23 = smov 116  }
 0x448   : > { %v1155_v55 = vpop.permute.xlu0 %1154 }
 0x449   : > { %v1158_v56 = vsel %vm1157_vm14, 0.0, %v1155_v55  ;;  %v1159_v59 = vsel %vm1157_vm14, %v1155_v55, 0.0 }
 0x44a   : > { %v4242_v61 = vpack.i.bf16 %v1159_v59, %v1158_v56 }
 0x44c   : > { %4243 = vrot.lane.b32.xlu0 %v4242_v61, %s6322_s27  ;;  %4238 = vrot.lane.b32.xlu1 %v4242_v61, %s6323_s22 }
 0x450   : > { %4253 = vrot.lane.b32.xlu0 %v4242_v61, %s6283_s2  ;;  %4248 = vrot.lane.b32.xlu1 %v4242_v61, %s6297_s20  ;;  %s4881_s20 = smov 7   ;;  %s6333_s2 = smov 11  }
 0x454   : > { %4263 = vrot.lane.b32.xlu0 %v4242_v61, %s6324_s24  ;;  %4258 = vrot.lane.b32.xlu1 %v4242_v61, %s6287_s1  ;;  %s6350_s1 = smov 109  }
 0x458   : > { %1208 = vrot.lane.b32.xlu0 %v1158_v56, %s6293_s29  ;;  %4268 = vrot.lane.b32.xlu1 %v4242_v61, %s6295_s26  ;;  %v1319_v61 = vld [vmem:[%s6330_s25 + $0x8] sm:$0xff]  ;;  %s4884_s26 = smov 120  }
 0x45c   : > { %1210 = vrot.lane.b32.xlu1 %v1159_v59, %s6293_s29  ;;  %1217 = vperm.xlu0 %4272, %v1151_v0   ;;  %v1318_v59 = vld [vmem:[%s6330_s25] sm:$0xff]  ;;  %s4882_s29 = smov 122  }
 0x45d   : > { %v3799_v0 = vpack.c.bf16 %v1319_v61, %v1318_v59 }
 0x45f   : > { %3800 = vmatprep.subr.bf16.mxu1 %v3799_v0 }
 0x460   : > { %1222 = vperm.xlu1 %4226, %v1152_v63   ;;  %3802 = vmatpush3.bf16.msra.mxu1 %v3799_v0  ;;  %v1438_v0 = vld [vmem:[%s6254_s12 + $0x8] sm:$0xff] }
 0x4be   : > { %v4244_v1 = vpop.permute.xlu0 %4243  ;;  %v4239_v2 = vpop.permute.xlu1 %4238 }
 0x4bf   : > { %v4241_v7 = vunpack.i.h.bf16 %v4239_v2  ;;  %v4240_v8 = vunpack.i.l.bf16 %v4239_v2  ;;  %v4246_v9 = vunpack.i.h.bf16 %v4244_v1  ;;  %v4245_v11 = vunpack.i.l.bf16 %v4244_v1  ;;  %v1321_v1 = vld [vmem:[%s6330_s25 + $0x18] sm:$0xff] }
 0x4c1   : > { %v1166_v12 = vsel %vm638_vm2, %v4240_v8, %v4241_v7  ;;  %v1172_v21 = vsel %vm653_vm7, %v4245_v11, %v4246_v9  ;;  %v3803_v7 = vpack.c.bf16 %v1321_v1, %v1320_v62  ;;  %v1322_v8 = vld [vmem:[%s6330_s25 + $0x20] sm:$0xff]  ;;  %v1323_v9 = vld [vmem:[%s6330_s25 + $0x28] sm:$0xff] }
 0x4c2   : > { %v4254_v14 = vpop.permute.xlu0 %4253  ;;  %v4249_v15 = vpop.permute.xlu1 %4248  ;;  %v3781_v16 = vpack.c.bf16 %v1166_v12, %v1155_v55  ;;  %v3807_v12 = vpack.c.bf16 %v1323_v9, %v1322_v8  ;;  %v1437_v1 = vld [vmem:[%s6254_s12] sm:$0xff] }
 0x4c3   : > { %v4251_v17 = vunpack.i.h.bf16 %v4249_v15  ;;  %v4250_v18 = vunpack.i.l.bf16 %v4249_v15  ;;  %v4256_v19 = vunpack.i.h.bf16 %v4254_v14  ;;  %v4255_v20 = vunpack.i.l.bf16 %v4254_v14  ;;  %3804 = vmatprep.subr.bf16.mxu1 %v3803_v7  ;;  %v1324_v14 = vld [vmem:[%s6330_s25 + $0x30] sm:$0xff]  ;;  %v1325_v15 = vld [vmem:[%s6330_s25 + $0x38] sm:$0xff] }
 0x4c4   : > { %3783 = vmatprep.subr.msk.bf16.mxu0 %vm3782_vm1, %v3781_v16  ;;  %3806 = vmatpush3.bf16.msra.mxu1 %v3803_v7 }
 0x4c5   : > { %3786 = vmatpush3.bf16.msk.msra.mxu0 %vm3782_vm1, %v3781_v16  ;;  %v1179_v22 = vsel %vm1178_vm12, %v4250_v18, %v4251_v17  ;;  %v1186_v31 = vsel %vm1185_vm11, %v4255_v20, %v4256_v19  ;;  %vm1205_vm1 = vcmask 875520   ;;  %3808 = vmatprep.subr.bf16.mxu1 %v3807_v12  ;;  %v3811_v16 = vpack.c.bf16 %v1325_v15, %v1324_v14  ;;  %v1326_v17 = vld [vmem:[%s6330_s25 + $0x40] sm:$0xff]  ;;  %v1327_v18 = vld [vmem:[%s6330_s25 + $0x48] sm:$0xff]  ;;  %v1328_v20 = vld [vmem:[%s6330_s25 + $0x50] sm:$0xff] }
 0x4c6   : > { %v4264_v24 = vpop.permute.xlu0 %4263  ;;  %v4259_v25 = vpop.permute.xlu1 %4258  ;;  %v3787_v26 = vpack.c.bf16 %v1179_v22, %v1172_v21  ;;  %v3815_v19 = vpack.c.bf16 %v1327_v18, %v1326_v17  ;;  %v1329_v21 = vld [vmem:[%s6330_s25 + $0x58] sm:$0xff] }
 0x4c7   : > { %v4261_v27 = vunpack.i.h.bf16 %v4259_v25  ;;  %v4260_v28 = vunpack.i.l.bf16 %v4259_v25  ;;  %v4266_v29 = vunpack.i.h.bf16 %v4264_v24  ;;  %v4265_v30 = vunpack.i.l.bf16 %v4264_v24  ;;  %v1330_v24 = vld [vmem:[%s6330_s25 + $0x60] sm:$0xff]  ;;  %v1331_v25 = vld [vmem:[%s6330_s25 + $0x68] sm:$0xff] }
 0x4c8   : > { %3788 = vmatprep.subr.bf16.mxu0 %v3787_v26  ;;  %3810 = vmatpush3.bf16.msra.mxu1 %v3807_v12  ;;  %v3819_v22 = vpack.c.bf16 %v1329_v21, %v1328_v20 }
 0x4c9   : > { %3790 = vmatpush3.bf16.msra.mxu0 %v3787_v26  ;;  %v1193_v32 = vsel %vm1192_vm10, %v4260_v28, %v4261_v27  ;;  %v1199_v38 = vsel %vm698_vm9, %v4265_v30, %v4266_v29  ;;  %3812 = vmatprep.subr.bf16.mxu1 %v3811_v16  ;;  %v3823_v26 = vpack.c.bf16 %v1331_v25, %v1330_v24  ;;  %v1332_v27 = vld [vmem:[%s6330_s25 + $0x70] sm:$0xff]  ;;  %v1333_v28 = vld [vmem:[%s6330_s25 + $0x78] sm:$0xff] }
 0x4ca   : > { %v4269_v33 = vpop.permute.xlu1 %4268  ;;  %v3791_v35 = vpack.c.bf16 %v1193_v32, %v1186_v31  ;;  %v1209_v43 = vpop.permute.xlu0 %1208  ;;  %v3827_v29 = vpack.c.bf16 %v1333_v28, %v1332_v27 }
 0x4cb   : > { %v4271_v36 = vunpack.i.h.bf16 %v4269_v33  ;;  %v4270_v37 = vunpack.i.l.bf16 %v4269_v33 }
 0x4cc   : > { %3792 = vmatprep.subr.bf16.mxu0 %v3791_v35  ;;  %3814 = vmatpush3.bf16.msra.mxu1 %v3811_v16 }
 0x4cd   : > { %3794 = vmatpush3.bf16.msra.mxu0 %v3791_v35  ;;  %v1206_v39 = vsel %vm1205_vm1, %v4270_v37, %v4271_v36  ;;  %3816 = vmatprep.subr.bf16.mxu1 %v3815_v19 }
 0x4ce   : > { %v1211_v40 = vpop.permute.xlu1 %1210  ;;  %v3795_v41 = vpack.c.bf16 %v1206_v39, %v1199_v38 }
 0x4cf   : > { %v1213_v44 = vsel %vm1212_vm5, %v1209_v43, %v1211_v40 }
 0x4d0   : > { %3796 = vmatprep.subr.bf16.mxu0 %v3795_v41  ;;  %3818 = vmatpush3.bf16.msra.mxu1 %v3815_v19 }
 0x4d1   : > { %3798 = vmatpush3.bf16.msra.mxu0 %v3795_v41  ;;  %3820 = vmatprep.subr.bf16.mxu1 %v3819_v22 }
 0x4d2   : > { %3554 = vmatprep.subr.mxu0 %v1213_v44 }
 0x4d4   : > { %3822 = vmatpush3.bf16.msra.mxu1 %v3819_v22 }
 0x4d5   : > { %3555 = vmatpush3.msra.mxu0 %v1213_v44  ;;  %3824 = vmatprep.subr.bf16.mxu1 %v3823_v26 }
 0x4d6   : > { %3557 = vmatmul.mubr.msk.f32.vlgmr.msra.gmra.mrb[4].mxu0 %vm6299_vm13, %v1150_v45  ;;  %3831 = vmatprep.subr.bf16.mxu0 %v4862_v5  ;;  %vm1447_vm13 = vcmask 56320  }
 0x4d7   : > { %vm3271_vm8 = vmneg %vm1447_vm13 }
 0x4d8   : > { %3826 = vmatpush3.bf16.msra.mxu1 %v3823_v26  ;;  %vm3833_vm4 = vmpackc.low %vm3271_vm8, %vm3271_vm8  ;;  %vm1488_vm8 = vcmask 998400  }
 0x4d9   : > { %3828 = vmatprep.subr.bf16.mxu1 %v3827_v29 }
 0x4db   : > { %v1218_v46 = vpop.permute.xlu0 %1217 }
 0x4dc   : > { %3830 = vmatpush3.bf16.msra.mxu1 %v3827_v29 }
 0x4df   : > { %v1223_v47 = vpop.permute.xlu1 %1222 }
 0x5a9   : > { %v3558_v48 = vpop.f32.mrb[4].mxu0 }
 0x5aa   : > { %v1303_v49 = vadd.f32 %v3558_v48, %v1223_v47  ;;  %v1297_v50 = vpop.f32.mrb[5].mxu0 }
 0x5ab   : > { %v1298_v51 = vadd.f32 %v1297_v50, %v1218_v46 }
 0x5ac   : > { %v1307_v52 = vmul.f32 0.2, %v1303_v49 }
 0x5ad   : > { %v1306_v54 = vmul.f32 0.2, %v1298_v51 }
 0x5ae   : > { %v1309_v55 = vmax.f32 %v1303_v49, %v1307_v52 }
 0x5af   : > { %v1308_v56 = vmax.f32 %v1298_v51, %v1306_v54 }
 0x5b0   : > { %v1317_v63 = vmul.f32 %v3270_v53, %v1309_v55 }
 0x5b1   : > { %v1316_v2 = vmul.f32 %v3270_v53, %v1308_v56 }
 0x5b3   : > { %v5353_v11 = vpack.i.bf16 %v1317_v63, %v1316_v2 }
 0x5b5   : > { %4274 = vrot.lane.b32.xlu1 %v5353_v11, %s6323_s22 }
 0x627   : > { %v4275_v30 = vpop.permute.xlu1 %4274 }
 0x628   : > { %v4277_v31 = vunpack.i.h.bf16 %v4275_v30  ;;  %v4276_v32 = vunpack.i.l.bf16 %v4275_v30 }
 0x62a   : > { %v1343_v33 = vsel %vm638_vm2, %v4277_v31, 0.0  ;;  %v1342_v35 = vsel %vm638_vm2, %v4276_v32, 0.0 }
 0x62b   : > { %v1344_v36 = vmax.f32 %v1316_v2, %v1342_v35  ;;  %v1345_v37 = vmax.f32 %v1317_v63, %v1343_v33  ;;  %v1434_v63 = vld [vmem:[%s6253_s11 + $0x8] sm:$0xff] }
 0x62d   : > { %v4278_v38 = vpack.i.bf16 %v1345_v37, %v1344_v36 }
 0x62f   : > { %4279 = vrot.lane.b32.xlu0 %v4278_v38, %s6331_s5 }
 0x6a1   : > { %v4280_v39 = vpop.permute.xlu0 %4279 }
 0x6a2   : > { %v4282_v40 = vunpack.i.h.bf16 %v4280_v39  ;;  %v4281_v41 = vunpack.i.l.bf16 %v4280_v39 }
 0x6a4   : > { %v1355_v43 = vsel %vm1178_vm12, %v4282_v40, 0.0  ;;  %v1354_v44 = vsel %vm1178_vm12, %v4281_v41, 0.0 }
 0x6a5   : > { %v1357_v45 = vmax.f32 %v1345_v37, %v1355_v43  ;;  %v1356_v46 = vmax.f32 %v1344_v36, %v1354_v44 }
 0x6a7   : > { %3591 = vmatprep.mubr.f32.mxu1 %v1356_v46 }
 0x6a8   : > { %3592 = vmatmul.mubr.f32.vlgmr.msra.gmra.mrb[4].mxu1 %v1357_v45 }
 0x77b   : > { %v3593_v47 = vpop.f32.mrb[4].mxu1 }
 0x77c   : > { %v1424_v48 = vpop.f32.mrb[5].mxu1 }
 0x77d   : > { %v4283_v49 = vpack.i.bf16 %v3593_v47, %v1424_v48 }
 0x77f   : > { %4284 = vrot.lane.b32.xlu1 %v4283_v49, %s4881_s20  ;;  %s6336_s20 = smov 107  }
 0x7f1   : > { %v4285_v50 = vpop.permute.xlu1 %4284 }
 0x7f2   : > { %v4287_v51 = vunpack.i.h.bf16 %v4285_v50  ;;  %v4286_v52 = vunpack.i.l.bf16 %v4285_v50 }
 0x7f4   : > { %v1449_v53 = vsel %vm1447_vm13, 0.0, %v4287_v51  ;;  %v1451_v54 = vsel %vm1447_vm13, %v4287_v51, 0.0  ;;  %v1448_v55 = vsel %vm1447_vm13, 0.0, %v4286_v52  ;;  %v1450_v56 = vsel %vm1447_vm13, %v4286_v52, 0.0 }
 0x7f5   : > { %v3832_v59 = vpack.c.bf16 %v4287_v51, %v4286_v52  ;;  %v4288_v61 = vpack.i.bf16 %v1451_v54, %v1449_v53  ;;  %v4323_v62 = vpack.i.bf16 %v1450_v56, %v1448_v55  ;;  %vm1501_vm13 = vcmask 990208  }
 0x7f7   : > { %3834 = vmatpush1.bf16.msk.msra.mxu0 %vm3833_vm4, %v3832_v59  ;;  %4289 = vrot.lane.b32.xlu1 %v4288_v61, %s6323_s22  ;;  %vm1567_vm4 = vcmask 130048  }
 0x7f8   : > { %4324 = vrot.lane.b32.xlu0 %v4323_v62, %s6323_s22  ;;  %3835 = vmatprep.subr.bf16.mxu0 %v4862_v5 }
 0x7f9   : > { %3275 = vmatprep.mubr.msk.f32.mxu0 %vm1567_vm4, %v1434_v63 }
 0x7fb   : > { %4294 = vrot.lane.b32.xlu1 %v4288_v61, %s6322_s27 }
 0x7fc   : > { %4329 = vrot.lane.b32.xlu0 %v4323_v62, %s6322_s27 }
 0x7ff   : > { %4299 = vrot.lane.b32.xlu1 %v4288_v61, %s4882_s29 }
 0x800   : > { %4334 = vrot.lane.b32.xlu0 %v4323_v62, %s4882_s29  ;;  %s6355_s29 = smov 90  }
 0x803   : > { %4304 = vrot.lane.b32.xlu1 %v4288_v61, %s4883_s6 }
 0x804   : > { %4339 = vrot.lane.b32.xlu0 %v4323_v62, %s4883_s6  ;;  %s6347_s6 = smov 110  }
 0x807   : > { %4309 = vrot.lane.b32.xlu1 %v4288_v61, %s4884_s26 }
 0x808   : > { %4344 = vrot.lane.b32.xlu0 %v4323_v62, %s4884_s26  ;;  %s6334_s26 = smov 117  }
 0x80b   : > { %4314 = vrot.lane.b32.xlu1 %v4288_v61, %s6332_s23 }
 0x80c   : > { %4349 = vrot.lane.b32.xlu0 %v4323_v62, %s6332_s23 }
 0x80f   : > { %4319 = vrot.lane.b32.xlu1 %v4288_v61, %s4885_s3 }
 0x810   : > { %4354 = vrot.lane.b32.xlu0 %v4323_v62, %s4885_s3  ;;  %s6354_s3 = smov 91  }
 0x813   : > { %4364 = vrot.lane.b32.xlu1 %v4288_v61, %s4886_s28 }
 0x814   : > { %4359 = vrot.lane.b32.xlu0 %v4323_v62, %s4886_s28  ;;  %s6335_s28 = sld [smem:[#allocation5_spill]] }
 0x817   : > { %1564 = vperm.xlu1 %4226, %v1438_v0  }
 0x818   : > { %1559 = vperm.xlu0 %4272, %v1437_v1  }
 0x81b   : > { %4374 = vrot.lane.b32.xlu1 %v5353_v11, %s6333_s2 }
 0x869   : > { %v4290_v2 = vpop.permute.xlu1 %4289 }
 0x86a   : > { %v4292_v7 = vunpack.i.h.bf16 %v4290_v2  ;;  %v4291_v8 = vunpack.i.l.bf16 %v4290_v2  ;;  %v4325_v9 = vpop.permute.xlu0 %4324 }
 0x86b   : > { %v4327_v12 = vunpack.i.h.bf16 %v4325_v9  ;;  %v4326_v14 = vunpack.i.l.bf16 %v4325_v9 }
 0x86c   : > { %v1465_v15 = vsel %vm638_vm2, %v4291_v8, %v4292_v7 }
 0x86d   : > { %v1464_v16 = vsel %vm638_vm2, %v4326_v14, %v4327_v12  ;;  %v4295_v17 = vpop.permute.xlu1 %4294 }
 0x86e   : > { %v4297_v18 = vunpack.i.h.bf16 %v4295_v17  ;;  %v4296_v19 = vunpack.i.l.bf16 %v4295_v17  ;;  %v4330_v20 = vpop.permute.xlu0 %4329  ;;  %v3836_v21 = vpack.c.bf16 %v1465_v15, %v1464_v16 }
 0x86f   : > { %v4332_v22 = vunpack.i.h.bf16 %v4330_v20  ;;  %v4331_v24 = vunpack.i.l.bf16 %v4330_v20 }
 0x870   : > { %v1477_v25 = vsel %vm653_vm7, %v4296_v19, %v4297_v18  ;;  %3837 = vmatpush1.bf16.msra.mxu0 %v3836_v21 }
 0x871   : > { %v1476_v11 = vsel %vm653_vm7, %v4331_v24, %v4332_v22  ;;  %v4300_v26 = vpop.permute.xlu1 %4299  ;;  %3838 = vmatprep.subr.bf16.mxu0 %v4862_v5 }
 0x872   : > { %v4302_v27 = vunpack.i.h.bf16 %v4300_v26  ;;  %v4301_v28 = vunpack.i.l.bf16 %v4300_v26  ;;  %v4335_v29 = vpop.permute.xlu0 %4334  ;;  %v3839_v30 = vpack.c.bf16 %v1477_v25, %v1476_v11 }
 0x873   : > { %v4337_v31 = vunpack.i.h.bf16 %v4335_v29  ;;  %v4336_v32 = vunpack.i.l.bf16 %v4335_v29  ;;  %v1433_v29 = vld [vmem:[%s6253_s11] sm:$0xff] }
 0x874   : > { %v1490_v33 = vsel %vm1488_vm8, %v4301_v28, %v4302_v27  ;;  %3840 = vmatpush1.bf16.msra.mxu0 %v3839_v30  ;;  %v1436_v30 = vld [vmem:[%s6253_s11 + $0x18] sm:$0xff] }
 0x875   : > { %v1489_v35 = vsel %vm1488_vm8, %v4336_v32, %v4337_v31  ;;  %v4305_v36 = vpop.permute.xlu1 %4304  ;;  %3841 = vmatprep.subr.bf16.mxu0 %v4862_v5  ;;  %vm1539_vm8 = vcmask 941056   ;;  %v1435_v31 = vld [vmem:[%s6253_s11 + $0x10] sm:$0xff] }
 0x876   : > { %v4307_v37 = vunpack.i.h.bf16 %v4305_v36  ;;  %v4306_v38 = vunpack.i.l.bf16 %v4305_v36  ;;  %v4340_v39 = vpop.permute.xlu0 %4339  ;;  %v3842_v40 = vpack.c.bf16 %v1490_v33, %v1489_v35 }
 0x877   : > { %v4342_v41 = vunpack.i.h.bf16 %v4340_v39  ;;  %v4341_v43 = vunpack.i.l.bf16 %v4340_v39 }
 0x878   : > { %v1503_v44 = vsel %vm1501_vm13, %v4306_v38, %v4307_v37  ;;  %3843 = vmatpush1.bf16.msra.mxu0 %v3842_v40 }
 0x879   : > { %v1502_v45 = vsel %vm1501_vm13, %v4341_v43, %v4342_v41  ;;  %v4310_v46 = vpop.permute.xlu1 %4309  ;;  %3844 = vmatprep.subr.bf16.mxu0 %v4862_v5 }
 0x87a   : > { %v4312_v47 = vunpack.i.h.bf16 %v4310_v46  ;;  %v4311_v48 = vunpack.i.l.bf16 %v4310_v46  ;;  %v4345_v49 = vpop.permute.xlu0 %4344  ;;  %v3845_v50 = vpack.c.bf16 %v1503_v44, %v1502_v45  ;;  %v1653_v45 = vld [vmem:[%s6335_s28] sm:$0xff]  ;;  %v1654_v46 = vld [vmem:[%s6335_s28 + $0x8] sm:$0xff] }
 0x87b   : > { %v4347_v51 = vunpack.i.h.bf16 %v4345_v49  ;;  %v4346_v52 = vunpack.i.l.bf16 %v4345_v49  ;;  %v1656_v49 = vld [vmem:[%s6335_s28 + $0x18] sm:$0xff] }
 0x87c   : > { %v1516_v53 = vsel %vm1514_vm0, %v4311_v48, %v4312_v47  ;;  %3846 = vmatpush1.bf16.msra.mxu0 %v3845_v50  ;;  %v1655_v47 = vld [vmem:[%s6335_s28 + $0x10] sm:$0xff]  ;;  %v3859_v48 = vpack.c.bf16 %v1654_v46, %v1653_v45  ;;  %v1745_v46 = vld [vmem:[%s6255_s13 + $0x8] sm:$0xff] }
 0x87d   : > { %v1515_v54 = vsel %vm1514_vm0, %v4346_v52, %v4347_v51  ;;  %v4315_v55 = vpop.permute.xlu1 %4314  ;;  %3847 = vmatprep.subr.bf16.mxu0 %v4862_v5  ;;  %vm1552_vm0 = vcmask 932864   ;;  %v3863_v50 = vpack.c.bf16 %v1656_v49, %v1655_v47  ;;  %v1657_v51 = vld [vmem:[%s6335_s28 + $0x20] sm:$0xff]  ;;  %v1658_v52 = vld [vmem:[%s6335_s28 + $0x28] sm:$0xff]  ;;  %v1746_v47 = vld [vmem:[%s6255_s13 + $0x10] sm:$0xff] }
 0x87e   : > { %v4317_v56 = vunpack.i.h.bf16 %v4315_v55  ;;  %v4316_v59 = vunpack.i.l.bf16 %v4315_v55  ;;  %v4350_v61 = vpop.permute.xlu0 %4349  ;;  %v3848_v62 = vpack.c.bf16 %v1516_v53, %v1515_v54  ;;  %3860 = vmatprep.subr.bf16.mxu1 %v3859_v48  ;;  %v3867_v53 = vpack.c.bf16 %v1658_v52, %v1657_v51  ;;  %v1659_v54 = vld [vmem:[%s6335_s28 + $0x30] sm:$0xff]  ;;  %v1660_v55 = vld [vmem:[%s6335_s28 + $0x38] sm:$0xff]  ;;  %v1750_v49 = vld [vmem:[%s6256_s14] sm:$0xff] }
 0x87f   : > { %v4352_v63 = vunpack.i.h.bf16 %v4350_v61  ;;  %v4351_v0 = vunpack.i.l.bf16 %v4350_v61  ;;  %3862 = vmatpush3.bf16.msra.mxu1 %v3859_v48  ;;  %v1662_v61 = vld [vmem:[%s6335_s28 + $0x48] sm:$0xff] }
 0x880   : > { %v1528_v1 = vsel %vm1192_vm10, %v4316_v59, %v4317_v56  ;;  %3849 = vmatpush1.bf16.msra.mxu0 %v3848_v62  ;;  %3864 = vmatprep.subr.bf16.mxu1 %v3863_v50  ;;  %v3871_v56 = vpack.c.bf16 %v1660_v55, %v1659_v54  ;;  %v1661_v59 = vld [vmem:[%s6335_s28 + $0x40] sm:$0xff]  ;;  %v1751_v48 = vld [vmem:[%s6256_s14 + $0x8] sm:$0xff] }
 0x881   : > { %v1527_v2 = vsel %vm1192_vm10, %v4351_v0, %v4352_v63  ;;  %v4320_v7 = vpop.permute.xlu1 %4319  ;;  %3850 = vmatprep.subr.bf16.mxu0 %v4862_v5  ;;  %v3875_v62 = vpack.c.bf16 %v1662_v61, %v1661_v59  ;;  %v1663_v63 = vld [vmem:[%s6335_s28 + $0x50] sm:$0xff]  ;;  %v1664_v0 = vld [vmem:[%s6335_s28 + $0x58] sm:$0xff] }
 0x882   : > { %v4322_v8 = vunpack.i.h.bf16 %v4320_v7  ;;  %v4321_v9 = vunpack.i.l.bf16 %v4320_v7  ;;  %v4355_v12 = vpop.permute.xlu0 %4354  ;;  %v3851_v14 = vpack.c.bf16 %v1528_v1, %v1527_v2  ;;  %v3879_v1 = vpack.c.bf16 %v1664_v0, %v1663_v63  ;;  %v1665_v2 = vld [vmem:[%s6335_s28 + $0x60] sm:$0xff]  ;;  %v1666_v7 = vld [vmem:[%s6335_s28 + $0x68] sm:$0xff] }
 0x883   : > { %v4357_v15 = vunpack.i.h.bf16 %v4355_v12  ;;  %v4356_v16 = vunpack.i.l.bf16 %v4355_v12  ;;  %3866 = vmatpush3.bf16.msra.mxu1 %v3863_v50  ;;  %v1668_v12 = vld [vmem:[%s6335_s28 + $0x78] sm:$0xff] }
 0x884   : > { %v1541_v17 = vsel %vm1539_vm8, %v4321_v9, %v4322_v8  ;;  %3852 = vmatpush1.bf16.msra.mxu0 %v3851_v14  ;;  %3868 = vmatprep.subr.bf16.mxu1 %v3867_v53  ;;  %v3883_v8 = vpack.c.bf16 %v1666_v7, %v1665_v2  ;;  %v1667_v9 = vld [vmem:[%s6335_s28 + $0x70] sm:$0xff] }
 0x885   : > { %v1540_v18 = vsel %vm1539_vm8, %v4356_v16, %v4357_v15  ;;  %v4365_v19 = vpop.permute.xlu1 %4364  ;;  %3853 = vmatprep.subr.bf16.mxu0 %v4862_v5  ;;  %v3887_v14 = vpack.c.bf16 %v1668_v12, %v1667_v9 }
 0x886   : > { %v4367_v20 = vunpack.i.h.bf16 %v4365_v19  ;;  %v4366_v21 = vunpack.i.l.bf16 %v4365_v19  ;;  %v4360_v22 = vpop.permute.xlu0 %4359  ;;  %v3854_v24 = vpack.c.bf16 %v1541_v17, %v1540_v18 }
 0x887   : > { %v4362_v25 = vunpack.i.h.bf16 %v4360_v22  ;;  %v4361_v11 = vunpack.i.l.bf16 %v4360_v22  ;;  %3870 = vmatpush3.bf16.msra.mxu1 %v3867_v53 }
 0x888   : > { %v1554_v26 = vsel %vm1552_vm0, %v4366_v21, %v4367_v20  ;;  %3855 = vmatpush1.bf16.msra.mxu0 %v3854_v24  ;;  %3872 = vmatprep.subr.bf16.mxu1 %v3871_v56 }
 0x889   : > { %v1553_v27 = vsel %vm1552_vm0, %v4361_v11, %v4362_v25  ;;  %3856 = vmatprep.subr.bf16.mxu0 %v4862_v5 }
 0x88a   : > { %v3857_v28 = vpack.c.bf16 %v1554_v26, %v1553_v27 }
 0x88b   : > { %3874 = vmatpush3.bf16.msra.mxu1 %v3871_v56 }
 0x88c   : > { %3858 = vmatpush1.bf16.msra.mxu0 %v3857_v28  ;;  %3876 = vmatprep.subr.bf16.mxu1 %v3875_v62 }
 0x88f   : > { %1639 = vmatmul.mubr.f32.vlgmr.msra.gmra.mrb[6].mxu0 %v1433_v29  ;;  %3878 = vmatpush3.bf16.msra.mxu1 %v3875_v62 }
 0x890   : > { %3276 = vmatprep.mubr.msk.f32.mxu0 %vm1567_vm4, %v1436_v30  ;;  %3880 = vmatprep.subr.bf16.mxu1 %v3879_v1  ;;  %vm3894_vm4 = vmpackc.low %vm5312_vm15, %vm5312_vm15 }
 0x893   : > { %1644 = vmatmul.mubr.f32.gmra.mrb[8].mxu0 %v1435_v31  ;;  %3882 = vmatpush3.bf16.msra.mxu1 %v3879_v1 }
 0x894   : > { %3884 = vmatprep.subr.bf16.mxu1 %v3883_v8  ;;  %2055 = vmatprep.mubr.f32.mxu0 %v1745_v46 }
 0x896   : > { %v5434_v32 = vpop.permute.xlu1 %1564 }
 0x897   : > { %3886 = vmatpush3.bf16.msra.mxu1 %v3883_v8  ;;  %v1560_v15 = vpop.permute.xlu0 %1559 }
 0x898   : > { %3888 = vmatprep.subr.bf16.mxu1 %v3887_v14 }
 0x89a   : > { %v4375_v33 = vpop.permute.xlu1 %4374 }
 0x89b   : > { %v5436_v35 = vunpack.i.h.bf16 %v4375_v33  ;;  %v5438_v36 = vunpack.i.l.bf16 %v4375_v33  ;;  %3890 = vmatpush3.bf16.msra.mxu1 %v3887_v14 }
 0x89d   : > { %v1769_v37 = vsel %vm1157_vm14, 0.0, %v5436_v35  ;;  %v1773_v38 = vsel %vm1157_vm14, %v5436_v35, 0.0  ;;  %v1768_v39 = vsel %vm1157_vm14, 0.0, %v5438_v36  ;;  %v1772_v40 = vsel %vm1157_vm14, %v5438_v36, 0.0 }
 0x89e   : > { %v3898_v41 = vpack.c.bf16 %v5436_v35, %v5438_v36  ;;  %v5450_v43 = vpack.i.bf16 %v1773_v38, %v1769_v37  ;;  %v5454_v44 = vpack.i.bf16 %v1772_v40, %v1768_v39 }
 0x8a0   : > { %4384 = vrot.lane.b32.xlu1 %v5450_v43, %s6334_s26 }
 0x8a4   : > { %4394 = vrot.lane.b32.xlu1 %v5450_v43, %s6332_s23 }
 0x8a8   : > { %4404 = vrot.lane.b32.xlu1 %v5450_v43, %s6323_s22 }
 0x8ac   : > { %4414 = vrot.lane.b32.xlu1 %v5450_v43, %s6324_s24 }
 0x8b0   : > { %4424 = vrot.lane.b32.xlu1 %v5450_v43, %s6322_s27 }
 0x8b4   : > { %4434 = vrot.lane.b32.xlu1 %v5450_v43, %s6336_s20 }
 0x912   : > { %v4385_v50 = vpop.permute.xlu1 %4384 }
 0x913   : > { %v4387_v0 = vunpack.i.h.bf16 %v4385_v50  ;;  %v4386_v1 = vunpack.i.l.bf16 %v4385_v50 }
 0x916   : > { %v5581_v52 = vpop.permute.xlu1 %4394 }
 0x91a   : > { %v5583_v53 = vpop.permute.xlu1 %4404 }
 0x91e   : > { %v5585_v54 = vpop.permute.xlu1 %4414 }
 0x91f   : > { %v4417_v6 = vunpack.i.h.bf16 %v5585_v54 }
 0x922   : > { %v5589_v56 = vpop.permute.xlu1 %4424 }
 0x926   : > { %v5593_v61 = vpop.permute.xlu1 %4434 }
 0x962   : > { %v1640_v16 = vpop.f32.mrb[6].mxu0 }
 0x963   : > { %v1641_v17 = vadd.f32 %v1640_v16, %v1560_v15  ;;  %v1642_v18 = vpop.f32.mrb[7].mxu0 }
 0x965   : > { %v1649_v19 = vmul.f32 0.2, %v1641_v17 }
 0x966   : > { %v1645_v20 = vpop.f32.mrb[8].mxu0 }
 0x967   : > { %v1651_v21 = vmax.f32 %v1641_v17, %v1649_v19  ;;  %v1646_v22 = vadd.f32 %v1645_v20, %v5434_v32  ;;  %v1647_v24 = vpop.f32.mrb[9].mxu0 }
 0x969   : > { %v1650_v25 = vmul.f32 0.2, %v1646_v22  ;;  %3626 = vmatprep.mubr.f32.mxu1 %v1651_v21  ;;  %v1873_v21 = vsel %vm1185_vm11, %v4386_v1, %v4387_v0 }
 0x96b   : > { %v1652_v11 = vmax.f32 %v1646_v22, %v1650_v25 }
 0x96d   : > { %3627 = vmatmul.mubr.f32.vlgmr.msra.gmra.mrb[6].mxu1 %v1652_v11 }
 0xa40   : > { %v3628_v26 = vpop.f32.mrb[6].mxu1 }
 0xa41   : > { %v1735_v27 = vpop.f32.mrb[7].mxu1 }
 0xa42   : > { %v4368_v28 = vpack.i.bf16 %v3628_v26, %v1735_v27 }
 0xa44   : > { %4369 = vrot.lane.b32.xlu0 %v4368_v28, %s6333_s2 }
 0xa48   : > { %4379 = vrot.lane.b32.xlu0 %v5454_v44, %s6334_s26 }
 0xa4c   : > { %4389 = vrot.lane.b32.xlu0 %v5454_v44, %s6332_s23 }
 0xa50   : > { %4399 = vrot.lane.b32.xlu0 %v5454_v44, %s6323_s22 }
 0xa54   : > { %4409 = vrot.lane.b32.xlu0 %v5454_v44, %s6324_s24 }
 0xa58   : > { %4419 = vrot.lane.b32.xlu0 %v5454_v44, %s6322_s27 }
 0xa5c   : > { %4429 = vrot.lane.b32.xlu0 %v5454_v44, %s6336_s20 }
 0xab6   : > { %v4370_v29 = vpop.permute.xlu0 %4369 }
 0xab7   : > { %v5528_v30 = vunpack.i.h.bf16 %v4370_v29  ;;  %v5530_v31 = vunpack.i.l.bf16 %v4370_v29 }
 0xab9   : > { %v1767_v32 = vsel %vm1157_vm14, 0.0, %v5528_v30  ;;  %v1771_v33 = vsel %vm1157_vm14, %v5528_v30, 0.0  ;;  %v1766_v37 = vsel %vm1157_vm14, 0.0, %v5530_v31  ;;  %v1770_v38 = vsel %vm1157_vm14, %v5530_v31, 0.0 }
 0xaba   : > { %v3893_v39 = vpack.c.bf16 %v5528_v30, %v5530_v31  ;;  %v4438_v40 = vpack.i.bf16 %v1771_v33, %v1767_v32  ;;  %v4473_v45 = vpack.i.bf16 %v1770_v38, %v1766_v37  ;;  %vm1984_vm14 = vcmask 261120   ;;  %v4380_v51 = vpop.permute.xlu0 %4379 }
 0xabb   : > { %3637 = vmatprep.mubr.msk.f32.mxu1 %vm1984_vm14, %v1746_v47  ;;  %v4381_v63 = vunpack.i.l.bf16 %v4380_v51  ;;  %v4397_v33 = vunpack.i.h.bf16 %v5581_v52  ;;  %v4396_v37 = vunpack.i.l.bf16 %v5581_v52 }
 0xabc   : > { %4439 = vrot.lane.b32.xlu1 %v4438_v40, %s6334_s26  ;;  %4474 = vrot.lane.b32.xlu0 %v4473_v45, %s6334_s26 }
 0xabd   : > { %v1897_v0 = vsel %vm1192_vm10, %v4396_v37, %v4397_v33 }
 0xac0   : > { %4444 = vrot.lane.b32.xlu1 %v4438_v40, %s6332_s23  ;;  %4479 = vrot.lane.b32.xlu0 %v4473_v45, %s6332_s23 }
 0xac4   : > { %4449 = vrot.lane.b32.xlu1 %v4438_v40, %s6323_s22  ;;  %4484 = vrot.lane.b32.xlu0 %v4473_v45, %s6323_s22 }
 0xac8   : > { %4454 = vrot.lane.b32.xlu1 %v4438_v40, %s6324_s24  ;;  %4489 = vrot.lane.b32.xlu0 %v4473_v45, %s6324_s24 }
 0xacc   : > { %4459 = vrot.lane.b32.xlu1 %v4438_v40, %s6322_s27  ;;  %4494 = vrot.lane.b32.xlu0 %v4473_v45, %s6322_s27 }
 0xad0   : > { %4464 = vrot.lane.b32.xlu1 %v4438_v40, %s6336_s20  ;;  %4499 = vrot.lane.b32.xlu0 %v4473_v45, %s6336_s20  ;;  %s6337_s20 = smov 106  }
 0xad4   : > { %4469 = vrot.lane.b32.xlu1 %v4438_v40, %s6331_s5  ;;  %4504 = vrot.lane.b32.xlu0 %v4473_v45, %s6331_s5 }
 0xad8   : > { %4514 = vrot.lane.b32.xlu1 %v5450_v43, %s6331_s5  ;;  %4509 = vrot.lane.b32.xlu0 %v5454_v44, %s6331_s5  ;;  %s6352_s5 = smov 92  }
 0xadc   : > { %4519 = vrot.lane.b32.xlu1 %v4438_v40, %s6337_s20  ;;  %4524 = vrot.lane.b32.xlu0 %v4473_v45, %s6337_s20 }
 0xae0   : > { %4534 = vrot.lane.b32.xlu1 %v5450_v43, %s6337_s20  ;;  %4529 = vrot.lane.b32.xlu0 %v5454_v44, %s6337_s20  ;;  %v4390_v43 = vpop.permute.xlu0 %4389  ;;  %s4120_s20 = smul.u32 6, %s6424_s30 }
 0xae1   : > { %v4392_v27 = vunpack.i.h.bf16 %v4390_v43  ;;  %v4391_v28 = vunpack.i.l.bf16 %v4390_v43 }
 0xae3   : > { %v1896_v52 = vsel %vm1192_vm10, %v4391_v28, %v4392_v27 }
 0xae4   : > { %1981 = vperm.xlu1 %4226, %v1751_v48   ;;  %1976 = vperm.xlu0 %4272, %v1750_v49   ;;  %v4400_v44 = vpop.permute.xlu0 %4399  ;;  %v4407_v49 = vunpack.i.h.bf16 %v5583_v53 }
 0xae5   : > { %v4402_v38 = vunpack.i.h.bf16 %v4400_v44  ;;  %v4401_v40 = vunpack.i.l.bf16 %v4400_v44 }
 0xae7   : > { %v1800_v44 = vsel %vm638_vm2, %v4401_v40, %v4402_v38 }
 0xae8   : > { %2366 = vrot.lane.b32.xlu1 %v5126_v4, %s6338_s7  ;;  %v5587_v55 = vpop.permute.xlu0 %4409  ;;  %v4382_v4 = vunpack.i.h.bf16 %v4380_v51 }
 0xaea   : > { %v1872_v17 = vsel %vm1185_vm11, %v4381_v63, %v4382_v4 }
 0xaeb   : > { %v3896_v26 = vpack.c.bf16 %v1873_v21, %v1872_v17 }
 0xaec   : > { %v5591_v59 = vpop.permute.xlu0 %4419 }
 0xaed   : > { %v4421_v17 = vunpack.i.l.bf16 %v5591_v59 }
 0xaf0   : > { %v5595_v62 = vpop.permute.xlu0 %4429 }
 0xb2e   : > { %v4440_v2 = vpop.permute.xlu1 %4439  ;;  %v4475_v7 = vpop.permute.xlu0 %4474 }
 0xb2f   : > { %v4442_v8 = vunpack.i.h.bf16 %v4440_v2  ;;  %v4441_v9 = vunpack.i.l.bf16 %v4440_v2  ;;  %v4477_v12 = vunpack.i.h.bf16 %v4475_v7  ;;  %v4476_v14 = vunpack.i.l.bf16 %v4475_v7 }
 0xb31   : > { %v1870_v15 = vsel %vm1185_vm11, %v4476_v14, %v4477_v12  ;;  %v1871_v16 = vsel %vm1185_vm11, %v4441_v9, %v4442_v8  ;;  %v3905_v8 = vpack.c.bf16 %v1897_v0, %v1896_v52  ;;  %v4411_v9 = vunpack.i.l.bf16 %v5587_v55 }
 0xb32   : > { %v4445_v18 = vpop.permute.xlu1 %4444  ;;  %v4480_v19 = vpop.permute.xlu0 %4479  ;;  %v3891_v20 = vpack.c.bf16 %v1871_v16, %v1870_v15  ;;  %v4416_v15 = vunpack.i.l.bf16 %v5585_v54  ;;  %v4422_v16 = vunpack.i.h.bf16 %v5591_v59 }
 0xb33   : > { %v4447_v22 = vunpack.i.h.bf16 %v4445_v18  ;;  %v4446_v24 = vunpack.i.l.bf16 %v4445_v18  ;;  %v4482_v25 = vunpack.i.h.bf16 %v4480_v19  ;;  %v4481_v11 = vunpack.i.l.bf16 %v4480_v19 }
 0xb34   : > { %3892 = vmatprep.subr.bf16.mxu0 %v3891_v20  ;;  %v1824_v28 = vsel %vm653_vm7, %v4421_v17, %v4422_v16  ;;  %v1921_v37 = vsel %vm698_vm9, %v4416_v15, %v4417_v6 }
 0xb35   : > { %3895 = vmatpush3.bf16.msk.msra.mxu0 %vm3894_vm4, %v3893_v39  ;;  %v1894_v29 = vsel %vm1192_vm10, %v4481_v11, %v4482_v25  ;;  %v1895_v32 = vsel %vm1192_vm10, %v4446_v24, %v4447_v22  ;;  %v4406_v39 = vunpack.i.l.bf16 %v5583_v53  ;;  %v4426_v11 = vunpack.i.l.bf16 %v5589_v56 }
 0xb36   : > { %v4450_v45 = vpop.permute.xlu1 %4449  ;;  %v4485_v46 = vpop.permute.xlu0 %4484  ;;  %3897 = vmatprep.subr.bf16.mxu0 %v3896_v26  ;;  %v3901_v50 = vpack.c.bf16 %v1895_v32, %v1894_v29  ;;  %vm6339_vm10 = vcmask 154624  }
 0xb37   : > { %v4452_v30 = vunpack.i.h.bf16 %v4450_v45  ;;  %v4451_v31 = vunpack.i.l.bf16 %v4450_v45  ;;  %v4487_v47 = vunpack.i.h.bf16 %v4485_v46  ;;  %v4486_v48 = vunpack.i.l.bf16 %v4485_v46  ;;  %vm6340_vm11 = vmmov %vm6339_vm10 }
 0xb38   : > { %v1801_v36 = vsel %vm638_vm2, %v4406_v39, %v4407_v49  ;;  %v4437_v39 = vunpack.i.h.bf16 %v5593_v61  ;;  %vm6342_vm15 = vmmov %vm6339_vm10 }
 0xb39   : > { %v1799_v51 = vsel %vm638_vm2, %v4451_v31, %v4452_v30  ;;  %v1798_v43 = vsel %vm638_vm2, %v4486_v48, %v4487_v47  ;;  %3900 = vmatpush3.bf16.msk.msra.mxu0 %vm3894_vm4, %v3898_v41  ;;  %v4412_v41 = vunpack.i.h.bf16 %v5587_v55  ;;  %v3907_v20 = vpack.c.bf16 %v1801_v36, %v1800_v44 }
 0xb3a   : > { %v3903_v4 = vpack.c.bf16 %v1799_v51, %v1798_v43  ;;  %v4455_v53 = vpop.permute.xlu1 %4454  ;;  %v4490_v63 = vpop.permute.xlu0 %4489  ;;  %3902 = vmatprep.subr.bf16.mxu0 %v3901_v50  ;;  %v4427_v55 = vunpack.i.h.bf16 %v5589_v56  ;;  %v4432_v31 = vunpack.i.h.bf16 %v5595_v62  ;;  %v4431_v47 = vunpack.i.l.bf16 %v5595_v62 }
 0xb3b   : > { %v4457_v1 = vunpack.i.h.bf16 %v4455_v53  ;;  %v4456_v2 = vunpack.i.l.bf16 %v4455_v53  ;;  %v4492_v7 = vunpack.i.h.bf16 %v4490_v63  ;;  %v4491_v35 = vunpack.i.l.bf16 %v4490_v63 }
 0xb3c   : > { %v1920_v59 = vsel %vm698_vm9, %v4411_v9, %v4412_v41  ;;  %v1825_v46 = vsel %vm653_vm7, %v4426_v11, %v4427_v55  ;;  %v4436_v50 = vunpack.i.l.bf16 %v5593_v61  ;;  %v2153_v11 = vld [vmem:[%s6246_s4 + $0x40] sm:$0xff] }
 0xb3d   : > { %3904 = vmatpush3.bf16.msra.mxu0 %v3903_v4  ;;  %v1918_v12 = vsel %vm698_vm9, %v4491_v35, %v4492_v7  ;;  %v1919_v14 = vsel %vm698_vm9, %v4456_v2, %v4457_v1  ;;  %v3913_v30 = vpack.c.bf16 %v1921_v37, %v1920_v59  ;;  %v3915_v52 = vpack.c.bf16 %v1825_v46, %v1824_v28  ;;  %v2146_v46 = vld [vmem:[%s6246_s4 + $0x8] sm:$0xff] }
 0xb3e   : > { %v4460_v18 = vpop.permute.xlu1 %4459  ;;  %v4495_v19 = vpop.permute.xlu0 %4494  ;;  %3906 = vmatprep.subr.bf16.mxu0 %v3905_v8  ;;  %v3909_v26 = vpack.c.bf16 %v1919_v14, %v1918_v12  ;;  %v1944_v2 = vsel %vm1205_vm1, %v4431_v47, %v4432_v31  ;;  %v1945_v61 = vsel %vm1205_vm1, %v4436_v50, %v4437_v39  ;;  %v2147_v12 = vld [vmem:[%s6246_s4 + $0x10] sm:$0xff]  ;;  %v2150_v14 = vld [vmem:[%s6246_s4 + $0x28] sm:$0xff] }
 0xb3f   : > { %v4462_v21 = vunpack.i.h.bf16 %v4460_v18  ;;  %v4461_v22 = vunpack.i.l.bf16 %v4460_v18  ;;  %v4497_v24 = vunpack.i.h.bf16 %v4495_v19  ;;  %v4496_v25 = vunpack.i.l.bf16 %v4495_v19  ;;  %v2159_v31 = vld [vmem:[%s6246_s4 + $0x70] sm:$0xff]  ;;  %v2162_v47 = vld [vmem:[%s6246_s4 + $0x88] sm:$0xff] }
 0xb40   : > { %v3921_v15 = vpack.c.bf16 %v1945_v61, %v1944_v2  ;;  %v2161_v61 = vld [vmem:[%s6246_s4 + $0x80] sm:$0xff] }
 0xb41   : > { %v1823_v27 = vsel %vm653_vm7, %v4461_v22, %v4462_v21  ;;  %v1822_v54 = vsel %vm653_vm7, %v4496_v25, %v4497_v24  ;;  %3908 = vmatpush3.bf16.msra.mxu0 %v3907_v20  ;;  %v3965_v21 = vpack.c.bf16 %v2150_v14, %v2147_v12  ;;  %v2160_v12 = vld [vmem:[%s6246_s4 + $0x78] sm:$0xff] }
 0xb42   : > { %v3911_v29 = vpack.c.bf16 %v1823_v27, %v1822_v54  ;;  %v4465_v32 = vpop.permute.xlu1 %4464  ;;  %v4500_v33 = vpop.permute.xlu0 %4499  ;;  %3910 = vmatprep.subr.bf16.mxu0 %v3909_v26  ;;  %v2156_v26 = vld [vmem:[%s6246_s4 + $0x58] sm:$0xff]  ;;  %v1744_v27 = vld [vmem:[%s6255_s13] sm:$0xff] }
 0xb43   : > { %v4467_v38 = vunpack.i.h.bf16 %v4465_v32  ;;  %v4466_v40 = vunpack.i.l.bf16 %v4465_v32  ;;  %v4502_v45 = vunpack.i.h.bf16 %v4500_v33  ;;  %v4501_v56 = vunpack.i.l.bf16 %v4500_v33  ;;  %v1748_v33 = vld [vmem:[%s6255_s13 + $0x20] sm:$0xff]  ;;  %v2164_v14 = vld [vmem:[%s6246_s4 + $0x98] sm:$0xff] }
 0xb44   : > { %v3969_v37 = vpack.c.bf16 %v2156_v26, %v2153_v11  ;;  %v2171_v11 = vld [vmem:[%s6246_s4 + $0xd0] sm:$0xff] }
 0xb45   : > { %3912 = vmatpush3.bf16.msra.mxu0 %v3911_v29  ;;  %v1942_v48 = vsel %vm1205_vm1, %v4501_v56, %v4502_v45  ;;  %v1943_v49 = vsel %vm1205_vm1, %v4466_v40, %v4467_v38  ;;  %vm4000_vm1 = vmpackc.low %vm5047_vm3, %vm5047_vm3 }
 0xb46   : > { %v4470_v51 = vpop.permute.xlu1 %4469  ;;  %v4505_v43 = vpop.permute.xlu0 %4504  ;;  %3914 = vmatprep.subr.bf16.mxu0 %v3913_v30  ;;  %v3917_v0 = vpack.c.bf16 %v1943_v49, %v1942_v48  ;;  %v2149_v30 = vld [vmem:[%s6246_s4 + $0x20] sm:$0xff]  ;;  %v1747_v48 = vld [vmem:[%s6255_s13 + $0x18] sm:$0xff] }
 0xb47   : > { %v4472_v44 = vunpack.i.h.bf16 %v4470_v51  ;;  %v4471_v4 = vunpack.i.l.bf16 %v4470_v51  ;;  %v4507_v53 = vunpack.i.h.bf16 %v4505_v43  ;;  %v4506_v63 = vunpack.i.l.bf16 %v4505_v43  ;;  %v2145_v43 = vld [vmem:[%s6246_s4] sm:$0xff] }
 0xb48   : > { %v3933_v51 = vpack.c.bf16 %v2149_v30, %v2146_v46  ;;  %v2185_v46 = vld [vmem:[%s6246_s4 + $0x140] sm:$0xff] }
 0xb49   : > { %v1847_v62 = vsel %vm1178_vm12, %v4471_v4, %v4472_v44  ;;  %v1846_v1 = vsel %vm1178_vm12, %v4506_v63, %v4507_v53  ;;  %3916 = vmatpush3.bf16.msra.mxu0 %v3915_v52  ;;  %v2148_v52 = vld [vmem:[%s6246_s4 + $0x18] sm:$0xff]  ;;  %v2155_v4 = vld [vmem:[%s6246_s4 + $0x50] sm:$0xff]  ;;  %v3973_v53 = vpack.c.bf16 %v2162_v47, %v2159_v31  ;;  %v2165_v63 = vld [vmem:[%s6246_s4 + $0xa0] sm:$0xff] }
 0xb4a   : > { %v3919_v7 = vpack.c.bf16 %v1847_v62, %v1846_v1  ;;  %v4515_v35 = vpop.permute.xlu1 %4514  ;;  %v4510_v36 = vpop.permute.xlu0 %4509  ;;  %3918 = vmatprep.subr.bf16.mxu0 %v3917_v0  ;;  %v2152_v44 = vld [vmem:[%s6246_s4 + $0x38] sm:$0xff]  ;;  %v1749_v62 = vld [vmem:[%s6255_s13 + $0x28] sm:$0xff]  ;;  %v3935_v1 = vpack.c.bf16 %v2148_v52, %v2145_v43  ;;  %v2181_v31 = vld [vmem:[%s6246_s4 + $0x120] sm:$0xff] }
 0xb4b   : > { %v4517_v6 = vunpack.i.h.bf16 %v4515_v35  ;;  %v4516_v8 = vunpack.i.l.bf16 %v4515_v35  ;;  %v4512_v41 = vunpack.i.h.bf16 %v4510_v36  ;;  %v4511_v9 = vunpack.i.l.bf16 %v4510_v36  ;;  %v2168_v0 = vld [vmem:[%s6246_s4 + $0xb8] sm:$0xff]  ;;  %v2154_v35 = vld [vmem:[%s6246_s4 + $0x48] sm:$0xff]  ;;  %v2191_v43 = vld [vmem:[%s6246_s4 + $0x170] sm:$0xff] }
 0xb4c   : > { %v3937_v2 = vpack.c.bf16 %v2155_v4, %v2152_v44  ;;  %v2158_v36 = vld [vmem:[%s6246_s4 + $0x68] sm:$0xff]  ;;  %v2184_v47 = vld [vmem:[%s6246_s4 + $0x138] sm:$0xff]  ;;  %v2187_v44 = vld [vmem:[%s6246_s4 + $0x150] sm:$0xff] }
 0xb4d   : > { %v1849_v16 = vsel %vm1178_vm12, %v4516_v8, %v4517_v6  ;;  %v1848_v17 = vsel %vm1178_vm12, %v4511_v9, %v4512_v41  ;;  %3920 = vmatpush3.bf16.msra.mxu0 %v3919_v7  ;;  %v2151_v7 = vld [vmem:[%s6246_s4 + $0x30] sm:$0xff]  ;;  %v3977_v6 = vpack.c.bf16 %v2168_v0, %v2165_v63  ;;  %v3941_v41 = vpack.c.bf16 %v2161_v61, %v2158_v36  ;;  %v2157_v9 = vld [vmem:[%s6246_s4 + $0x60] sm:$0xff]  ;;  %v2190_v4 = vld [vmem:[%s6246_s4 + $0x168] sm:$0xff] }
 0xb4e   : > { %v3923_v18 = vpack.c.bf16 %v1849_v16, %v1848_v17  ;;  %v4520_v19 = vpop.permute.xlu1 %4519  ;;  %v4525_v20 = vpop.permute.xlu0 %4524  ;;  %3922 = vmatprep.subr.bf16.mxu0 %v3921_v15  ;;  %v3939_v8 = vpack.c.bf16 %v2154_v35, %v2151_v7  ;;  %v2167_v15 = vld [vmem:[%s6246_s4 + $0xb0] sm:$0xff]  ;;  %v3943_v16 = vpack.c.bf16 %v2160_v12, %v2157_v9  ;;  %v3963_v63 = vpack.c.bf16 %v2190_v4, %v2187_v44  ;;  %v2192_v0 = vld [vmem:[%s6246_s4 + $0x178] sm:$0xff]  ;;  %vm6341_vm12 = vmmov %vm6339_vm10 }
 0xb4f   : > { %v4522_v22 = vunpack.i.h.bf16 %v4520_v19  ;;  %v4521_v24 = vunpack.i.l.bf16 %v4520_v19  ;;  %v4527_v25 = vunpack.i.h.bf16 %v4525_v20  ;;  %v4526_v55 = vunpack.i.l.bf16 %v4525_v20  ;;  %v2166_v19 = vld [vmem:[%s6246_s4 + $0xa8] sm:$0xff] }
 0xb50   : > { %v3945_v17 = vpack.c.bf16 %v2167_v15, %v2164_v14 }
 0xb51   : > { %3924 = vmatpush3.bf16.msra.mxu0 %v3923_v18  ;;  %v1966_v54 = vsel %vm1212_vm5, %v4526_v55, %v4527_v25  ;;  %v1967_v59 = vsel %vm1212_vm5, %v4521_v24, %v4522_v22  ;;  %v2163_v18 = vld [vmem:[%s6246_s4 + $0x90] sm:$0xff]  ;;  %v2173_v22 = vld [vmem:[%s6246_s4 + $0xe0] sm:$0xff]  ;;  %v2172_v55 = vld [vmem:[%s6246_s4 + $0xd8] sm:$0xff] }
 0xb52   : > { %v4535_v28 = vpop.permute.xlu1 %4534  ;;  %v4530_v29 = vpop.permute.xlu0 %4529  ;;  %v3925_v32 = vpack.c.bf16 %v1967_v59, %v1966_v54  ;;  %3966 = vmatprep.subr.bf16.mxu0 %v3965_v21  ;;  %v3947_v20 = vpack.c.bf16 %v2166_v19, %v2163_v18  ;;  %v2169_v25 = vld [vmem:[%s6246_s4 + $0xc0] sm:$0xff]  ;;  %v2176_v59 = vld [vmem:[%s6246_s4 + $0xf8] sm:$0xff] }
 0xb53   : > { %v4537_v38 = vunpack.i.h.bf16 %v4535_v28  ;;  %v4536_v40 = vunpack.i.l.bf16 %v4535_v28  ;;  %v4532_v45 = vunpack.i.h.bf16 %v4530_v29  ;;  %v4531_v56 = vunpack.i.l.bf16 %v4530_v29  ;;  %v2179_v28 = vld [vmem:[%s6246_s4 + $0x110] sm:$0xff] }
 0xb54   : > { %2056 = vmatmul.mubr.f32.vlgmr.msra.gmra.mrb[10].mxu0 %v1744_v27  ;;  %3926 = vmatprep.subr.bf16.mxu1 %v3925_v32  ;;  %v3951_v26 = vpack.c.bf16 %v2172_v55, %v2169_v25  ;;  %v2174_v27 = vld [vmem:[%s6246_s4 + $0xe8] sm:$0xff]  ;;  %v3953_v29 = vpack.c.bf16 %v2179_v28, %v2176_v59 }
 0xb55   : > { %3928 = vmatpush3.bf16.msra.mxu1 %v3925_v32  ;;  %2060 = vmatprep.mubr.f32.mxu0 %v1748_v33  ;;  %v1968_v49 = vsel %vm1212_vm5, %v4531_v56, %v4532_v45  ;;  %v1969_v39 = vsel %vm1212_vm5, %v4536_v40, %v4537_v38  ;;  %v3981_v54 = vpack.c.bf16 %v2174_v27, %v2171_v11  ;;  %v2175_v32 = vld [vmem:[%s6246_s4 + $0xf0] sm:$0xff]  ;;  %v2178_v33 = vld [vmem:[%s6246_s4 + $0x108] sm:$0xff]  ;;  %v2180_v40 = vld [vmem:[%s6246_s4 + $0x118] sm:$0xff] }
 0xb56   : > { %v3929_v50 = vpack.c.bf16 %v1969_v39, %v1968_v49  ;;  %3968 = vmatpush3.bf16.msra.mxu0 %v3965_v21  ;;  %v2170_v21 = vld [vmem:[%s6246_s4 + $0xc8] sm:$0xff]  ;;  %v3955_v38 = vpack.c.bf16 %v2178_v33, %v2175_v32  ;;  %v3959_v49 = vpack.c.bf16 %v2184_v47, %v2181_v31  ;;  %vm6343_vm5 = vmmov %vm6339_vm10 }
 0xb57   : > { %3970 = vmatprep.subr.bf16.mxu0 %v3969_v37  ;;  %v3949_v24 = vpack.c.bf16 %v2173_v22, %v2170_v21  ;;  %v2182_v56 = vld [vmem:[%s6246_s4 + $0x128] sm:$0xff]  ;;  %vm6344_vm13 = vmmov %vm6343_vm5 }
 0xb58   : > { %2061 = vmatmul.mubr.f32.gmra.mrb[12].mxu0 %v1747_v48  ;;  %3930 = vmatprep.subr.bf16.mxu1 %v3929_v50  ;;  %v3957_v30 = vpack.c.bf16 %v2185_v46, %v2182_v56  ;;  %v2183_v48 = vld [vmem:[%s6246_s4 + $0x130] sm:$0xff]  ;;  %v2186_v39 = vld [vmem:[%s6246_s4 + $0x148] sm:$0xff]  ;;  %vm6345_vm8 = vmmov %vm6343_vm5 }
 0xb59   : > { %3932 = vmatpush3.bf16.msra.mxu1 %v3929_v50  ;;  %v3989_v50 = vpack.c.bf16 %v2186_v39, %v2183_v48  ;;  %vm6346_vm3 = vmmov %vm6343_vm5 }
 0xb5a   : > { %3934 = vmatprep.subr.bf16.mxu1 %v3933_v51  ;;  %3972 = vmatpush3.bf16.msra.mxu0 %v3969_v37  ;;  %v2177_v37 = vld [vmem:[%s6246_s4 + $0x100] sm:$0xff]  ;;  %v2188_v51 = vld [vmem:[%s6246_s4 + $0x158] sm:$0xff]  ;;  %vm6348_vm0 = vmmov %vm6346_vm3 }
 0xb5b   : > { %3974 = vmatprep.subr.bf16.mxu0 %v3973_v53  ;;  %v3985_v45 = vpack.c.bf16 %v2180_v40, %v2177_v37  ;;  %v3961_v52 = vpack.c.bf16 %v2191_v43, %v2188_v51  ;;  %vm6351_vm4 = vmmov %vm6348_vm0 }
 0xb5c   : > { %3638 = vmatmul.mubr.msk.f32.vlgmr.msra.gmra.mrb[8].mxu1 %vm1984_vm14, %v1749_v62  ;;  %vm6349_vm14 = vmmov %vm6348_vm0 }
 0xb5d   : > { %3936 = vmatpush1.bf16.msra.mxu1 %v3935_v1  ;;  %2257 = vmatprep.mubr.f32.mxu1 %v4869_v13 }
 0xb5e   : > { %3938 = vmatprep.subr.bf16.mxu1 %v3937_v2  ;;  %3976 = vmatpush3.bf16.msra.mxu0 %v3973_v53  ;;  %v2189_v53 = vld [vmem:[%s6246_s4 + $0x160] sm:$0xff] }
 0xb5f   : > { %3978 = vmatprep.subr.bf16.mxu0 %v3977_v6  ;;  %v3993_v62 = vpack.c.bf16 %v2192_v0, %v2189_v53 }
 0xb61   : > { %3940 = vmatpush1.bf16.msra.mxu1 %v3939_v8 }
 0xb62   : > { %3942 = vmatprep.subr.bf16.mxu1 %v3941_v41  ;;  %3980 = vmatpush3.bf16.msra.mxu0 %v3977_v6 }
 0xb63   : > { %3982 = vmatprep.subr.bf16.mxu0 %v3981_v54  ;;  %v1982_v6 = vpop.permute.xlu1 %1981  ;;  %v1977_v8 = vpop.permute.xlu0 %1976 }
 0xb65   : > { %3944 = vmatpush1.bf16.msra.mxu1 %v3943_v16 }
 0xb66   : > { %3946 = vmatprep.subr.bf16.mxu1 %v3945_v17  ;;  %3984 = vmatpush3.bf16.msra.mxu0 %v3981_v54 }
 0xb67   : > { %3986 = vmatprep.subr.bf16.mxu0 %v3985_v45  ;;  %v5831_v59 = vpop.permute.xlu1 %2366 }
 0xb69   : > { %3948 = vmatpush1.bf16.msra.mxu1 %v3947_v20 }
 0xb6a   : > { %3950 = vmatprep.subr.bf16.mxu1 %v3949_v24  ;;  %3988 = vmatpush3.bf16.msra.mxu0 %v3985_v45 }
 0xb6b   : > { %3990 = vmatprep.subr.bf16.mxu0 %v3989_v50 }
 0xb6d   : > { %3952 = vmatpush1.bf16.msra.mxu1 %v3951_v26 }
 0xb6e   : > { %3954 = vmatprep.subr.bf16.mxu1 %v3953_v29  ;;  %3992 = vmatpush3.bf16.msra.mxu0 %v3989_v50 }
 0xb6f   : > { %3994 = vmatprep.subr.bf16.mxu0 %v3993_v62 }
 0xb71   : > { %3956 = vmatpush1.bf16.msra.mxu1 %v3955_v38 }
 0xb72   : > { %3958 = vmatprep.subr.bf16.mxu1 %v3957_v30  ;;  %3996 = vmatpush3.bf16.msra.mxu0 %v3993_v62 }
 0xb73   : > { %4051 = vmatprep.subr.bf16.mxu0 %v4862_v5 }
 0xb75   : > { %3960 = vmatpush1.bf16.msra.mxu1 %v3959_v49 }
 0xb76   : > { %3962 = vmatprep.subr.bf16.mxu1 %v3961_v52  ;;  %v5856_v52 = vsel %vm6346_vm3, 0.0, %v5831_v59 }
 0xb79   : > { %3964 = vmatpush1.bf16.msra.mxu1 %v3963_v63 }
 0xc27   : > { %v3442_v1 = vpop.f32.mrb[10].mxu0 }
 0xc28   : > { %v3443_v2 = vpop.f32.mrb[11].mxu0 }
 0xc29   : > { %v3444_v7 = vadd.f32 %v3443_v2, %v3442_v1 }
 0xc2b   : > { %v3445_v35 = vpop.f32.mrb[12].mxu0  ;;  %v2058_v12 = vadd.f32 %v3444_v7, %v1977_v8  ;;  %v2347_v8 = vld [vmem:[%s6258_s16] sm:$0xff] }
 0xc2c   : > { %v3446_v36 = vpop.f32.mrb[13].mxu0 }
 0xc2d   : > { %v3447_v61 = vadd.f32 %v3446_v36, %v3445_v35 }
 0xc2f   : > { %v2063_v41 = vadd.f32 %v3447_v61, %v1982_v6  ;;  %v3639_v9 = vpop.f32.mrb[8].mxu1  ;;  %v2346_v6 = vld [vmem:[%s6257_s15 + $0x8] sm:$0xff] }
 0xc30   : > { %v2132_v14 = vpop.f32.mrb[9].mxu1 }
 0xc31   : > { %v2138_v15 = vadd.f32 %v3639_v9, %v2063_v41  ;;  %v2133_v16 = vadd.f32 %v2132_v14, %v2058_v12 }
 0xc33   : > { %v2142_v17 = vmul.f32 0.2, %v2138_v15  ;;  %v2141_v18 = vmul.f32 0.2, %v2133_v16 }
 0xc35   : > { %v2144_v19 = vmax.f32 %v2138_v15, %v2142_v17  ;;  %v2143_v20 = vmax.f32 %v2133_v16, %v2141_v18 }
 0xc37   : > { %2258 = vmatmul.mubr.f32.vlgmr.msra.gmra.mrb[10].mxu1 %v2143_v20  ;;  %3672 = vmatprep.mubr.f32.mxu0 %v2143_v20 }
 0xc38   : > { %3673 = vmatmul.mubr.f32.vlgmr.msra.gmra.mrb[14].mxu0 %v2144_v19  ;;  %2263 = vmatprep.mubr.f32.mxu1 %v4869_v13 }
 0xc3b   : > { %2264 = vmatmul.mubr.f32.gmra.mrb[12].mxu1 %v2144_v19 }
 0xd0a   : > { %v2259_v21 = vpop.f32.mrb[10].mxu1 }
 0xd0b   : > { %v2261_v22 = vpop.f32.mrb[11].mxu1  ;;  %v3674_v24 = vpop.f32.mrb[14].mxu0 }
 0xd0c   : > { %v4538_v25 = vpack.i.bf16 %v2261_v22, %v2259_v21  ;;  %v2336_v55 = vpop.f32.mrb[15].mxu0 }
 0xd0e   : > { %4539 = vrot.lane.b32.xlu0 %v4538_v25, %s6338_s7  ;;  %v2265_v11 = vpop.f32.mrb[12].mxu1 }
 0xd0f   : > { %v4543_v26 = vpack.i.bf16 %v2265_v11, %v2336_v55  ;;  %v2267_v27 = vpop.f32.mrb[13].mxu1 }
 0xd10   : > { %v4548_v54 = vpack.i.bf16 %v3674_v24, %v2267_v27 }
 0xd11   : > { %4544 = vrot.lane.b32.xlu1 %v4543_v26, %s6338_s7 }
 0xd12   : > { %4549 = vrot.lane.b32.xlu0 %v4548_v54, %s6338_s7 }
 0xd15   : > { %2370 = vrot.lane.b32.xlu1 %v5123_v3, %s6338_s7 }
 0xd16   : > { %2368 = vrot.lane.b32.xlu0 %v5138_v10, %s6338_s7 }
 0xd80   : > { %v4540_v28 = vpop.permute.xlu0 %4539 }
 0xd81   : > { %v4542_v29 = vunpack.i.h.bf16 %v4540_v28  ;;  %v4541_v32 = vunpack.i.l.bf16 %v4540_v28 }
 0xd83   : > { %v4545_v33 = vpop.permute.xlu1 %4544  ;;  %v2372_v30 = vsel %vm6340_vm11, %v4541_v32, %v4542_v29  ;;  %vm2743_vm11 = vcmask 719872  }
 0xd84   : > { %v4547_v37 = vunpack.i.h.bf16 %v4545_v33  ;;  %v4546_v38 = vunpack.i.l.bf16 %v4545_v33  ;;  %v4550_v40 = vpop.permute.xlu0 %4549  ;;  %3294 = vmatprep.mubr.msk.f32.mxu0 %vm2743_vm11, %v2346_v6  ;;  %3293 = vmatprep.mubr.msk.f32.mxu1 %vm2743_vm11, %v2346_v6 }
 0xd85   : > { %v4552_v45 = vunpack.i.h.bf16 %v4550_v40  ;;  %v4551_v56 = vunpack.i.l.bf16 %v4550_v40 }
 0xd86   : > { %v2373_v46 = vsel %vm6339_vm10, %v4542_v29, %v4546_v38  ;;  %v3999_v39 = vpack.c.bf16 %v4547_v37, %v4541_v32  ;;  %v2393_v4 = vsel %vm6348_vm0, %v4546_v38, 0.0  ;;  %v2391_v2 = vsel %vm6351_vm4, 0.0, %v4547_v37  ;;  %vm6353_vm10 = vmmov %vm6348_vm0 }
 0xd87   : > { %v2374_v3 = vsel %vm6341_vm12, %v4547_v37, %v4551_v56  ;;  %v2375_v31 = vsel %vm6342_vm15, %v4551_v56, %v4552_v45  ;;  %v2371_v10 = vpop.permute.xlu1 %2370  ;;  %v2394_v53 = vsel %vm6349_vm14, %v4552_v45, 0.0  ;;  %v4693_v63 = vpack.i.bf16 %v2373_v46, %v2372_v30 }
 0xd88   : > { %v2369_v47 = vpop.permute.xlu0 %2368  ;;  %v3997_v48 = vpack.c.bf16 %v2374_v3, %v2372_v30  ;;  %v4052_v49 = vpack.c.bf16 %v2375_v31, %v2373_v46  ;;  %v5850_v23 = vsel %vm6345_vm8, %v2371_v10, 0.0  ;;  %v4743_v0 = vpack.i.bf16 %v2375_v31, %v2374_v3 }
 0xd89   : > { %v5842_v50 = vsel %vm6343_vm5, %v5831_v59, %v2369_v47  ;;  %v5845_v51 = vsel %vm6344_vm13, %v2369_v47, %v2371_v10  ;;  %v4563_v44 = vpack.i.bf16 %v5850_v23, %v5856_v52  ;;  %v4778_v62 = vpack.i.bf16 %v2394_v53, %v2393_v4 }
 0xd8a   : > { %3998 = vmatprep.subr.bf16.mxu1 %v3997_v48  ;;  %4053 = vmatpush1.bf16.msra.mxu0 %v4052_v49  ;;  %v4558_v43 = vpack.i.bf16 %v5845_v51, %v5842_v50  ;;  %v4598_v1 = vpack.i.bf16 %v5850_v23, %v2394_v53  ;;  %v4593_v7 = vpack.i.bf16 %v5856_v52, %v2391_v2  ;;  %v2390_v35 = vsel %vm6353_vm10, 0.0, %v4541_v32 }
 0xd8b   : > { %4001 = vmatpush1.bf16.msk.msra.mxu1 %vm4000_vm1, %v3999_v39  ;;  %4054 = vmatprep.subr.bf16.mxu0 %v4862_v5  ;;  %v4603_v36 = vpack.i.bf16 %v2391_v2, %v2390_v35  ;;  %v4643_v61 = vpack.i.bf16 %v2393_v4, %v2390_v35  ;;  %vm6356_vm12 = vcmask 900096   ;;  %vm6365_vm4 = vcmask 891904  }
 0xd8c   : > { %4559 = vrot.lane.b32.xlu0 %v4558_v43, %s6322_s27  ;;  %4554 = vrot.lane.b32.xlu1 %v4558_v43, %s6323_s22  ;;  %vm6357_vm15 = vmmov %vm6356_vm12 }
 0xd8d   : > { %vm6358_vm1 = vmmov %vm6356_vm12 }
 0xd8e   : > { %vm6359_vm5 = vmmov %vm6358_vm1 }
 0xd8f   : > { %vm6360_vm13 = vmmov %vm6358_vm1 }
 0xd90   : > { %4564 = vrot.lane.b32.xlu0 %v4563_v44, %s6322_s27  ;;  %4569 = vrot.lane.b32.xlu1 %v4558_v43, %s6347_s6  ;;  %vm6361_vm8 = vmmov %vm6358_vm1 }
 0xd91   : > { %vm6362_vm3 = vmmov %vm6358_vm1 }
 0xd92   : > { %vm6363_vm0 = vmmov %vm6358_vm1 }
 0xd93   : > { %vm6364_vm14 = vmmov %vm6363_vm0 }
 0xd94   : > { %4574 = vrot.lane.b32.xlu0 %v4558_v43, %s6350_s1  ;;  %4584 = vrot.lane.b32.xlu1 %v4558_v43, %s6324_s24  ;;  %vm6366_vm10 = vmmov %vm6365_vm4 }
 0xd95   : > { %vm6367_vm11 = vmmov %vm6365_vm4 }
 0xd98   : > { %4579 = vrot.lane.b32.xlu0 %v4563_v44, %s6350_s1  ;;  %4599 = vrot.lane.b32.xlu1 %v4598_v1, %s6323_s22 }
 0xd9c   : > { %4589 = vrot.lane.b32.xlu0 %v4558_v43, %s6352_s5  ;;  %4614 = vrot.lane.b32.xlu1 %v4598_v1, %s6347_s6 }
 0xda0   : > { %4594 = vrot.lane.b32.xlu0 %v4593_v7, %s6323_s22  ;;  %4629 = vrot.lane.b32.xlu1 %v4598_v1, %s6324_s24 }
 0xda4   : > { %4604 = vrot.lane.b32.xlu0 %v4603_v36, %s6322_s27  ;;  %4644 = vrot.lane.b32.xlu1 %v4643_v61, %s6323_s22 }
 0xda8   : > { %4609 = vrot.lane.b32.xlu0 %v4593_v7, %s6347_s6  ;;  %4664 = vrot.lane.b32.xlu1 %v4558_v43, %s6354_s3 }
 0xdac   : > { %4619 = vrot.lane.b32.xlu0 %v4603_v36, %s6350_s1  ;;  %4669 = vrot.lane.b32.xlu1 %v4743_v0, %s6322_s27 }
 0xdb0   : > { %4624 = vrot.lane.b32.xlu0 %v4593_v7, %s6324_s24  ;;  %4674 = vrot.lane.b32.xlu1 %v4778_v62, %s6322_s27 }
 0xdb4   : > { %4634 = vrot.lane.b32.xlu0 %v4603_v36, %s6352_s5  ;;  %4679 = vrot.lane.b32.xlu1 %v4693_v63, %s6347_s6 }
 0xdb8   : > { %4639 = vrot.lane.b32.xlu0 %v4693_v63, %s6323_s22  ;;  %4684 = vrot.lane.b32.xlu1 %v4643_v61, %s6347_s6 }
 0xdbc   : > { %4704 = vrot.lane.b32.xlu1 %v4598_v1, %s6354_s3  ;;  %4649 = vrot.lane.b32.xlu0 %v4743_v0, %s6323_s22 }
 0xdc0   : > { %4709 = vrot.lane.b32.xlu1 %v4743_v0, %s6350_s1  ;;  %4654 = vrot.lane.b32.xlu0 %v4693_v63, %s6322_s27 }
 0xdc4   : > { %4714 = vrot.lane.b32.xlu1 %v4778_v62, %s6350_s1  ;;  %4659 = vrot.lane.b32.xlu0 %v4563_v44, %s6352_s5 }
 0xdc8   : > { %4719 = vrot.lane.b32.xlu1 %v4693_v63, %s6324_s24  ;;  %4689 = vrot.lane.b32.xlu0 %v4743_v0, %s6347_s6 }
 0xdcc   : > { %4724 = vrot.lane.b32.xlu1 %v4643_v61, %s6324_s24  ;;  %4694 = vrot.lane.b32.xlu0 %v4693_v63, %s6350_s1 }
 0xdd0   : > { %4744 = vrot.lane.b32.xlu1 %v4743_v0, %s6352_s5  ;;  %4699 = vrot.lane.b32.xlu0 %v4593_v7, %s6354_s3 }
 0xdd4   : > { %4749 = vrot.lane.b32.xlu1 %v4778_v62, %s6352_s5  ;;  %4729 = vrot.lane.b32.xlu0 %v4743_v0, %s6324_s24 }
 0xdd8   : > { %4754 = vrot.lane.b32.xlu1 %v4693_v63, %s6354_s3  ;;  %4734 = vrot.lane.b32.xlu0 %v4693_v63, %s6352_s5 }
 0xddc   : > { %4759 = vrot.lane.b32.xlu1 %v4643_v61, %s6354_s3  ;;  %4739 = vrot.lane.b32.xlu0 %v4603_v36, %s6355_s29 }
 0xde0   : > { %4774 = vrot.lane.b32.xlu1 %v4743_v0, %s6355_s29  ;;  %4764 = vrot.lane.b32.xlu0 %v4743_v0, %s6354_s3 }
 0xde4   : > { %4779 = vrot.lane.b32.xlu1 %v4778_v62, %s6355_s29  ;;  %4769 = vrot.lane.b32.xlu0 %v4693_v63, %s6355_s29 }
 0xde8   : > { %2716 = vrot.lane.b32.xlu1 %v5845_v51, %s6355_s29  ;;  %2714 = vrot.lane.b32.xlu0 %v5842_v50, %s6355_s29 }
 0xdec   : > { %2718 = vrot.lane.b32.xlu1 %v5850_v23, %s6355_s29  ;;  %2712 = vrot.lane.b32.xlu0 %v5856_v52, %s6355_s29 }
 0xdf0   : > { %2740 = vperm.xlu0 %4272, %v2347_v8  }
 0xdfe   : > { %v5925_v41 = vpop.permute.xlu0 %4559  ;;  %v4555_v9 = vpop.permute.xlu1 %4554 }
 0xdff   : > { %v4562_v29 = vunpack.i.h.bf16 %v5925_v41  ;;  %v4561_v32 = vunpack.i.l.bf16 %v5925_v41  ;;  %v4557_v33 = vunpack.i.h.bf16 %v4555_v9  ;;  %v4556_v37 = vunpack.i.l.bf16 %v4555_v9 }
 0xe01   : > { %v2433_v3 = vsel %vm638_vm2, %v4556_v37, %v4557_v33  ;;  %v5970_v31 = vsel %vm653_vm7, %v4561_v32, %v4562_v29 }
 0xe02   : > { %v5927_v12 = vpop.permute.xlu0 %4564  ;;  %v5929_v14 = vpop.permute.xlu1 %4569 }
 0xe03   : > { %v4566_v45 = vunpack.i.l.bf16 %v5927_v12  ;;  %v4567_v39 = vunpack.i.h.bf16 %v5927_v12  ;;  %v4572_v43 = vunpack.i.h.bf16 %v5929_v14  ;;  %v4571_v23 = vunpack.i.l.bf16 %v5929_v14 }
 0xe05   : > { %v5976_v44 = vsel %vm653_vm7, %v4566_v45, %v4561_v32  ;;  %v2517_v41 = vsel %vm6357_vm15, %v4571_v23, %v4572_v43  ;;  %vm6369_vm15 = vmmov %vm6365_vm4 }
 0xe06   : > { %v5931_v15 = vpop.permute.xlu0 %4574  ;;  %v5933_v16 = vpop.permute.xlu1 %4584 }
 0xe0a   : > { %v5935_v17 = vpop.permute.xlu0 %4579  ;;  %v4600_v18 = vpop.permute.xlu1 %4599 }
 0xe0b   : > { %v4602_v56 = vunpack.i.h.bf16 %v4600_v18  ;;  %v4601_v4 = vunpack.i.l.bf16 %v4600_v18 }
 0xe0d   : > { %v2434_v0 = vsel %vm638_vm2, %v4557_v33, %v4602_v56 }
 0xe0e   : > { %v5937_v19 = vpop.permute.xlu0 %4589  ;;  %v5939_v20 = vpop.permute.xlu1 %4614 }
 0xe12   : > { %v4595_v21 = vpop.permute.xlu0 %4594  ;;  %v5941_v22 = vpop.permute.xlu1 %4629 }
 0xe13   : > { %v4597_v52 = vunpack.i.h.bf16 %v4595_v21  ;;  %v4596_v36 = vunpack.i.l.bf16 %v4595_v21 }
 0xe15   : > { %v2432_v9 = vsel %vm638_vm2, %v4597_v52, %v4556_v37 }
 0xe16   : > { %v5943_v24 = vpop.permute.xlu0 %4604  ;;  %v4645_v25 = vpop.permute.xlu1 %4644 }
 0xe17   : > { %v4647_v10 = vunpack.i.h.bf16 %v4645_v25  ;;  %v4646_v47 = vunpack.i.l.bf16 %v4645_v25  ;;  %v4607_v12 = vunpack.i.h.bf16 %v5943_v24 }
 0xe1a   : > { %v5945_v55 = vpop.permute.xlu0 %4609  ;;  %v5947_v11 = vpop.permute.xlu1 %4664 }
 0xe1e   : > { %v5949_v26 = vpop.permute.xlu0 %4619  ;;  %v5951_v27 = vpop.permute.xlu1 %4669 }
 0xe1f   : > { %v4672_v62 = vunpack.i.h.bf16 %v5951_v27  ;;  %v4671_v1 = vunpack.i.l.bf16 %v5951_v27  ;;  %v4606_v27 = vunpack.i.l.bf16 %v5943_v24 }
 0xe22   : > { %v5953_v54 = vpop.permute.xlu0 %4624  ;;  %v5955_v28 = vpop.permute.xlu1 %4674 }
 0xe23   : > { %v4677_v61 = vunpack.i.h.bf16 %v5955_v28  ;;  %v4676_v33 = vunpack.i.l.bf16 %v5955_v28 }
 0xe25   : > { %v2473_v24 = vsel %vm653_vm7, %v4672_v62, %v4677_v61  ;;  %v2471_v61 = vsel %vm653_vm7, %v4607_v12, %v4671_v1  ;;  %v4581_v12 = vunpack.i.l.bf16 %v5935_v17 }
 0xe26   : > { %v5959_v38 = vpop.permute.xlu0 %4634  ;;  %v5961_v40 = vpop.permute.xlu1 %4679 }
 0xe2a   : > { %v4640_v46 = vpop.permute.xlu0 %4639  ;;  %v5964_v30 = vpop.permute.xlu1 %4684 }
 0xe2b   : > { %v4642_v48 = vunpack.i.h.bf16 %v4640_v46  ;;  %v4641_v49 = vunpack.i.l.bf16 %v4640_v46  ;;  %v2472_v46 = vsel %vm653_vm7, %v4671_v1, %v4672_v62  ;;  %v4617_v62 = vunpack.i.h.bf16 %v5939_v20 }
 0xe2c   : > { %v4586_v1 = vunpack.i.l.bf16 %v5933_v16 }
 0xe2d   : > { %v2426_v53 = vsel %vm638_vm2, %v4646_v47, %v4641_v49  ;;  %v2428_v63 = vsel %vm638_vm2, %v4642_v48, %v4647_v10  ;;  %v2427_v25 = vsel %vm638_vm2, %v4641_v49, %v4642_v48  ;;  %v4687_v10 = vunpack.i.h.bf16 %v5964_v30 }
 0xe2e   : > { %v4055_v2 = vpack.c.bf16 %v2428_v63, %v5845_v51  ;;  %v5984_v7 = vpop.permute.xlu1 %4704  ;;  %v4650_v35 = vpop.permute.xlu0 %4649  ;;  %v4004_v18 = vpack.c.bf16 %v2426_v53, %v5831_v59  ;;  %v4002_v21 = vpack.c.bf16 %v2427_v25, %v5842_v50  ;;  %v4682_v50 = vunpack.i.h.bf16 %v5961_v40 }
 0xe2f   : > { %v4652_v6 = vunpack.i.h.bf16 %v4650_v35  ;;  %v4651_v8 = vunpack.i.l.bf16 %v4650_v35  ;;  %v4681_v49 = vunpack.i.l.bf16 %v5961_v40  ;;  %v2476_v40 = vsel %vm653_vm7, %v4562_v29, %v4567_v39 }
 0xe30   : > { %4056 = vmatpush1.bf16.msra.mxu0 %v4055_v2  ;;  %4003 = vmatprep.subr.bf16.mxu1 %v4002_v21  ;;  %v4577_v29 = vunpack.i.h.bf16 %v5931_v15  ;;  %v4576_v39 = vunpack.i.l.bf16 %v5931_v15 }
 0xe31   : > { %v2431_v51 = vsel %vm638_vm2, %v4652_v6, %v4601_v4  ;;  %v2429_v32 = vsel %vm638_vm2, %v4596_v36, %v4651_v8  ;;  %4057 = vmatprep.subr.bf16.mxu0 %v4862_v5  ;;  %v2430_v59 = vsel %vm638_vm2, %v4651_v8, %v4652_v6  ;;  %4006 = vmatpush1.bf16.msk.msra.mxu1 %vm5060_vm6, %v4004_v18  ;;  %v4686_v4 = vunpack.i.l.bf16 %v5964_v30 }
 0xe32   : > { %v4058_v37 = vpack.c.bf16 %v2434_v0, %v2431_v51  ;;  %v5997_v45 = vpop.permute.xlu1 %4709  ;;  %v4655_v56 = vpop.permute.xlu0 %4654  ;;  %v4009_v28 = vpack.c.bf16 %v2432_v9, %v2429_v32  ;;  %v4007_v52 = vpack.c.bf16 %v2433_v3, %v2430_v59  ;;  %v4612_v36 = vunpack.i.h.bf16 %v5945_v55 }
 0xe33   : > { %v4657_v47 = vunpack.i.h.bf16 %v4655_v56  ;;  %v4656_v48 = vunpack.i.l.bf16 %v4655_v56  ;;  %v2512_v6 = vsel %vm6356_vm12, %v4682_v50, %v4687_v10  ;;  %v2511_v9 = vsel %vm6358_vm1, %v4681_v49, %v4682_v50  ;;  %vm6368_vm12 = vmmov %vm6365_vm4 }
 0xe34   : > { %4059 = vmatpush1.bf16.msra.mxu0 %v4058_v37  ;;  %4008 = vmatprep.subr.bf16.mxu1 %v4007_v52  ;;  %v4587_v18 = vunpack.i.h.bf16 %v5933_v16  ;;  %v2510_v25 = vsel %vm6359_vm5, %v4686_v4, %v4681_v49  ;;  %v4616_v51 = vunpack.i.l.bf16 %v5939_v20  ;;  %v4611_v32 = vunpack.i.l.bf16 %v5945_v55  ;;  %vm6370_vm1 = vmmov %vm6365_vm4 }
 0xe35   : > { %v2470_v53 = vsel %vm653_vm7, %v4657_v47, %v4676_v33  ;;  %v2468_v63 = vsel %vm653_vm7, %v4606_v27, %v4656_v48  ;;  %4060 = vmatprep.subr.bf16.mxu0 %v4862_v5  ;;  %v2469_v0 = vsel %vm653_vm7, %v4656_v48, %v4657_v47  ;;  %4010 = vmatpush1.bf16.msra.mxu1 %v4009_v28  ;;  %v4621_v10 = vunpack.i.l.bf16 %v5949_v26  ;;  %vm6371_vm5 = vmmov %vm6370_vm1 }
 0xe36   : > { %v4061_v2 = vpack.c.bf16 %v2473_v24, %v2470_v53  ;;  %v4715_v3 = vpop.permute.xlu1 %4714  ;;  %v6016_v35 = vpop.permute.xlu0 %4659  ;;  %v4011_v30 = vpack.c.bf16 %v2472_v46, %v2469_v0  ;;  %v4013_v8 = vpack.c.bf16 %v2471_v61, %v2468_v63  ;;  %v2518_v27 = vsel %vm6360_vm13, %v4572_v43, %v4617_v62  ;;  %vm6372_vm13 = vmmov %vm6370_vm1 }
 0xe37   : > { %v4064_v21 = vpack.c.bf16 %v2512_v6, %v2476_v40  ;;  %v2516_v56 = vsel %vm6361_vm8, %v4612_v36, %v4571_v23  ;;  %v4015_v24 = vpack.c.bf16 %v2511_v9, %v5970_v31  ;;  %v4017_v43 = vpack.c.bf16 %v2510_v25, %v5976_v44  ;;  %vm6373_vm8 = vmmov %vm6370_vm1 }
 0xe38   : > { %4062 = vmatpush1.bf16.msra.mxu0 %v4061_v2  ;;  %4012 = vmatprep.subr.bf16.mxu1 %v4011_v30  ;;  %v4712_v20 = vunpack.i.h.bf16 %v5997_v45  ;;  %v4711_v55 = vunpack.i.l.bf16 %v5997_v45  ;;  %v4717_v47 = vunpack.i.h.bf16 %v4715_v3  ;;  %v4716_v23 = vunpack.i.l.bf16 %v4715_v3 }
 0xe39   : > { %4063 = vmatprep.subr.bf16.mxu0 %v4862_v5  ;;  %4014 = vmatpush1.bf16.msra.mxu1 %v4013_v8  ;;  %v4582_v0 = vunpack.i.h.bf16 %v5935_v17  ;;  %v2559_v62 = vsel %vm6365_vm4, %v4576_v39, %v4577_v29  ;;  %v4622_v2 = vunpack.i.h.bf16 %v5949_v26  ;;  %v2558_v61 = vsel %vm6369_vm15, %v4581_v12, %v4576_v39 }
 0xe3a   : > { %v6039_v33 = vpop.permute.xlu1 %4719  ;;  %v4690_v37 = vpop.permute.xlu0 %4689  ;;  %4016 = vmatprep.subr.bf16.mxu1 %v4015_v24  ;;  %v2557_v3 = vsel %vm6366_vm10, %v4712_v20, %v4717_v47  ;;  %v2601_v26 = vsel %vm698_vm9, %v4586_v1, %v4587_v18  ;;  %v4632_v9 = vunpack.i.h.bf16 %v5941_v22  ;;  %vm6381_vm15 = vcmask 744448  }
 0xe3b   : > { %v4692_v59 = vunpack.i.h.bf16 %v4690_v37  ;;  %v4691_v46 = vunpack.i.l.bf16 %v4690_v37  ;;  %v4722_v50 = vunpack.i.h.bf16 %v6039_v33  ;;  %v4721_v45 = vunpack.i.l.bf16 %v6039_v33 }
 0xe3c   : > { %4065 = vmatpush1.bf16.msra.mxu0 %v4064_v21  ;;  %v2555_v25 = vsel %vm6370_vm1, %v4622_v2, %v4711_v55  ;;  %v2556_v21 = vsel %vm6372_vm13, %v4711_v55, %v4712_v20  ;;  %v2560_v33 = vsel %vm6373_vm8, %v4577_v29, %v4582_v0  ;;  %v4592_v37 = vunpack.i.h.bf16 %v5937_v19 }
 0xe3d   : > { %v2515_v48 = vsel %vm6362_vm3, %v4692_v59, %v4616_v51  ;;  %v2513_v14 = vsel %vm6363_vm0, %v4611_v32, %v4691_v46  ;;  %4066 = vmatprep.subr.bf16.mxu0 %v4862_v5  ;;  %v2514_v31 = vsel %vm6364_vm14, %v4691_v46, %v4692_v59  ;;  %4018 = vmatpush1.bf16.msra.mxu1 %v4017_v43  ;;  %v4626_v46 = vunpack.i.l.bf16 %v5953_v54 }
 0xe3e   : > { %v4067_v44 = vpack.c.bf16 %v2518_v27, %v2515_v48  ;;  %v4725_v49 = vpop.permute.xlu1 %4724  ;;  %v4695_v28 = vpop.permute.xlu0 %4694  ;;  %v4019_v52 = vpack.c.bf16 %v2517_v41, %v2514_v31  ;;  %v4021_v40 = vpack.c.bf16 %v2516_v56, %v2513_v14  ;;  %v2595_v12 = vsel %vm698_vm9, %v4721_v45, %v4722_v50 }
 0xe3f   : > { %v4727_v4 = vunpack.i.h.bf16 %v4725_v49  ;;  %v4697_v53 = vunpack.i.h.bf16 %v4695_v28  ;;  %v4696_v63 = vunpack.i.l.bf16 %v4695_v28  ;;  %v4726_v6 = vunpack.i.l.bf16 %v4725_v49 }
 0xe40   : > { %4068 = vmatpush1.bf16.msra.mxu0 %v4067_v44  ;;  %4020 = vmatprep.subr.bf16.mxu1 %v4019_v52  ;;  %v4627_v27 = vunpack.i.h.bf16 %v5953_v54  ;;  %v4631_v56 = vunpack.i.l.bf16 %v5941_v22  ;;  %v4027_v20 = vpack.c.bf16 %v2595_v12, %v2559_v62  ;;  %v4591_v22 = vunpack.i.l.bf16 %v5937_v19 }
 0xe41   : > { %v2554_v30 = vsel %vm6367_vm11, %v4697_v53, %v4716_v23  ;;  %v2552_v36 = vsel %vm6368_vm12, %v4621_v10, %v4696_v63  ;;  %4069 = vmatprep.subr.bf16.mxu0 %v4862_v5  ;;  %v2596_v39 = vsel %vm698_vm9, %v4722_v50, %v4727_v4  ;;  %4022 = vmatpush1.bf16.msra.mxu1 %v4021_v40  ;;  %v4637_v31 = vunpack.i.h.bf16 %v5959_v38 }
 0xe42   : > { %v4070_v17 = vpack.c.bf16 %v2557_v3, %v2554_v30  ;;  %v6064_v41 = vpop.permute.xlu1 %4744  ;;  %v6066_v8 = vpop.permute.xlu0 %4699  ;;  %v4025_v51 = vpack.c.bf16 %v2555_v25, %v2552_v36  ;;  %v2553_v32 = vsel %vm6371_vm5, %v4696_v63, %v4697_v53  ;;  %v2594_v24 = vsel %vm698_vm9, %v4726_v6, %v4721_v45  ;;  %vm6383_vm5 = vmmov %vm6381_vm15 }
 0xe43   : > { %v4023_v59 = vpack.c.bf16 %v2556_v21, %v2553_v32  ;;  %v4073_v10 = vpack.c.bf16 %v2596_v39, %v2560_v33  ;;  %v4747_v55 = vunpack.i.h.bf16 %v6064_v41  ;;  %v4746_v15 = vunpack.i.l.bf16 %v6064_v41  ;;  %vm6384_vm13 = vmmov %vm6383_vm5 }
 0xe44   : > { %4071 = vmatpush1.bf16.msra.mxu0 %v4070_v17  ;;  %v2602_v14 = vsel %vm698_vm9, %v4587_v18, %v4632_v9  ;;  %v2600_v54 = vsel %vm698_vm9, %v4627_v27, %v4586_v1  ;;  %v4636_v23 = vunpack.i.l.bf16 %v5959_v38  ;;  %v4662_v18 = vunpack.i.h.bf16 %v6016_v35 }
 0xe45   : > { %4072 = vmatprep.subr.bf16.mxu0 %v4862_v5  ;;  %4024 = vmatprep.subr.bf16.mxu1 %v4023_v59  ;;  %v4029_v28 = vpack.c.bf16 %v2594_v24, %v2558_v61  ;;  %vm6374_vm3 = vcmask 752640   ;;  %v4661_v6 = vunpack.i.l.bf16 %v6016_v35  ;;  %v4666_v32 = vunpack.i.l.bf16 %v5947_v11 }
 0xe46   : > { %v4750_v43 = vpop.permute.xlu1 %4749  ;;  %v4730_v47 = vpop.permute.xlu0 %4729  ;;  %4026 = vmatpush1.bf16.msra.mxu1 %v4025_v51  ;;  %v2640_v38 = vsel %vm6374_vm3, %v4746_v15, %v4747_v55  ;;  %vm6375_vm0 = vmmov %vm6374_vm3  ;;  %v4667_v51 = vunpack.i.h.bf16 %v5947_v11  ;;  %v4707_v33 = vunpack.i.h.bf16 %v5984_v7  ;;  %v4706_v11 = vunpack.i.l.bf16 %v5984_v7 }
 0xe47   : > { %v4732_v29 = vunpack.i.h.bf16 %v4730_v47  ;;  %v4731_v48 = vunpack.i.l.bf16 %v4730_v47  ;;  %v4752_v50 = vunpack.i.h.bf16 %v4750_v43  ;;  %4028 = vmatprep.subr.bf16.mxu1 %v4027_v20  ;;  %v4751_v4 = vunpack.i.l.bf16 %v4750_v43  ;;  %vm6376_vm14 = vmmov %vm6375_vm0 }
 0xe48   : > { %4074 = vmatpush1.bf16.msra.mxu0 %v4073_v10  ;;  %vm6377_vm4 = vmmov %vm6375_vm0  ;;  %v4702_v10 = vunpack.i.h.bf16 %v6066_v8  ;;  %v4701_v19 = vunpack.i.l.bf16 %v6066_v8 }
 0xe49   : > { %v2599_v44 = vsel %vm698_vm9, %v4732_v29, %v4631_v56  ;;  %v2597_v49 = vsel %vm698_vm9, %v4626_v46, %v4731_v48  ;;  %4075 = vmatprep.subr.bf16.mxu0 %v4862_v5  ;;  %v2598_v45 = vsel %vm698_vm9, %v4731_v48, %v4732_v29  ;;  %v2641_v3 = vsel %vm6375_vm0, %v4747_v55, %v4752_v50  ;;  %vm6378_vm10 = vmmov %vm6375_vm0 }
 0xe4a   : > { %v4076_v16 = vpack.c.bf16 %v2602_v14, %v2599_v44  ;;  %v4755_v52 = vpop.permute.xlu1 %4754  ;;  %v4735_v1 = vpop.permute.xlu0 %4734  ;;  %v4033_v0 = vpack.c.bf16 %v2600_v54, %v2597_v49  ;;  %4030 = vmatpush1.bf16.msra.mxu1 %v4029_v28  ;;  %v4031_v2 = vpack.c.bf16 %v2601_v26, %v2598_v45  ;;  %vm6379_vm11 = vmmov %vm6375_vm0 }
 0xe4b   : > { %v4737_v53 = vunpack.i.h.bf16 %v4735_v1  ;;  %v4736_v63 = vunpack.i.l.bf16 %v4735_v1  ;;  %v4757_v40 = vunpack.i.h.bf16 %v4755_v52  ;;  %v4756_v62 = vunpack.i.l.bf16 %v4755_v52  ;;  %vm6380_vm12 = vmmov %vm6375_vm0 }
 0xe4c   : > { %4077 = vmatpush1.bf16.msra.mxu0 %v4076_v16  ;;  %4032 = vmatprep.subr.bf16.mxu1 %v4031_v2  ;;  %v2639_v26 = vsel %vm6379_vm11, %v4637_v31, %v4746_v15  ;;  %v2643_v27 = vsel %vm6380_vm12, %v4591_v22, %v4592_v37  ;;  %vm6382_vm1 = vmmov %vm6375_vm0  ;;  %vm6392_vm12 = vcmask 736256  }
 0xe4d   : > { %v2638_v30 = vsel %vm6376_vm14, %v4737_v53, %v4751_v4  ;;  %v2636_v36 = vsel %vm6377_vm4, %v4636_v23, %v4736_v63  ;;  %4078 = vmatprep.subr.bf16.mxu0 %v4862_v5  ;;  %v2637_v61 = vsel %vm6378_vm10, %v4736_v63, %v4737_v53  ;;  %v2679_v35 = vsel %vm6381_vm15, %v4756_v62, %v4757_v40  ;;  %vm6385_vm8 = vmmov %vm6375_vm0 }
 0xe4e   : > { %v4079_v17 = vpack.c.bf16 %v2641_v3, %v2638_v30  ;;  %v4760_v41 = vpop.permute.xlu1 %4759  ;;  %v6112_v9 = vpop.permute.xlu0 %4739  ;;  %v4035_v25 = vpack.c.bf16 %v2640_v38, %v2637_v61  ;;  %v4037_v21 = vpack.c.bf16 %v2639_v26, %v2636_v36  ;;  %4034 = vmatpush1.bf16.msra.mxu1 %v4033_v0  ;;  %v2644_v56 = vsel %vm6382_vm1, %v4592_v37, %v4662_v18  ;;  %vm6386_vm3 = vmmov %vm6383_vm5 }
 0xe4f   : > { %v4762_v39 = vunpack.i.h.bf16 %v4760_v41  ;;  %v4761_v12 = vunpack.i.l.bf16 %v4760_v41  ;;  %v2642_v24 = vsel %vm6385_vm8, %v4661_v6, %v4591_v22  ;;  %v4039_v15 = vpack.c.bf16 %v2679_v35, %v2643_v27  ;;  %vm6387_vm0 = vmmov %vm6386_vm3 }
 0xe50   : > { %4080 = vmatpush1.bf16.msra.mxu0 %v4079_v17  ;;  %4036 = vmatprep.subr.bf16.mxu1 %v4035_v25  ;;  %v2685_v54 = vsel %vm6386_vm3, %v4666_v32, %v4667_v51  ;;  %v2686_v7 = vsel %vm6387_vm0, %v4667_v51, %v4707_v33  ;;  %vm6388_vm14 = vmmov %vm6387_vm0  ;;  %v4741_v23 = vunpack.i.l.bf16 %v6112_v9  ;;  %v4742_v45 = vunpack.i.h.bf16 %v6112_v9  ;;  %v2345_v9 = vld [vmem:[%s6257_s15] sm:$0xff] }
 0xe51   : > { %v2678_v59 = vsel %vm6383_vm5, %v4761_v12, %v4756_v62  ;;  %v2680_v46 = vsel %vm6384_vm13, %v4757_v40, %v4762_v39  ;;  %4081 = vmatprep.subr.bf16.mxu0 %v4862_v5  ;;  %vm6389_vm4 = vmmov %vm6387_vm0 }
 0xe52   : > { %v4082_v43 = vpack.c.bf16 %v2680_v46, %v2644_v56  ;;  %v4775_v47 = vpop.permute.xlu1 %4774  ;;  %v4765_v20 = vpop.permute.xlu0 %4764  ;;  %v4041_v29 = vpack.c.bf16 %v2678_v59, %v2642_v24  ;;  %4038 = vmatpush1.bf16.msra.mxu1 %v4037_v21  ;;  %vm6390_vm10 = vmmov %vm6387_vm0 }
 0xe53   : > { %v4767_v55 = vunpack.i.h.bf16 %v4765_v20  ;;  %v4766_v37 = vunpack.i.l.bf16 %v4765_v20  ;;  %v4777_v48 = vunpack.i.h.bf16 %v4775_v47  ;;  %v4776_v14 = vunpack.i.l.bf16 %v4775_v47  ;;  %4040 = vmatprep.subr.bf16.mxu1 %v4039_v15  ;;  %vm6391_vm11 = vmmov %vm6387_vm0 }
 0xe54   : > { %4083 = vmatpush1.bf16.msra.mxu0 %v4082_v43  ;;  %v2684_v8 = vsel %vm6390_vm10, %v4702_v10, %v4666_v32  ;;  %vm6393_vm15 = vmmov %vm6392_vm12  ;;  %vm6402_vm10 = vcmask 154624  }
 0xe55   : > { %v2683_v22 = vsel %vm6388_vm14, %v4767_v55, %v4706_v11  ;;  %v2681_v31 = vsel %vm6389_vm4, %v4701_v19, %v4766_v37  ;;  %4084 = vmatprep.subr.bf16.mxu0 %v4862_v5  ;;  %v2682_v18 = vsel %vm6391_vm11, %v4766_v37, %v4767_v55  ;;  %v2724_v63 = vsel %vm6392_vm12, %v4776_v14, %v4777_v48  ;;  %vm6394_vm1 = vmmov %vm6392_vm12 }
 0xe56   : > { %v4085_v50 = vpack.c.bf16 %v2686_v7, %v2683_v22  ;;  %v4780_v44 = vpop.permute.xlu1 %4779  ;;  %v4770_v49 = vpop.permute.xlu0 %4769  ;;  %v4045_v4 = vpack.c.bf16 %v2684_v8, %v2681_v31  ;;  %4042 = vmatpush1.bf16.msra.mxu1 %v4041_v29  ;;  %v4043_v53 = vpack.c.bf16 %v2685_v54, %v2682_v18  ;;  %vm6395_vm5 = vmmov %vm6394_vm1  ;;  %vm6401_vm4 = vmmov 0   ;;  %v2898_v54 = vld [vmem:[%s6260_s18] sm:$0x3] }
 0xe57   : > { %v4782_v28 = vunpack.i.h.bf16 %v4780_v44  ;;  %v4781_v16 = vunpack.i.l.bf16 %v4780_v44  ;;  %v4772_v52 = vunpack.i.h.bf16 %v4770_v49  ;;  %v4771_v1 = vunpack.i.l.bf16 %v4770_v49  ;;  %vm6396_vm13 = vmmov %vm6394_vm1 }
 0xe58   : > { %4086 = vmatpush1.bf16.msra.mxu0 %v4085_v50  ;;  %4044 = vmatprep.subr.bf16.mxu1 %v4043_v53  ;;  %vm6397_vm8 = vmmov %vm6394_vm1 }
 0xe59   : > { %v2725_v38 = vsel %vm6393_vm15, %v4777_v48, %v4782_v28  ;;  %v2722_v0 = vsel %vm6394_vm1, %v4772_v52, %v4781_v16  ;;  %v2720_v40 = vsel %vm6395_vm5, %v4741_v23, %v4771_v1  ;;  %4087 = vmatprep.subr.bf16.mxu0 %v4862_v5  ;;  %v2721_v62 = vsel %vm6396_vm13, %v4771_v1, %v4772_v52  ;;  %vm6398_vm3 = vmmov %vm6394_vm1 }
 0xe5a   : > { %v4088_v2 = vpack.c.bf16 %v2725_v38, %v2722_v0  ;;  %v2717_v3 = vpop.permute.xlu1 %2716  ;;  %v2715_v30 = vpop.permute.xlu0 %2714  ;;  %v4047_v36 = vpack.c.bf16 %v2724_v63, %v2721_v62  ;;  %v2723_v61 = vsel %vm6397_vm8, %v4742_v45, %v4776_v14  ;;  %4046 = vmatpush1.bf16.msra.mxu1 %v4045_v4  ;;  %vm6399_vm0 = vmmov %vm6394_vm1  ;;  %vm6406_vm1 = vcmask 900096  }
 0xe5b   : > { %v4049_v6 = vpack.c.bf16 %v2723_v61, %v2720_v40  ;;  %v2727_v26 = vsel %vm6399_vm0, %v2715_v30, %v2717_v3  ;;  %vm6400_vm14 = vmmov %vm6399_vm0  ;;  %vm6409_vm13 = vcmask 891904  }
 0xe5c   : > { %4089 = vmatpush1.bf16.msra.mxu0 %v4088_v2  ;;  %4048 = vmatprep.subr.bf16.mxu1 %v4047_v36  ;;  %vm6403_vm11 = vmmov %vm6402_vm10 }
 0xe5d   : > { %2870 = vmatprep.subr.mxu0 %v4869_v13  ;;  %vm6404_vm12 = vmmov %vm6402_vm10 }
 0xe5e   : > { %v2719_v17 = vpop.permute.xlu1 %2718  ;;  %v2713_v41 = vpop.permute.xlu0 %2712  ;;  %4050 = vmatpush1.bf16.msra.mxu1 %v4049_v6  ;;  %vm6405_vm15 = vmmov %vm6402_vm10 }
 0xe5f   : > { %v2728_v25 = vsel %vm6398_vm3, %v2717_v3, %v2719_v17  ;;  %v2726_v39 = vsel %vm6400_vm14, %v2713_v41, %v2715_v30  ;;  %2799 = vmatprep.subr.mxu1 %v2727_v26  ;;  %vm6408_vm5 = vmmov %vm6406_vm1  ;;  %vm6414_vm3 = vcmask 752640  }
 0xe60   : > { %2871 = vmatpush1.msra.mxu0 %v2728_v25  ;;  %vm6415_vm0 = vmmov %vm6414_vm3 }
 0xe61   : > { %2883 = vmatmul.mubr.f32.vlgmr.msra.gmra.mrb[16].mxu0 %v2345_v9  ;;  %4107 = vmatprep.subr.bf16.mxu0 %v4862_v5  ;;  %vm6416_vm14 = vmmov %vm6415_vm0 }
 0xe62   : > { %3693 = vmatprep.mubr.msk.f32.mxu0 %vm6401_vm4, %v4869_v13  ;;  %2800 = vmatpush1.msra.mxu1 %v2726_v39 }
 0xe63   : > { %2812 = vmatmul.mubr.f32.vlgmr.msra.gmra.mrb[14].mxu1 %v2345_v9 }
 0xe64   : > { %3102 = vmatprep.mubr.f32.mxu1 %v4869_v13 }
 0xe6f   : > { %v2741_v51 = vpop.permute.xlu0 %2740 }
 0xf34   : > { %v2884_v12 = vpop.f32.mrb[16].mxu0 }
 0xf35   : > { %v2886_v27 = vpop.f32.mrb[17].mxu0  ;;  %v2885_v32 = vadd.f32 %v2884_v12, %v2741_v51 }
 0xf36   : > { %v2813_v21 = vpop.f32.mrb[14].mxu1 }
 0xf37   : > { %v2814_v35 = vadd.f32 %v2813_v21, %v2741_v51  ;;  %v2815_v33 = vpop.f32.mrb[15].mxu1  ;;  %v2890_v59 = vmul.f32 0.2, %v2885_v32 }
 0xf38   : > { %v2816_v56 = vadd.f32 %v2815_v33, %v2741_v51 }
 0xf39   : > { %v2888_v46 = vmul.f32 0.2, %v2814_v35  ;;  %v2893_v43 = vmax.f32 %v2885_v32, %v2890_v59 }
 0xf3a   : > { %v2889_v11 = vmul.f32 0.2, %v2816_v56 }
 0xf3b   : > { %v2891_v24 = vmax.f32 %v2814_v35, %v2888_v46  ;;  %v2896_v19 = vmul.f32 %v2893_v43, %v5107_v57 }
 0xf3c   : > { %v2892_v10 = vmax.f32 %v2816_v56, %v2889_v11 }
 0xf3d   : > { %v2894_v47 = vmul.f32 %v2891_v24, %v5109_v58 }
 0xf3e   : > { %v2895_v20 = vmul.f32 %v2892_v10, %v5111_v60 }
 0xf3f   : > { %2902 = vrot.lane.b32.xlu1 %v2894_v47, %s6338_s7 }
 0xf40   : > { %2904 = vrot.lane.b32.xlu0 %v2895_v20, %s6338_s7 }
 0xf43   : > { %2906 = vrot.lane.b32.xlu1 %v2896_v19, %s6338_s7 }
 0xfb1   : > { %v6165_v55 = vpop.permute.xlu1 %2902 }
 0xfb2   : > { %v2914_v15 = vsel %vm6402_vm10, 0.0, %v6165_v55  ;;  %v2905_v57 = vpop.permute.xlu0 %2904  ;;  %vm6418_vm10 = vcmask 736256  }
 0xfb3   : > { %v2908_v60 = vsel %vm6405_vm15, %v6165_v55, %v2905_v57  ;;  %vm6421_vm15 = vcmask 588800  }
 0xfb5   : > { %v2907_v37 = vpop.permute.xlu1 %2906 }
 0xfb6   : > { %v2915_v29 = vsel %vm6403_vm11, %v2907_v37, 0.0  ;;  %v2909_v58 = vsel %vm6404_vm12, %v2905_v57, %v2907_v37  ;;  %vm6419_vm11 = vmmov %vm6418_vm10 }
 0xfb7   : > { %v4788_v48 = vpack.i.bf16 %v2915_v29, %v2914_v15  ;;  %v4823_v14 = vpack.i.bf16 %v2909_v58, %v2908_v60  ;;  %vm6420_vm12 = vmmov %vm6418_vm10 }
 0xfb9   : > { %4789 = vrot.lane.b32.xlu0 %v4788_v48, %s6322_s27  ;;  %4784 = vrot.lane.b32.xlu1 %v4788_v48, %s6323_s22 }
 0xfbd   : > { %4799 = vrot.lane.b32.xlu0 %v4788_v48, %s6350_s1  ;;  %4794 = vrot.lane.b32.xlu1 %v4788_v48, %s6347_s6 }
 0xfc1   : > { %4809 = vrot.lane.b32.xlu0 %v4788_v48, %s6352_s5  ;;  %4804 = vrot.lane.b32.xlu1 %v4788_v48, %s6324_s24 }
 0xfc5   : > { %4824 = vrot.lane.b32.xlu1 %v4823_v14, %s6347_s6  ;;  %4814 = vrot.lane.b32.xlu0 %v4823_v14, %s6323_s22 }
 0xfc9   : > { %4834 = vrot.lane.b32.xlu1 %v4823_v14, %s6324_s24  ;;  %4819 = vrot.lane.b32.xlu0 %v4823_v14, %s6322_s27 }
 0xfcd   : > { %4844 = vrot.lane.b32.xlu1 %v4823_v14, %s6354_s3  ;;  %4829 = vrot.lane.b32.xlu0 %v4823_v14, %s6350_s1 }
 0xfd1   : > { %4849 = vrot.lane.b32.xlu1 %v4788_v48, %s6354_s3  ;;  %4839 = vrot.lane.b32.xlu0 %v4823_v14, %s6352_s5  ;;  %s602_s5 = scalar_lea.vmem %s6261_s19, %s4120_s20 }
 0xfd5   : > { %3020 = vrot.lane.b32.xlu1 %v2909_v58, %s6355_s29  ;;  %3018 = vrot.lane.b32.xlu0 %v2908_v60, %s6355_s29 }
 0xfd9   : > { %3022 = vrot.lane.b32.xlu1 %v2915_v29, %s6355_s29  ;;  %3016 = vrot.lane.b32.xlu0 %v2914_v15, %s6355_s29 }
 0xfdd   : > { %3032 = vperm.xlu0 %4272, %v2898_v54  }
0x102b   : > { %v4790_v7 = vpop.permute.xlu0 %4789  ;;  %v4785_v22 = vpop.permute.xlu1 %4784 }
0x102c   : > { %v4787_v18 = vunpack.i.h.bf16 %v4785_v22  ;;  %v4786_v28 = vunpack.i.l.bf16 %v4785_v22  ;;  %v4792_v1 = vunpack.i.h.bf16 %v4790_v7  ;;  %v4791_v45 = vunpack.i.l.bf16 %v4790_v7 }
0x102f   : > { %v4800_v31 = vpop.permute.xlu0 %4799  ;;  %v4795_v8 = vpop.permute.xlu1 %4794 }
0x1030   : > { %v4802_v4 = vunpack.i.h.bf16 %v4800_v31  ;;  %v4801_v53 = vunpack.i.l.bf16 %v4800_v31  ;;  %v4797_v63 = vunpack.i.h.bf16 %v4795_v8  ;;  %v4796_v62 = vunpack.i.l.bf16 %v4795_v8 }
0x1033   : > { %v6194_v23 = vpop.permute.xlu0 %4809  ;;  %v4805_v50 = vpop.permute.xlu1 %4804 }
0x1034   : > { %v4812_v6 = vunpack.i.h.bf16 %v6194_v23  ;;  %v4811_v25 = vunpack.i.l.bf16 %v6194_v23  ;;  %v4807_v27 = vunpack.i.h.bf16 %v4805_v50  ;;  %v4806_v35 = vunpack.i.l.bf16 %v4805_v50 }
0x1037   : > { %v4825_v44 = vpop.permute.xlu1 %4824  ;;  %v4815_v49 = vpop.permute.xlu0 %4814 }
0x1038   : > { %v4817_v16 = vunpack.i.h.bf16 %v4815_v49  ;;  %v4816_v52 = vunpack.i.l.bf16 %v4815_v49  ;;  %v4827_v38 = vunpack.i.h.bf16 %v4825_v44  ;;  %v4826_v2 = vunpack.i.l.bf16 %v4825_v44 }
0x103a   : > { %v2928_v0 = vsel %vm638_vm2, %v4817_v16, %v4787_v18  ;;  %v2926_v40 = vsel %vm638_vm2, %v4786_v28, %v4816_v52  ;;  %v2927_v61 = vsel %vm638_vm2, %v4816_v52, %v4817_v16  ;;  %v2956_v51 = vsel %vm6406_vm1, %v4827_v38, %v4797_v63  ;;  %vm6407_vm2 = vmmov %vm6406_vm1 }
0x103b   : > { %v4108_v3 = vpack.c.bf16 %v2928_v0, %v2909_v58  ;;  %v4835_v30 = vpop.permute.xlu1 %4834  ;;  %v4820_v36 = vpop.permute.xlu0 %4819  ;;  %v4092_v17 = vpack.c.bf16 %v2926_v40, %v6165_v55  ;;  %v4090_v12 = vpack.c.bf16 %v2927_v61, %v2908_v60  ;;  %v2954_v33 = vsel %vm6407_vm2, %v4796_v62, %v4826_v2  ;;  %vm6422_vm1 = vmmov %vm6421_vm15 }
0x103c   : > { %v4822_v41 = vunpack.i.h.bf16 %v4820_v36  ;;  %v4821_v9 = vunpack.i.l.bf16 %v4820_v36  ;;  %v4837_v26 = vunpack.i.h.bf16 %v4835_v30  ;;  %v4836_v39 = vunpack.i.l.bf16 %v4835_v30 }
0x103d   : > { %4109 = vmatpush3.bf16.msra.mxu0 %v4108_v3  ;;  %4091 = vmatprep.subr.bf16.mxu1 %v4090_v12  ;;  %v2955_v47 = vsel %vm6408_vm5, %v4826_v2, %v4827_v38 }
0x103e   : > { %v2942_v32 = vsel %vm653_vm7, %v4822_v41, %v4792_v1  ;;  %v2940_v21 = vsel %vm653_vm7, %v4791_v45, %v4821_v9  ;;  %4110 = vmatprep.subr.bf16.mxu0 %v4862_v5  ;;  %v2941_v11 = vsel %vm653_vm7, %v4821_v9, %v4822_v41  ;;  %4094 = vmatpush1.bf16.msk.msra.mxu1 %vm5060_vm6, %v4092_v17  ;;  %vm6410_vm7 = vmmov %vm6409_vm13 }
0x103f   : > { %v4111_v56 = vpack.c.bf16 %v2956_v51, %v2942_v32  ;;  %v4845_v59 = vpop.permute.xlu1 %4844  ;;  %v4830_v46 = vpop.permute.xlu0 %4829  ;;  %v4097_v24 = vpack.c.bf16 %v2954_v33, %v2940_v21  ;;  %v2984_v20 = vsel %vm698_vm9, %v4837_v26, %v4807_v27  ;;  %v2982_v19 = vsel %vm698_vm9, %v4806_v35, %v4836_v39  ;;  %vm6411_vm6 = vmmov %vm6410_vm7 }
0x1040   : > { %v4832_v10 = vunpack.i.h.bf16 %v4830_v46  ;;  %v4831_v43 = vunpack.i.l.bf16 %v4830_v46  ;;  %v4095_v55 = vpack.c.bf16 %v2955_v47, %v2941_v11  ;;  %v2983_v37 = vsel %vm698_vm9, %v4836_v39, %v4837_v26 }
0x1041   : > { %4112 = vmatpush3.bf16.msra.mxu0 %v4111_v56  ;;  %v4847_v15 = vunpack.i.h.bf16 %v4845_v59  ;;  %v4846_v57 = vunpack.i.l.bf16 %v4845_v59  ;;  %vm6412_vm9 = vcmask 744448  }
0x1042   : > { %v2970_v29 = vsel %vm6409_vm13, %v4832_v10, %v4802_v4  ;;  %v2968_v48 = vsel %vm6410_vm7, %v4801_v53, %v4831_v43  ;;  %4113 = vmatprep.subr.bf16.mxu0 %v4862_v5  ;;  %v2969_v34 = vsel %vm6411_vm6, %v4831_v43, %v4832_v10  ;;  %4096 = vmatprep.subr.bf16.mxu1 %v4095_v55  ;;  %vm6413_vm8 = vmmov %vm6412_vm9 }
0x1043   : > { %v4114_v58 = vpack.c.bf16 %v2984_v20, %v2970_v29  ;;  %v4101_v60 = vpack.c.bf16 %v2982_v19, %v2968_v48  ;;  %v4850_v14 = vpop.permute.xlu1 %4849  ;;  %v4840_v54 = vpop.permute.xlu0 %4839  ;;  %v4099_v7 = vpack.c.bf16 %v2983_v37, %v2969_v34  ;;  %4098 = vmatpush1.bf16.msra.mxu1 %v4097_v24  ;;  %vm6417_vm4 = vmmov %vm6413_vm8 }
0x1044   : > { %v4852_v22 = vunpack.i.h.bf16 %v4850_v14  ;;  %v4851_v31 = vunpack.i.l.bf16 %v4850_v14  ;;  %v4842_v8 = vunpack.i.h.bf16 %v4840_v54  ;;  %v4841_v23 = vunpack.i.l.bf16 %v4840_v54 }
0x1045   : > { %4100 = vmatprep.subr.bf16.mxu1 %v4099_v7  ;;  %4115 = vmatpush3.bf16.msra.mxu0 %v4114_v58  ;;  %v3011_v45 = vsel %vm6417_vm4, %v4846_v57, %v4847_v15 }
0x1046   : > { %v3010_v50 = vsel %vm6412_vm9, %v4851_v31, %v4846_v57  ;;  %v3012_v44 = vsel %vm6413_vm8, %v4847_v15, %v4852_v22  ;;  %v2998_v49 = vsel %vm6414_vm3, %v4842_v8, %v4812_v6  ;;  %v2996_v18 = vsel %vm6415_vm0, %v4811_v25, %v4841_v23  ;;  %4116 = vmatprep.subr.bf16.mxu0 %v4862_v5  ;;  %v2897_v5 = vld [vmem:[%s6259_s17] sm:$0x3] }
0x1047   : > { %v4117_v28 = vpack.c.bf16 %v3012_v44, %v2998_v49  ;;  %v3021_v16 = vpop.permute.xlu1 %3020  ;;  %v3019_v52 = vpop.permute.xlu0 %3018  ;;  %v2997_v1 = vsel %vm6416_vm14, %v4841_v23, %v4842_v8  ;;  %v4105_v4 = vpack.c.bf16 %v3010_v50, %v2996_v18  ;;  %4102 = vmatpush1.bf16.msra.mxu1 %v4101_v60 }
0x1048   : > { %v4103_v53 = vpack.c.bf16 %v3011_v45, %v2997_v1  ;;  %v3025_v40 = vsel %vm6419_vm11, %v3019_v52, %v3021_v16 }
0x1049   : > { %4118 = vmatpush3.bf16.msra.mxu0 %v4117_v28 }
0x104a   : > { %4104 = vmatprep.subr.bf16.mxu1 %v4103_v53  ;;  %3691 = vmatprep.subr.mxu0 %v4869_v13  ;;  %v4887_v13 = vmov 1983009808  }
0x104b   : > { %v3023_v63 = vpop.permute.xlu1 %3022  ;;  %v3017_v38 = vpop.permute.xlu0 %3016  ;;  %4106 = vmatpush1.bf16.msra.mxu1 %v4105_v4  ;;  %v3184_v2 = vunpack.c.l.s4 %v4887_v13 }
0x104c   : > { %v3026_v0 = vsel %vm6418_vm10, %v3021_v16, %v3023_v63  ;;  %v3024_v62 = vsel %vm6420_vm12, %v3017_v38, %v3019_v52  ;;  %3054 = vmatprep.subr.mxu1 %v3025_v40 }
0x104d   : > { %3692 = vmatpush3.msra.mxu0 %v3026_v0  ;;  %v3185_v30 = vunpack.c.0.s8 %v3184_v2 }
0x104e   : > { %3694 = vmatmul.mubr.msk.f32.vlgmr.msra.gmra.mrb[18].mxu0 %vm6421_vm15, %v2897_v5 }
0x104f   : > { %3055 = vmatpush1.msra.mxu1 %v3024_v62  ;;  %v3188_v25 = vsub.s32 %v3185_v30, %v5099_v42 }
0x1050   : > { %3297 = vmatmul.mubr.msk.f32.vlgmr.msra.gmra.mrb[16].mxu1 %vm6422_vm1, %v2897_v5 }
0x105c   : > { %v3033_v61 = vpop.permute.xlu0 %3032 }
0x1121   : > { %v3175_v3 = vpop.f32.mrb[18].mxu0 }
0x1122   : > { %v3695_v36 = vpop.f32.mrb[19].mxu0  ;;  %v3176_v9 = vadd.f32 %v3175_v3, %v3033_v61 }
0x1123   : > { %v3104_v6 = vpop.f32.mrb[16].mxu1 }
0x1124   : > { %v3105_v17 = vadd.f32 %v3104_v6, %v3033_v61  ;;  %v3106_v41 = vpop.f32.mrb[17].mxu1  ;;  %v3196_v12 = vrot.slane %v3176_v9, %v3188_v25 }
0x1125   : > { %v3107_v26 = vadd.f32 %v3106_v41, %v3033_v61 }
0x1127   : > { %v3182_v39 = vcombine.low %v3105_v17, %v3107_v26 }
0x1129   : > { %v3189_v27 = vrot.slane %v3182_v39, %v3188_v25 }
0x112b   : > { %v3197_v51 = vcombine.low %v3189_v27, %v3196_v12 }
0x112d   : > { %3199 = vst [vmem:[%s602_s5] sm:$0x3f] %v3197_v51 }
0x112e PF: > { %s29_s0 = sadd.s32 1, %s4859_s0  }
0x112f   : > { %p26_p4 = scmp.ge.s32.totalorder %s29_s0, 4  }
0x1131   :  { %28 = sbr.rel (!%p26_p4) target bundleno = 11 (0xb), region = 126 }

</bundles_post_ra>
